<compile_context>
chip_gen: v7x
topology: tpu7x:2x2x1
jax: 0.10.0
libtpu: 0.0.40
codegen_flags: <defaults>
</compile_context>

<pallas_src>
import functools
import math

import jax
import jax.numpy as jnp
from jax.experimental import pallas as pl
from jax.experimental.pallas import tpu as pltpu


# ------------------------------ small helpers ---------------------------------

def _layernorm(v, g, b, eps=1e-5):
    mu = jnp.mean(v, axis=-1, keepdims=True)
    var = jnp.mean((v - mu) ** 2, axis=-1, keepdims=True)
    return (v - mu) * jax.lax.rsqrt(var + eps) * g + b


def _pick_tile(S, target):
    """Largest tile <= target that divides S and satisfies the (8,128) layout
    rule for the second-to-last block dim (multiple of 8, or the full S)."""
    if S <= target:
        return S
    for t in range(min(target, S), 7, -1):
        if S % t == 0 and t % 8 == 0:
            return t
    return S


def _vmem_cap_bytes():
    try:
        return int(pltpu.get_tpu_info().vmem_capacity_bytes)
    except Exception:
        return 64 << 20          # conservative: v7x per-core VMEM


def _probe_buffered():
    """Can this Pallas build single-buffer a BlockSpec via pipeline_mode?"""
    if not hasattr(pl, "Buffered"):
        return False
    try:
        pl.BlockSpec((8, 128), lambda i: (0, 0), pipeline_mode=pl.Buffered(1))
        return True
    except Exception:
        return False


_BUFFERED_OK = _probe_buffered()

_WEIGHT_KEYS = ("wq", "wkv", "bq", "bkv", "wo_h", "bo",
                "w1", "b1", "w2", "b2", "g1", "be1", "g2", "be2")


# ------------------------------ kernel ----------------------------------------

def _encoder_layer_kernel(*refs, nhead, compute_dtype, has_pos):
    if has_pos:
        (xq_ref, xkv_ref, qc_ref, kc_ref,
         wq_ref, wkv_ref, bq_ref, bkv_ref, wo_ref, bo_ref,
         w1_ref, b1_ref, w2_ref, b2_ref,
         g1_ref, be1_ref, g2_ref, be2_ref,
         o_ref, q_scr, m_scr, l_scr, acc_scr) = refs
    else:
        (xq_ref, xkv_ref,
         wq_ref, wkv_ref, bq_ref, bkv_ref, wo_ref, bo_ref,
         w1_ref, b1_ref, w2_ref, b2_ref,
         g1_ref, be1_ref, g2_ref, be2_ref,
         o_ref, q_scr, m_scr, l_scr, acc_scr) = refs
        qc_ref = kc_ref = None

    cdt = compute_dtype
    ki = pl.program_id(2)
    nk = pl.num_programs(2)

    x_q = xq_ref[0]                              # (TQ, E) f32, resident over ki
    TQ, E = x_q.shape
    dh = E // nhead

    # ---- first KV step: query projection (1/sqrt(dh) folded into wq/bq) and
    #      online-softmax state init --------------------------------------------
    @pl.when(ki == 0)
    def _():
        q = jnp.dot(x_q.astype(cdt), wq_ref[...],
                    preferred_element_type=jnp.float32) + bq_ref[...]
        if has_pos:
            q = q + qc_ref[0]                    # precomputed pos @ Wq (scaled)
        q_scr[...] = pltpu.einshape("qhd->hqd",
                                    q.astype(cdt).reshape(TQ, nhead, dh))
        m_scr[...] = jnp.full(m_scr.shape, -jnp.inf, jnp.float32)
        l_scr[...] = jnp.zeros(l_scr.shape, jnp.float32)
        acc_scr[...] = jnp.zeros(acc_scr.shape, jnp.float32)

    # ---- K/V projection for this KV tile + online softmax update --------------
    x_kv = xkv_ref[0]                            # (TK, E) f32
    TK = x_kv.shape[0]
    kv = jnp.dot(x_kv.astype(cdt), wkv_ref[...],
                 preferred_element_type=jnp.float32) + bkv_ref[...]   # (TK, 2E)
    k = kv[:, :E]
    if has_pos:
        k = k + kc_ref[0]                        # precomputed pos @ Wk
    v = kv[:, E:]
    k3 = pltpu.einshape("khd->hkd", k.astype(cdt).reshape(TK, nhead, dh))
    v3 = pltpu.einshape("khd->hkd", v.astype(cdt).reshape(TK, nhead, dh))

    s = jnp.einsum("hqd,hkd->hqk", q_scr[...], k3,
                   preferred_element_type=jnp.float32)                # (H,TQ,TK)
    m_prev = m_scr[...]
    m_new = jnp.maximum(m_prev, jnp.max(s, axis=-1, keepdims=True))
    alpha = jnp.exp(m_prev - m_new)
    p = jnp.exp(s - m_new)
    l_scr[...] = alpha * l_scr[...] + jnp.sum(p, axis=-1, keepdims=True)
    acc_scr[...] = alpha * acc_scr[...] + jnp.einsum(
        "hqk,hkd->hqd", p.astype(cdt), v3, preferred_element_type=jnp.float32)
    m_scr[...] = m_new

    # ---- last KV step: out-proj + residual + LN + MLP + LN ---------------------
    @pl.when(ki == nk - 1)
    def _():
        ctx = (acc_scr[...] * pl.reciprocal(l_scr[...], approx=True)).astype(cdt)
        # Per-head contraction with host-reshaped Wo (H, dh, E), summed over
        # heads: avoids transposing ctx back to (TQ, H*dh).
        attn = jnp.einsum("hqd,hde->hqe", ctx, wo_ref[...],
                          preferred_element_type=jnp.float32)         # (H,TQ,E)
        attn = jnp.sum(attn, axis=0) + bo_ref[...]
        y = _layernorm(x_q + attn, g1_ref[...], be1_ref[...])
        h = jnp.maximum(
            jnp.dot(y.astype(cdt), w1_ref[...],
                    preferred_element_type=jnp.float32) + b1_ref[...], 0.0)
        z = jnp.dot(h.astype(cdt), w2_ref[...],
                    preferred_element_type=jnp.float32) + b2_ref[...]
        o_ref[0] = _layernorm(y + z, g2_ref[...], be2_ref[...])


# ------------------------------ host-side layer prep --------------------------

def _prepare_layer(p, nhead, compute_dtype):
    """Fold 1/sqrt(dh) into q weights/bias, split the fused QKV weight into
    q / kv parts, reshape Wo to (H, dh, E) and cast matmul weights to the
    compute dtype.  Biases / layernorm params stay f32."""
    E = p["wo"].shape[0]
    dh = E // nhead
    scale = 1.0 / math.sqrt(dh)
    wqkv = p["wqkv"].astype(jnp.float32)
    bqkv = p["bqkv"].astype(jnp.float32)
    wq = wqkv[:, :E] * scale
    bq = bqkv[:, :E] * scale
    wkv = wqkv[:, E:]
    bkv = bqkv[:, E:]
    return {
        "wq":  wq.astype(compute_dtype),
        "wkv": wkv.astype(compute_dtype),
        "bq":  bq,
        "bkv": bkv,
        "wo_h": p["wo"].astype(compute_dtype).reshape(nhead, dh, E),
        "bo":  p["bo"].astype(jnp.float32),
        "w1":  p["w1"].astype(compute_dtype),
        "b1":  p["b1"].astype(jnp.float32),
        "w2":  p["w2"].astype(compute_dtype),
        "b2":  p["b2"].astype(jnp.float32),
        "g1":  p["g1"].astype(jnp.float32),
        "be1": p["be1"].astype(jnp.float32),
        "g2":  p["g2"].astype(jnp.float32),
        "be2": p["be2"].astype(jnp.float32),
        # f32 copies used only OUTSIDE the kernel to fold pos into q/k.
        "wq_pos": wq,
        "wk_pos": wkv[:, :E],
    }


def _vmem_limit_bytes(prep, tq, tk, E, F, H, dh, compute_dtype, has_pos):
    cap = _vmem_cap_bytes()
    wbytes = sum(int(prep[k].size) * prep[k].dtype.itemsize for k in _WEIGHT_KEYS)
    itm = jnp.dtype(compute_dtype).itemsize
    blocks = 2 * 4 * (tq * E + tk * E)            # x_q / x_kv double buffers
    if has_pos:
        blocks += 2 * 4 * (tq * E + tk * E)       # q/k correction blocks
    blocks += 2 * 4 * tq * E                      # output double buffer
    scratch = H * tq * dh * (itm + 4) + 2 * H * tq * 128 * 4
    interm = (4 * tk * 2 * E + 2 * 4 * H * tq * tk + 4 * H * tq * E
              + 4 * tq * F + 6 * 4 * tq * E)
    need = wbytes + blocks + scratch + interm + (4 << 20)
    return int(max(16 << 20, min(need, int(cap * 0.85))))


# ------------------------------ pallas_call wrapper ----------------------------

def _layer_call(xb, corr, prep, *, nhead, compute_dtype, tq, tk,
                vmem_limit, single_buffer):
    B, S, E = xb.shape
    H = nhead
    dh = E // H
    F = prep["w1"].shape[1]
    nq = S // tq
    nk = S // tk
    has_pos = corr is not None

    def const_spec(shape):
        idx = lambda b, qi, ki: (0,) * len(shape)
        if single_buffer and _BUFFERED_OK:
            try:
                return pl.BlockSpec(shape, idx, pipeline_mode=pl.Buffered(1))
            except Exception:
                pass
        return pl.BlockSpec(shape, idx)

    q_spec = pl.BlockSpec((1, tq, E), lambda b, qi, ki: (b, qi, 0))
    kv_spec = pl.BlockSpec((1, tk, E), lambda b, qi, ki: (b, ki, 0))
    out_spec = pl.BlockSpec((1, tq, E), lambda b, qi, ki: (b, qi, 0))

    in_args = [xb, xb]
    in_specs = [q_spec, kv_spec]
    if has_pos:
        qc, kc = corr
        Bc = qc.shape[0]
        qidx = (lambda b, qi, ki: (0, qi, 0)) if Bc == 1 else (lambda b, qi, ki: (b, qi, 0))
        kidx = (lambda b, qi, ki: (0, ki, 0)) if Bc == 1 else (lambda b, qi, ki: (b, ki, 0))
        in_args += [qc, kc]
        in_specs += [pl.BlockSpec((1, tq, E), qidx),
                     pl.BlockSpec((1, tk, E), kidx)]

    wshapes = {"wq": (E, E), "wkv": (E, 2 * E), "bq": (1, E), "bkv": (1, 2 * E),
               "wo_h": (H, dh, E), "bo": (1, E), "w1": (E, F), "b1": (1, F),
               "w2": (F, E), "b2": (1, E), "g1": (1, E), "be1": (1, E),
               "g2": (1, E), "be2": (1, E)}
    for key in _WEIGHT_KEYS:
        in_args.append(prep[key])
        in_specs.append(const_spec(wshapes[key]))

    kernel = functools.partial(_encoder_layer_kernel, nhead=nhead,
                               compute_dtype=compute_dtype, has_pos=has_pos)

    # NOTE: no input_output_aliases here — the KV-indexed view re-reads rows
    # that another q-tile's output would already have overwritten in place.
    return pl.pallas_call(
        kernel,
        out_shape=jax.ShapeDtypeStruct((B, S, E), jnp.float32),
        grid_spec=pltpu.PrefetchScalarGridSpec(
            num_scalar_prefetch=0,
            grid=(B, nq, nk),
            in_specs=in_specs,
            out_specs=out_spec,
            scratch_shapes=[
                pltpu.VMEM((H, tq, dh), compute_dtype),   # q (pre-scaled)
                pltpu.VMEM((H, tq, 1), jnp.float32),      # running max
                pltpu.VMEM((H, tq, 1), jnp.float32),      # running denom
                pltpu.VMEM((H, tq, dh), jnp.float32),     # context accumulator
            ]),
        compiler_params=pltpu.CompilerParams(
            dimension_semantics=("parallel", "parallel", "arbitrary"),
            vmem_limit_bytes=vmem_limit),
    )(*in_args)


@functools.partial(jax.jit,
                   static_argnames=("nhead", "compute_dtype", "q_block",
                                    "kv_block", "single_buffer"))
def _forward(xb, pos_b, prepared, *, nhead, compute_dtype, q_block, kv_block,
             single_buffer):
    B, S, E = xb.shape
    H = nhead
    dh = E // H
    F = prepared[0]["w1"].shape[1]
    tq = _pick_tile(S, q_block)
    tk = _pick_tile(S, kv_block)
    has_pos = pos_b is not None
    vmem_limit = _vmem_limit_bytes(prepared[0], tq, tk, E, F, H, dh,
                                   compute_dtype, has_pos)
    for prep in prepared:
        if has_pos:
            # Per-layer pos corrections, computed once outside the kernel
            # (pos is typically batch-broadcast, so this is tiny).
            corr = (jnp.einsum("bse,ef->bsf", pos_b, prep["wq_pos"]),
                    jnp.einsum("bse,ef->bsf", pos_b, prep["wk_pos"]))
        else:
            corr = None
        xb = _layer_call(xb, corr, prep, nhead=nhead,
                         compute_dtype=compute_dtype, tq=tq, tk=tk,
                         vmem_limit=vmem_limit, single_buffer=single_buffer)
    return xb


def transformer_encoder(x, params, *, nhead, pos=None,
                        compute_dtype=jnp.bfloat16, q_block=256, kv_block=256):
    """x: (S, B, E) float32, seq-first (PyTorch MultiheadAttention layout).
    Use q_block=kv_block=128 on v5e; 256 (default) on v6e/v7x."""
    x = jnp.asarray(x, jnp.float32)
    xb = jnp.transpose(x, (1, 0, 2))                          # (B, S, E)
    if pos is None:
        pos_b = None
    else:
        pos = jnp.asarray(pos, jnp.float32)
        if pos.ndim == 2:
            pos = pos[:, None, :]
        pos_b = jnp.transpose(pos, (1, 0, 2))                 # (Bp, S, E), Bp∈{1,B}
    prepared = [_prepare_layer(p, nhead, compute_dtype) for p in params]
    kwargs = dict(nhead=nhead, compute_dtype=compute_dtype,
                  q_block=int(q_block), kv_block=int(kv_block))
    if _BUFFERED_OK:
        try:
            out_b = _forward(xb, pos_b, prepared, single_buffer=True, **kwargs)
        except Exception:
            out_b = _forward(xb, pos_b, prepared, single_buffer=False, **kwargs)
    else:
        out_b = _forward(xb, pos_b, prepared, single_buffer=False, **kwargs)
    return jnp.transpose(out_b, (1, 0, 2))                    # back to (S, B, E)


# ------------------------------ params -----------------------------------------

def init_params(key, emb_dim, nhead, num_layers, dim_forward=2048):
    params = []
    for _ in range(num_layers):
        ks = jax.random.split(key, 9)
        key = ks[0]
        p = {
            "wqkv": jax.random.normal(ks[1], (emb_dim, 3 * emb_dim), jnp.float32) * 0.02,
            "bqkv": jax.random.normal(ks[2], (1, 3 * emb_dim), jnp.float32) * 0.02,
            "wo":   jax.random.normal(ks[3], (emb_dim, emb_dim), jnp.float32) * 0.02,
            "bo":   jax.random.normal(ks[4], (1, emb_dim), jnp.float32) * 0.02,
            "w1":   jax.random.normal(ks[5], (emb_dim, dim_forward), jnp.float32) * 0.02,
            "b1":   jax.random.normal(ks[6], (1, dim_forward), jnp.float32) * 0.02,
            "w2":   jax.random.normal(ks[7], (dim_forward, emb_dim), jnp.float32) * 0.02,
            "b2":   jax.random.normal(ks[8], (1, emb_dim), jnp.float32) * 0.02,
            "g1":   jnp.ones((1, emb_dim), jnp.float32),
            "be1":  jnp.zeros((1, emb_dim), jnp.float32),
            "g2":   jnp.ones((1, emb_dim), jnp.float32),
            "be2":  jnp.zeros((1, emb_dim), jnp.float32),
        }
        params.append(p)
    return params


# ------------------------------ reference (pure JAX) ----------------------------

def ref_forward(x, params, *, nhead, pos=None):
    S, B, E = x.shape
    xb = jnp.transpose(x, (1, 0, 2))
    if pos is None:
        pos_b = jnp.zeros_like(xb)
    else:
        pos_b = jnp.transpose(jnp.broadcast_to(pos, x.shape), (1, 0, 2))
    dh = E // nhead
    for p in params:
        q_in = xb + pos_b
        qp = jnp.einsum("bse,ef->bsf", q_in, p["wqkv"][:, :E]) + p["bqkv"][0, :E]
        kp = jnp.einsum("bse,ef->bsf", q_in, p["wqkv"][:, E:2 * E]) + p["bqkv"][0, E:2 * E]
        vp = jnp.einsum("bse,ef->bsf", xb, p["wqkv"][:, 2 * E:]) + p["bqkv"][0, 2 * E:]
        qh = qp.reshape(B, S, nhead, dh)
        kh = kp.reshape(B, S, nhead, dh)
        vh = vp.reshape(B, S, nhead, dh)
        s = jnp.einsum("bqhd,bkhd->bhqk", qh, kh) / math.sqrt(dh)
        a = jax.nn.softmax(s, axis=-1)
        ctx = jnp.einsum("bhqk,bkhd->bqhd", a, vh).reshape(B, S, E)
        attn = ctx @ p["wo"] + p["bo"][0]
        y = _layernorm(xb + attn, p["g1"][0], p["be1"][0])
        h = jax.nn.relu(y @ p["w1"] + p["b1"][0])
        z = h @ p["w2"] + p["b2"][0]
        xb = _layernorm(y + z, p["g2"][0], p["be2"][0])
    return jnp.transpose(xb, (1, 0, 2))


# ------------------------------ main --------------------------------------------

if __name__ == "__main__":
    EMB, NHEAD, NLAYERS, FF = 32, 4, 2, 128
    SEQ, BATCH = 8, 2

    key = jax.random.PRNGKey(0)
    kx, kp, kpos, kx2 = jax.random.split(key, 4)
    x = jax.random.normal(kx, (SEQ, BATCH, EMB), jnp.float32)      # (S, B, E)
    params = init_params(kp, EMB, NHEAD, NLAYERS, dim_forward=FF)

    ref = jax.block_until_ready(ref_forward(x, params, nhead=NHEAD, pos=None))

    # f32 path, pos=None (matches the module default usage).
    out = jax.block_until_ready(
        transformer_encoder(x, params, nhead=NHEAD, pos=None,
                            compute_dtype=jnp.float32))
    assert out.shape == (SEQ, BATCH, EMB)
    err = float(jnp.max(jnp.abs(out - ref)))
    assert err < 5e-3, f"f32 kernel/ref mismatch: {err}"

    # bf16 weights/activations with f32 accumulation (MXU path).
    out_bf = jax.block_until_ready(
        transformer_encoder(x, params, nhead=NHEAD, pos=None,
                            compute_dtype=jnp.bfloat16))
    err_bf = float(jnp.max(jnp.abs(out_bf - ref)))
    assert err_bf < 8e-2, f"bf16 kernel/ref mismatch: {err_bf}"

    # pos path (positional embedding added to q/k only; value uses x).
    pos = jax.random.normal(kpos, (SEQ, 1, EMB), jnp.float32) * 0.1
    out_pos = jax.block_until_ready(
        transformer_encoder(x, params, nhead=NHEAD, pos=pos,
                            compute_dtype=jnp.float32))
    ref_pos = jax.block_until_ready(ref_forward(x, params, nhead=NHEAD, pos=pos))
    err_pos = float(jnp.max(jnp.abs(out_pos - ref_pos)))
    assert err_pos < 5e-3, f"pos kernel/ref mismatch: {err_pos}"

    # Multi-tile flash path: SEQ=16 with 8-wide q/kv tiles exercises the
    # online-softmax accumulation across several KV blocks and the
    # (B, n_q, n_kv) grid.
    SEQ2 = 16
    x2 = jax.random.normal(kx2, (SEQ2, BATCH, EMB), jnp.float32)
    out_t = jax.block_until_ready(
        transformer_encoder(x2, params, nhead=NHEAD, pos=None,
                            compute_dtype=jnp.float32, q_block=8, kv_block=8))
    ref_t = jax.block_until_ready(ref_forward(x2, params, nhead=NHEAD, pos=None))
    err_t = float(jnp.max(jnp.abs(out_t - ref_t)))
    assert err_t < 5e-3, f"tiled kernel/ref mismatch: {err_t}"

    print("KERNEL_OK")
</pallas_src>

<mosaic_0001>
module attributes {stable_mosaic.version = 11 : i64} {
  func.func @_encoder_layer_kernel(%arg0: i32, %arg1: i32, %arg2: i32, %arg3: memref<1x8x32xf32, #tpu.memory_space<vmem>>, %arg4: memref<1x8x32xf32, #tpu.memory_space<vmem>>, %arg5: memref<32x32xf32, #tpu.memory_space<vmem>>, %arg6: memref<32x64xf32, #tpu.memory_space<vmem>>, %arg7: memref<1x32xf32, #tpu.memory_space<vmem>>, %arg8: memref<1x64xf32, #tpu.memory_space<vmem>>, %arg9: memref<4x8x32xf32, #tpu.memory_space<vmem>>, %arg10: memref<1x32xf32, #tpu.memory_space<vmem>>, %arg11: memref<32x128xf32, #tpu.memory_space<vmem>>, %arg12: memref<1x128xf32, #tpu.memory_space<vmem>>, %arg13: memref<128x32xf32, #tpu.memory_space<vmem>>, %arg14: memref<1x32xf32, #tpu.memory_space<vmem>>, %arg15: memref<1x32xf32, #tpu.memory_space<vmem>>, %arg16: memref<1x32xf32, #tpu.memory_space<vmem>>, %arg17: memref<1x32xf32, #tpu.memory_space<vmem>>, %arg18: memref<1x32xf32, #tpu.memory_space<vmem>>, %arg19: memref<1x8x32xf32, #tpu.memory_space<vmem>>, %arg20: memref<4x8x8xf32, #tpu.memory_space<vmem>>, %arg21: memref<4x8x1xf32, #tpu.memory_space<vmem>>, %arg22: memref<4x8x1xf32, #tpu.memory_space<vmem>>, %arg23: memref<4x8x8xf32, #tpu.memory_space<vmem>>) attributes {dimension_semantics = [#tpu.dimension_semantics<parallel>, #tpu.dimension_semantics<parallel>, #tpu.dimension_semantics<arbitrary>], iteration_bounds = array<i64: 2, 1, 1>, scalar_prefetch = 0 : i64, scratch_operands = 4 : i64, tpu.core_type = #tpu.core_type<tc>, window_params = [{transform_indices = @transform_0, window_bounds = array<i64: 1, 8, 32>}, {transform_indices = @transform_1, window_bounds = array<i64: 1, 8, 32>}, {pipeline_mode = #tpu.pipeline_mode<synchronous>, transform_indices = @transform_2, window_bounds = array<i64: 32, 32>}, {pipeline_mode = #tpu.pipeline_mode<synchronous>, transform_indices = @transform_3, window_bounds = array<i64: 32, 64>}, {pipeline_mode = #tpu.pipeline_mode<synchronous>, transform_indices = @transform_4, window_bounds = array<i64: 1, 32>}, {pipeline_mode = #tpu.pipeline_mode<synchronous>, transform_indices = @transform_5, window_bounds = array<i64: 1, 64>}, {pipeline_mode = #tpu.pipeline_mode<synchronous>, transform_indices = @transform_6, window_bounds = array<i64: 4, 8, 32>}, {pipeline_mode = #tpu.pipeline_mode<synchronous>, transform_indices = @transform_7, window_bounds = array<i64: 1, 32>}, {pipeline_mode = #tpu.pipeline_mode<synchronous>, transform_indices = @transform_8, window_bounds = array<i64: 32, 128>}, {pipeline_mode = #tpu.pipeline_mode<synchronous>, transform_indices = @transform_9, window_bounds = array<i64: 1, 128>}, {pipeline_mode = #tpu.pipeline_mode<synchronous>, transform_indices = @transform_10, window_bounds = array<i64: 128, 32>}, {pipeline_mode = #tpu.pipeline_mode<synchronous>, transform_indices = @transform_11, window_bounds = array<i64: 1, 32>}, {pipeline_mode = #tpu.pipeline_mode<synchronous>, transform_indices = @transform_12, window_bounds = array<i64: 1, 32>}, {pipeline_mode = #tpu.pipeline_mode<synchronous>, transform_indices = @transform_13, window_bounds = array<i64: 1, 32>}, {pipeline_mode = #tpu.pipeline_mode<synchronous>, transform_indices = @transform_14, window_bounds = array<i64: 1, 32>}, {pipeline_mode = #tpu.pipeline_mode<synchronous>, transform_indices = @transform_15, window_bounds = array<i64: 1, 32>}, {transform_indices = @transform_16, window_bounds = array<i64: 1, 8, 32>}]} {
    %c0 = arith.constant 0 : index
    %c0_0 = arith.constant 0 : index
    %c0_1 = arith.constant 0 : index
    %0 = vector.load %arg3[%c0, %c0_0, %c0_1] : memref<1x8x32xf32, #tpu.memory_space<vmem>>, vector<1x8x32xf32>
    %1 = vector.shape_cast %0 : vector<1x8x32xf32> to vector<8x32xf32>
    %c0_i32 = arith.constant 0 : i32
    %2 = arith.cmpi eq, %arg2, %c0_i32 : i32
    %3 = arith.extui %2 : i1 to i32
    %c0_i32_2 = arith.constant 0 : i32
    %4 = arith.cmpi ne, %3, %c0_i32_2 : i32
    scf.if %4 {
      %c0_37 = arith.constant 0 : index
      %c0_38 = arith.constant 0 : index
      %45 = vector.load %arg5[%c0_37, %c0_38] : memref<32x32xf32, #tpu.memory_space<vmem>>, vector<32x32xf32>
      %cst_39 = arith.constant dense<0.000000e+00> : vector<8x32xf32>
      %46 = tpu.matmul %1, %45, %cst_39 {dimension_numbers = #tpu.dot_dimension_numbers<[1], [0], [0], [1], [0, 0, 1, 1], [], []>} : vector<8x32xf32>, vector<32x32xf32>, vector<8x32xf32> -> vector<8x32xf32>
      %c0_40 = arith.constant 0 : index
      %c0_41 = arith.constant 0 : index
      %47 = vector.load %arg7[%c0_40, %c0_41] : memref<1x32xf32, #tpu.memory_space<vmem>>, vector<1x32xf32>
      %48 = vector.broadcast %47 : vector<1x32xf32> to vector<8x32xf32>
      %49 = arith.addf %46, %48 : vector<8x32xf32>
      %50 = vector.shape_cast %49 : vector<8x32xf32> to vector<8x4x8xf32>
      %51 = tpu.transpose %50, [1, 0, 2] : vector<8x4x8xf32> -> vector<4x8x8xf32>
      %c0_42 = arith.constant 0 : index
      %c0_43 = arith.constant 0 : index
      %c0_44 = arith.constant 0 : index
      %52 = vector.load %arg20[%c0_42, %c0_43, %c0_44] : memref<4x8x8xf32, #tpu.memory_space<vmem>>, vector<4x8x8xf32>
      tpu.vector_store %arg20[%c0_42, %c0_43, %c0_44], %51 {strides = array<i32>} : memref<4x8x8xf32, #tpu.memory_space<vmem>>, vector<4x8x8xf32>,
      %cst_45 = arith.constant 0xFF800000 : f32
      %53 = vector.broadcast %cst_45 : f32 to vector<4x8x1xf32>
      %c0_46 = arith.constant 0 : index
      %c0_47 = arith.constant 0 : index
      %c0_48 = arith.constant 0 : index
      %54 = vector.load %arg21[%c0_46, %c0_47, %c0_48] : memref<4x8x1xf32, #tpu.memory_space<vmem>>, vector<4x8x1xf32>
      tpu.vector_store %arg21[%c0_46, %c0_47, %c0_48], %53 {strides = array<i32>} : memref<4x8x1xf32, #tpu.memory_space<vmem>>, vector<4x8x1xf32>,
      %cst_49 = arith.constant 0.000000e+00 : f32
      %55 = vector.broadcast %cst_49 : f32 to vector<4x8x1xf32>
      %c0_50 = arith.constant 0 : index
      %c0_51 = arith.constant 0 : index
      %c0_52 = arith.constant 0 : index
      %56 = vector.load %arg22[%c0_50, %c0_51, %c0_52] : memref<4x8x1xf32, #tpu.memory_space<vmem>>, vector<4x8x1xf32>
      tpu.vector_store %arg22[%c0_50, %c0_51, %c0_52], %55 {strides = array<i32>} : memref<4x8x1xf32, #tpu.memory_space<vmem>>, vector<4x8x1xf32>,
      %cst_53 = arith.constant 0.000000e+00 : f32
      %57 = vector.broadcast %cst_53 : f32 to vector<4x8x8xf32>
      %c0_54 = arith.constant 0 : index
      %c0_55 = arith.constant 0 : index
      %c0_56 = arith.constant 0 : index
      %58 = vector.load %arg23[%c0_54, %c0_55, %c0_56] : memref<4x8x8xf32, #tpu.memory_space<vmem>>, vector<4x8x8xf32>
      tpu.vector_store %arg23[%c0_54, %c0_55, %c0_56], %57 {strides = array<i32>} : memref<4x8x8xf32, #tpu.memory_space<vmem>>, vector<4x8x8xf32>,
    } else {
    }
    %c0_3 = arith.constant 0 : index
    %c0_4 = arith.constant 0 : index
    %c0_5 = arith.constant 0 : index
    %5 = vector.load %arg4[%c0_3, %c0_4, %c0_5] : memref<1x8x32xf32, #tpu.memory_space<vmem>>, vector<1x8x32xf32>
    %6 = vector.shape_cast %5 : vector<1x8x32xf32> to vector<8x32xf32>
    %c0_6 = arith.constant 0 : index
    %c0_7 = arith.constant 0 : index
    %7 = vector.load %arg6[%c0_6, %c0_7] : memref<32x64xf32, #tpu.memory_space<vmem>>, vector<32x64xf32>
    %cst = arith.constant dense<0.000000e+00> : vector<8x64xf32>
    %8 = tpu.matmul %6, %7, %cst {dimension_numbers = #tpu.dot_dimension_numbers<[1], [0], [0], [1], [0, 0, 1, 1], [], []>} : vector<8x32xf32>, vector<32x64xf32>, vector<8x64xf32> -> vector<8x64xf32>
    %c0_8 = arith.constant 0 : index
    %c0_9 = arith.constant 0 : index
    %9 = vector.load %arg8[%c0_8, %c0_9] : memref<1x64xf32, #tpu.memory_space<vmem>>, vector<1x64xf32>
    %10 = vector.broadcast %9 : vector<1x64xf32> to vector<8x64xf32>
    %11 = arith.addf %8, %10 : vector<8x64xf32>
    %12 = vector.extract_strided_slice %11 {offsets = [0, 0], sizes = [8, 32], strides = [1, 1]} : vector<8x64xf32> to vector<8x32xf32>
    %13 = vector.extract_strided_slice %11 {offsets = [0, 32], sizes = [8, 32], strides = [1, 1]} : vector<8x64xf32> to vector<8x32xf32>
    %14 = vector.shape_cast %12 : vector<8x32xf32> to vector<8x4x8xf32>
    %15 = tpu.transpose %14, [1, 0, 2] : vector<8x4x8xf32> -> vector<4x8x8xf32>
    %16 = vector.shape_cast %13 : vector<8x32xf32> to vector<8x4x8xf32>
    %17 = tpu.transpose %16, [1, 0, 2] : vector<8x4x8xf32> -> vector<4x8x8xf32>
    %c0_10 = arith.constant 0 : index
    %c0_11 = arith.constant 0 : index
    %c0_12 = arith.constant 0 : index
    %18 = vector.load %arg20[%c0_10, %c0_11, %c0_12] : memref<4x8x8xf32, #tpu.memory_space<vmem>>, vector<4x8x8xf32>
    "tpu.trace_start"() <{level = 10 : i32, message = "hqd,hkd->hqk"}> : () -> ()
    %cst_13 = arith.constant dense<0.000000e+00> : vector<4x8x8xf32>
    %19 = tpu.matmul %18, %15, %cst_13 {dimension_numbers = #tpu.dot_dimension_numbers<[2], [2], [1], [1], [0, 0, 0, 1, 1, 1], [0], [0]>} : vector<4x8x8xf32>, vector<4x8x8xf32>, vector<4x8x8xf32> -> vector<4x8x8xf32>
    "tpu.trace_stop"() : () -> ()
    %c0_14 = arith.constant 0 : index
    %c0_15 = arith.constant 0 : index
    %c0_16 = arith.constant 0 : index
    %20 = vector.load %arg21[%c0_14, %c0_15, %c0_16] : memref<4x8x1xf32, #tpu.memory_space<vmem>>, vector<4x8x1xf32>
    %cst_17 = arith.constant dense<0xFF800000> : vector<4x8xf32>
    %21 = vector.multi_reduction <maximumf>, %19, %cst_17 [2] : vector<4x8x8xf32> to vector<4x8xf32>
    %22 = vector.shape_cast %21 : vector<4x8xf32> to vector<4x8x1xf32>
    %23 = arith.maximumf %20, %22 : vector<4x8x1xf32>
    %24 = arith.subf %20, %23 : vector<4x8x1xf32>
    %25 = math.exp %24 : vector<4x8x1xf32>
    %26 = vector.broadcast %23 : vector<4x8x1xf32> to vector<4x8x8xf32>
    %27 = arith.subf %19, %26 : vector<4x8x8xf32>
    %28 = math.exp %27 : vector<4x8x8xf32>
    %c0_18 = arith.constant 0 : index
    %c0_19 = arith.constant 0 : index
    %c0_20 = arith.constant 0 : index
    %29 = vector.load %arg22[%c0_18, %c0_19, %c0_20] : memref<4x8x1xf32, #tpu.memory_space<vmem>>, vector<4x8x1xf32>
    %30 = arith.mulf %25, %29 : vector<4x8x1xf32>
    %cst_21 = arith.constant dense<0.000000e+00> : vector<4x8xf32>
    %31 = vector.multi_reduction <add>, %28, %cst_21 [2] : vector<4x8x8xf32> to vector<4x8xf32>
    %32 = vector.shape_cast %31 : vector<4x8xf32> to vector<4x8x1xf32>
    %33 = arith.addf %30, %32 : vector<4x8x1xf32>
    %c0_22 = arith.constant 0 : index
    %c0_23 = arith.constant 0 : index
    %c0_24 = arith.constant 0 : index
    %34 = vector.load %arg22[%c0_22, %c0_23, %c0_24] : memref<4x8x1xf32, #tpu.memory_space<vmem>>, vector<4x8x1xf32>
    tpu.vector_store %arg22[%c0_22, %c0_23, %c0_24], %33 {strides = array<i32>} : memref<4x8x1xf32, #tpu.memory_space<vmem>>, vector<4x8x1xf32>,
    %c0_25 = arith.constant 0 : index
    %c0_26 = arith.constant 0 : index
    %c0_27 = arith.constant 0 : index
    %35 = vector.load %arg23[%c0_25, %c0_26, %c0_27] : memref<4x8x8xf32, #tpu.memory_space<vmem>>, vector<4x8x8xf32>
    %36 = vector.broadcast %25 : vector<4x8x1xf32> to vector<4x8x8xf32>
    %37 = arith.mulf %36, %35 : vector<4x8x8xf32>
    "tpu.trace_start"() <{level = 10 : i32, message = "hqk,hkd->hqd"}> : () -> ()
    %cst_28 = arith.constant dense<0.000000e+00> : vector<4x8x8xf32>
    %38 = tpu.matmul %28, %17, %cst_28 {dimension_numbers = #tpu.dot_dimension_numbers<[2], [1], [1], [2], [0, 0, 0, 1, 1, 2], [0], [0]>} : vector<4x8x8xf32>, vector<4x8x8xf32>, vector<4x8x8xf32> -> vector<4x8x8xf32>
    "tpu.trace_stop"() : () -> ()
    %39 = arith.addf %37, %38 : vector<4x8x8xf32>
    %c0_29 = arith.constant 0 : index
    %c0_30 = arith.constant 0 : index
    %c0_31 = arith.constant 0 : index
    %40 = vector.load %arg23[%c0_29, %c0_30, %c0_31] : memref<4x8x8xf32, #tpu.memory_space<vmem>>, vector<4x8x8xf32>
    tpu.vector_store %arg23[%c0_29, %c0_30, %c0_31], %39 {strides = array<i32>} : memref<4x8x8xf32, #tpu.memory_space<vmem>>, vector<4x8x8xf32>,
    %c0_32 = arith.constant 0 : index
    %c0_33 = arith.constant 0 : index
    %c0_34 = arith.constant 0 : index
    %41 = vector.load %arg21[%c0_32, %c0_33, %c0_34] : memref<4x8x1xf32, #tpu.memory_space<vmem>>, vector<4x8x1xf32>
    tpu.vector_store %arg21[%c0_32, %c0_33, %c0_34], %23 {strides = array<i32>} : memref<4x8x1xf32, #tpu.memory_space<vmem>>, vector<4x8x1xf32>,
    %c0_i32_35 = arith.constant 0 : i32
    %42 = arith.cmpi eq, %arg2, %c0_i32_35 : i32
    %43 = arith.extui %42 : i1 to i32
    %c0_i32_36 = arith.constant 0 : i32
    %44 = arith.cmpi ne, %43, %c0_i32_36 : i32
    scf.if %44 {
      %c0_37 = arith.constant 0 : index
      %c0_38 = arith.constant 0 : index
      %c0_39 = arith.constant 0 : index
      %45 = vector.load %arg23[%c0_37, %c0_38, %c0_39] : memref<4x8x8xf32, #tpu.memory_space<vmem>>, vector<4x8x8xf32>
      %c0_40 = arith.constant 0 : index
      %c0_41 = arith.constant 0 : index
      %c0_42 = arith.constant 0 : index
      %46 = vector.load %arg22[%c0_40, %c0_41, %c0_42] : memref<4x8x1xf32, #tpu.memory_space<vmem>>, vector<4x8x1xf32>
      %47 = tpu.reciprocal %46 {approx = true} : vector<4x8x1xf32> -> vector<4x8x1xf32>
      %48 = vector.broadcast %47 : vector<4x8x1xf32> to vector<4x8x8xf32>
      %49 = arith.mulf %45, %48 : vector<4x8x8xf32>
      %c0_43 = arith.constant 0 : index
      %c0_44 = arith.constant 0 : index
      %c0_45 = arith.constant 0 : index
      %50 = vector.load %arg9[%c0_43, %c0_44, %c0_45] : memref<4x8x32xf32, #tpu.memory_space<vmem>>, vector<4x8x32xf32>
      "tpu.trace_start"() <{level = 10 : i32, message = "hqd,hde->hqe"}> : () -> ()
      %cst_46 = arith.constant dense<0.000000e+00> : vector<4x8x32xf32>
      %51 = tpu.matmul %49, %50, %cst_46 {dimension_numbers = #tpu.dot_dimension_numbers<[2], [1], [1], [2], [0, 0, 0, 1, 1, 2], [0], [0]>} : vector<4x8x8xf32>, vector<4x8x32xf32>, vector<4x8x32xf32> -> vector<4x8x32xf32>
      "tpu.trace_stop"() : () -> ()
      %cst_47 = arith.constant dense<0.000000e+00> : vector<8x32xf32>
      %52 = vector.multi_reduction <add>, %51, %cst_47 [0] : vector<4x8x32xf32> to vector<8x32xf32>
      %c0_48 = arith.constant 0 : index
      %c0_49 = arith.constant 0 : index
      %53 = vector.load %arg10[%c0_48, %c0_49] : memref<1x32xf32, #tpu.memory_space<vmem>>, vector<1x32xf32>
      %54 = vector.broadcast %53 : vector<1x32xf32> to vector<8x32xf32>
      %55 = arith.addf %52, %54 : vector<8x32xf32>
      %56 = arith.addf %1, %55 : vector<8x32xf32>
      %c0_50 = arith.constant 0 : index
      %c0_51 = arith.constant 0 : index
      %57 = vector.load %arg15[%c0_50, %c0_51] : memref<1x32xf32, #tpu.memory_space<vmem>>, vector<1x32xf32>
      %c0_52 = arith.constant 0 : index
      %c0_53 = arith.constant 0 : index
      %58 = vector.load %arg16[%c0_52, %c0_53] : memref<1x32xf32, #tpu.memory_space<vmem>>, vector<1x32xf32>
      %cst_54 = arith.constant dense<0.000000e+00> : vector<8xf32>
      %59 = vector.multi_reduction <add>, %56, %cst_54 [1] : vector<8x32xf32> to vector<8xf32>
      %60 = vector.shape_cast %59 : vector<8xf32> to vector<8x1xf32>
      %cst_55 = arith.constant 3.200000e+01 : f32
      %61 = vector.broadcast %cst_55 : f32 to vector<8x1xf32>
      %62 = arith.divf %60, %61 : vector<8x1xf32>
      %63 = vector.broadcast %62 : vector<8x1xf32> to vector<8x32xf32>
      %64 = arith.subf %56, %63 : vector<8x32xf32>
      %65 = arith.mulf %64, %64 : vector<8x32xf32>
      %cst_56 = arith.constant dense<0.000000e+00> : vector<8xf32>
      %66 = vector.multi_reduction <add>, %65, %cst_56 [1] : vector<8x32xf32> to vector<8xf32>
      %67 = vector.shape_cast %66 : vector<8xf32> to vector<8x1xf32>
      %cst_57 = arith.constant 3.200000e+01 : f32
      %68 = vector.broadcast %cst_57 : f32 to vector<8x1xf32>
      %69 = arith.divf %67, %68 : vector<8x1xf32>
      %70 = vector.broadcast %62 : vector<8x1xf32> to vector<8x32xf32>
      %71 = arith.subf %56, %70 : vector<8x32xf32>
      %cst_58 = arith.constant 9.99999974E-6 : f32
      %72 = vector.broadcast %cst_58 : f32 to vector<8x1xf32>
      %73 = arith.addf %69, %72 : vector<8x1xf32>
      %74 = math.rsqrt %73 : vector<8x1xf32>
      %75 = vector.broadcast %74 : vector<8x1xf32> to vector<8x32xf32>
      %76 = arith.mulf %71, %75 : vector<8x32xf32>
      %77 = vector.broadcast %57 : vector<1x32xf32> to vector<8x32xf32>
      %78 = arith.mulf %76, %77 : vector<8x32xf32>
      %79 = vector.broadcast %58 : vector<1x32xf32> to vector<8x32xf32>
      %80 = arith.addf %78, %79 : vector<8x32xf32>
      %c0_59 = arith.constant 0 : index
      %c0_60 = arith.constant 0 : index
      %81 = vector.load %arg11[%c0_59, %c0_60] : memref<32x128xf32, #tpu.memory_space<vmem>>, vector<32x128xf32>
      %cst_61 = arith.constant dense<0.000000e+00> : vector<8x128xf32>
      %82 = tpu.matmul %80, %81, %cst_61 {dimension_numbers = #tpu.dot_dimension_numbers<[1], [0], [0], [1], [0, 0, 1, 1], [], []>} : vector<8x32xf32>, vector<32x128xf32>, vector<8x128xf32> -> vector<8x128xf32>
      %c0_62 = arith.constant 0 : index
      %c0_63 = arith.constant 0 : index
      %83 = vector.load %arg12[%c0_62, %c0_63] : memref<1x128xf32, #tpu.memory_space<vmem>>, vector<1x128xf32>
      %84 = vector.broadcast %83 : vector<1x128xf32> to vector<8x128xf32>
      %85 = arith.addf %82, %84 : vector<8x128xf32>
      %cst_64 = arith.constant 0.000000e+00 : f32
      %86 = vector.broadcast %cst_64 : f32 to vector<8x128xf32>
      %87 = arith.maximumf %85, %86 : vector<8x128xf32>
      %c0_65 = arith.constant 0 : index
      %c0_66 = arith.constant 0 : index
      %88 = vector.load %arg13[%c0_65, %c0_66] : memref<128x32xf32, #tpu.memory_space<vmem>>, vector<128x32xf32>
      %cst_67 = arith.constant dense<0.000000e+00> : vector<8x32xf32>
      %89 = tpu.matmul %87, %88, %cst_67 {dimension_numbers = #tpu.dot_dimension_numbers<[1], [0], [0], [1], [0, 0, 1, 1], [], []>} : vector<8x128xf32>, vector<128x32xf32>, vector<8x32xf32> -> vector<8x32xf32>
      %c0_68 = arith.constant 0 : index
      %c0_69 = arith.constant 0 : index
      %90 = vector.load %arg14[%c0_68, %c0_69] : memref<1x32xf32, #tpu.memory_space<vmem>>, vector<1x32xf32>
      %91 = vector.broadcast %90 : vector<1x32xf32> to vector<8x32xf32>
      %92 = arith.addf %89, %91 : vector<8x32xf32>
      %93 = arith.addf %80, %92 : vector<8x32xf32>
      %c0_70 = arith.constant 0 : index
      %c0_71 = arith.constant 0 : index
      %94 = vector.load %arg17[%c0_70, %c0_71] : memref<1x32xf32, #tpu.memory_space<vmem>>, vector<1x32xf32>
      %c0_72 = arith.constant 0 : index
      %c0_73 = arith.constant 0 : index
      %95 = vector.load %arg18[%c0_72, %c0_73] : memref<1x32xf32, #tpu.memory_space<vmem>>, vector<1x32xf32>
      %cst_74 = arith.constant dense<0.000000e+00> : vector<8xf32>
      %96 = vector.multi_reduction <add>, %93, %cst_74 [1] : vector<8x32xf32> to vector<8xf32>
      %97 = vector.shape_cast %96 : vector<8xf32> to vector<8x1xf32>
      %cst_75 = arith.constant 3.200000e+01 : f32
      %98 = vector.broadcast %cst_75 : f32 to vector<8x1xf32>
      %99 = arith.divf %97, %98 : vector<8x1xf32>
      %100 = vector.broadcast %99 : vector<8x1xf32> to vector<8x32xf32>
      %101 = arith.subf %93, %100 : vector<8x32xf32>
      %102 = arith.mulf %101, %101 : vector<8x32xf32>
      %cst_76 = arith.constant dense<0.000000e+00> : vector<8xf32>
      %103 = vector.multi_reduction <add>, %102, %cst_76 [1] : vector<8x32xf32> to vector<8xf32>
      %104 = vector.shape_cast %103 : vector<8xf32> to vector<8x1xf32>
      %cst_77 = arith.constant 3.200000e+01 : f32
      %105 = vector.broadcast %cst_77 : f32 to vector<8x1xf32>
      %106 = arith.divf %104, %105 : vector<8x1xf32>
      %107 = vector.broadcast %99 : vector<8x1xf32> to vector<8x32xf32>
      %108 = arith.subf %93, %107 : vector<8x32xf32>
      %cst_78 = arith.constant 9.99999974E-6 : f32
      %109 = vector.broadcast %cst_78 : f32 to vector<8x1xf32>
      %110 = arith.addf %106, %109 : vector<8x1xf32>
      %111 = math.rsqrt %110 : vector<8x1xf32>
      %112 = vector.broadcast %111 : vector<8x1xf32> to vector<8x32xf32>
      %113 = arith.mulf %108, %112 : vector<8x32xf32>
      %114 = vector.broadcast %94 : vector<1x32xf32> to vector<8x32xf32>
      %115 = arith.mulf %113, %114 : vector<8x32xf32>
      %116 = vector.broadcast %95 : vector<1x32xf32> to vector<8x32xf32>
      %117 = arith.addf %115, %116 : vector<8x32xf32>
      %c0_79 = arith.constant 0 : index
      %c0_80 = arith.constant 0 : index
      %c0_81 = arith.constant 0 : index
      %118 = vector.load %arg19[%c0_79, %c0_80, %c0_81] : memref<1x8x32xf32, #tpu.memory_space<vmem>>, vector<1x8x32xf32>
      %119 = vector.shape_cast %118 : vector<1x8x32xf32> to vector<8x32xf32>
      %120 = vector.shape_cast %117 : vector<8x32xf32> to vector<1x8x32xf32>
      tpu.vector_store %arg19[%c0_79, %c0_80, %c0_81], %120 {strides = array<i32>} : memref<1x8x32xf32, #tpu.memory_space<vmem>>, vector<1x8x32xf32>,
    } else {
    }
    return
  }
  func.func @transform_0(%arg0: i32, %arg1: i32, %arg2: i32) -> (i32, i32, i32) {
    %c0_i32 = arith.constant 0 : i32
    %c0_i32_0 = arith.constant 0 : i32
    return %arg0, %arg1, %c0_i32 : i32, i32, i32
  }
  func.func @transform_1(%arg0: i32, %arg1: i32, %arg2: i32) -> (i32, i32, i32) {
    %c0_i32 = arith.constant 0 : i32
    %c0_i32_0 = arith.constant 0 : i32
    return %arg0, %arg2, %c0_i32 : i32, i32, i32
  }
  func.func @transform_2(%arg0: i32, %arg1: i32, %arg2: i32) -> (i32, i32) {
    %c0_i32 = arith.constant 0 : i32
    %c0_i32_0 = arith.constant 0 : i32
    %c0_i32_1 = arith.constant 0 : i32
    return %c0_i32, %c0_i32_0 : i32, i32
  }
  func.func @transform_3(%arg0: i32, %arg1: i32, %arg2: i32) -> (i32, i32) {
    %c0_i32 = arith.constant 0 : i32
    %c0_i32_0 = arith.constant 0 : i32
    %c0_i32_1 = arith.constant 0 : i32
    return %c0_i32, %c0_i32_0 : i32, i32
  }
  func.func @transform_4(%arg0: i32, %arg1: i32, %arg2: i32) -> (i32, i32) {
    %c0_i32 = arith.constant 0 : i32
    %c0_i32_0 = arith.constant 0 : i32
    %c0_i32_1 = arith.constant 0 : i32
    return %c0_i32, %c0_i32_0 : i32, i32
  }
  func.func @transform_5(%arg0: i32, %arg1: i32, %arg2: i32) -> (i32, i32) {
    %c0_i32 = arith.constant 0 : i32
    %c0_i32_0 = arith.constant 0 : i32
    %c0_i32_1 = arith.constant 0 : i32
    return %c0_i32, %c0_i32_0 : i32, i32
  }
  func.func @transform_6(%arg0: i32, %arg1: i32, %arg2: i32) -> (i32, i32, i32) {
    %c0_i32 = arith.constant 0 : i32
    %c0_i32_0 = arith.constant 0 : i32
    %c0_i32_1 = arith.constant 0 : i32
    %c0_i32_2 = arith.constant 0 : i32
    return %c0_i32, %c0_i32_0, %c0_i32_1 : i32, i32, i32
  }
  func.func @transform_7(%arg0: i32, %arg1: i32, %arg2: i32) -> (i32, i32) {
    %c0_i32 = arith.constant 0 : i32
    %c0_i32_0 = arith.constant 0 : i32
    %c0_i32_1 = arith.constant 0 : i32
    return %c0_i32, %c0_i32_0 : i32, i32
  }
  func.func @transform_8(%arg0: i32, %arg1: i32, %arg2: i32) -> (i32, i32) {
    %c0_i32 = arith.constant 0 : i32
    %c0_i32_0 = arith.constant 0 : i32
    %c0_i32_1 = arith.constant 0 : i32
    return %c0_i32, %c0_i32_0 : i32, i32
  }
  func.func @transform_9(%arg0: i32, %arg1: i32, %arg2: i32) -> (i32, i32) {
    %c0_i32 = arith.constant 0 : i32
    %c0_i32_0 = arith.constant 0 : i32
    %c0_i32_1 = arith.constant 0 : i32
    return %c0_i32, %c0_i32_0 : i32, i32
  }
  func.func @transform_10(%arg0: i32, %arg1: i32, %arg2: i32) -> (i32, i32) {
    %c0_i32 = arith.constant 0 : i32
    %c0_i32_0 = arith.constant 0 : i32
    %c0_i32_1 = arith.constant 0 : i32
    return %c0_i32, %c0_i32_0 : i32, i32
  }
  func.func @transform_11(%arg0: i32, %arg1: i32, %arg2: i32) -> (i32, i32) {
    %c0_i32 = arith.constant 0 : i32
    %c0_i32_0 = arith.constant 0 : i32
    %c0_i32_1 = arith.constant 0 : i32
    return %c0_i32, %c0_i32_0 : i32, i32
  }
  func.func @transform_12(%arg0: i32, %arg1: i32, %arg2: i32) -> (i32, i32) {
    %c0_i32 = arith.constant 0 : i32
    %c0_i32_0 = arith.constant 0 : i32
    %c0_i32_1 = arith.constant 0 : i32
    return %c0_i32, %c0_i32_0 : i32, i32
  }
  func.func @transform_13(%arg0: i32, %arg1: i32, %arg2: i32) -> (i32, i32) {
    %c0_i32 = arith.constant 0 : i32
    %c0_i32_0 = arith.constant 0 : i32
    %c0_i32_1 = arith.constant 0 : i32
    return %c0_i32, %c0_i32_0 : i32, i32
  }
  func.func @transform_14(%arg0: i32, %arg1: i32, %arg2: i32) -> (i32, i32) {
    %c0_i32 = arith.constant 0 : i32
    %c0_i32_0 = arith.constant 0 : i32
    %c0_i32_1 = arith.constant 0 : i32
    return %c0_i32, %c0_i32_0 : i32, i32
  }
  func.func @transform_15(%arg0: i32, %arg1: i32, %arg2: i32) -> (i32, i32) {
    %c0_i32 = arith.constant 0 : i32
    %c0_i32_0 = arith.constant 0 : i32
    %c0_i32_1 = arith.constant 0 : i32
    return %c0_i32, %c0_i32_0 : i32, i32
  }
  func.func @transform_16(%arg0: i32, %arg1: i32, %arg2: i32) -> (i32, i32, i32) {
    %c0_i32 = arith.constant 0 : i32
    %c0_i32_0 = arith.constant 0 : i32
    return %arg0, %arg1, %c0_i32 : i32, i32, i32
  }
}

module attributes {stable_mosaic.version = 11 : i64} {
  func.func @_encoder_layer_kernel(%arg0: i32, %arg1: i32, %arg2: i32, %arg3: memref<1x8x32xf32, #tpu.memory_space<vmem>>, %arg4: memref<1x8x32xf32, #tpu.memory_space<vmem>>, %arg5: memref<32x32xf32, #tpu.memory_space<vmem>>, %arg6: memref<32x64xf32, #tpu.memory_space<vmem>>, %arg7: memref<1x32xf32, #tpu.memory_space<vmem>>, %arg8: memref<1x64xf32, #tpu.memory_space<vmem>>, %arg9: memref<4x8x32xf32, #tpu.memory_space<vmem>>, %arg10: memref<1x32xf32, #tpu.memory_space<vmem>>, %arg11: memref<32x128xf32, #tpu.memory_space<vmem>>, %arg12: memref<1x128xf32, #tpu.memory_space<vmem>>, %arg13: memref<128x32xf32, #tpu.memory_space<vmem>>, %arg14: memref<1x32xf32, #tpu.memory_space<vmem>>, %arg15: memref<1x32xf32, #tpu.memory_space<vmem>>, %arg16: memref<1x32xf32, #tpu.memory_space<vmem>>, %arg17: memref<1x32xf32, #tpu.memory_space<vmem>>, %arg18: memref<1x32xf32, #tpu.memory_space<vmem>>, %arg19: memref<1x8x32xf32, #tpu.memory_space<vmem>>, %arg20: memref<4x8x8xf32, #tpu.memory_space<vmem>>, %arg21: memref<4x8x1xf32, #tpu.memory_space<vmem>>, %arg22: memref<4x8x1xf32, #tpu.memory_space<vmem>>, %arg23: memref<4x8x8xf32, #tpu.memory_space<vmem>>) attributes {dimension_semantics = [#tpu.dimension_semantics<parallel>, #tpu.dimension_semantics<parallel>, #tpu.dimension_semantics<arbitrary>], iteration_bounds = array<i64: 2, 1, 1>, scalar_prefetch = 0 : i64, scratch_operands = 4 : i64, tpu.core_type = #tpu.core_type<tc>, window_params = [{transform_indices = @transform_0, window_bounds = array<i64: 1, 8, 32>}, {transform_indices = @transform_1, window_bounds = array<i64: 1, 8, 32>}, {pipeline_mode = #tpu.pipeline_mode<synchronous>, transform_indices = @transform_2, window_bounds = array<i64: 32, 32>}, {pipeline_mode = #tpu.pipeline_mode<synchronous>, transform_indices = @transform_3, window_bounds = array<i64: 32, 64>}, {pipeline_mode = #tpu.pipeline_mode<synchronous>, transform_indices = @transform_4, window_bounds = array<i64: 1, 32>}, {pipeline_mode = #tpu.pipeline_mode<synchronous>, transform_indices = @transform_5, window_bounds = array<i64: 1, 64>}, {pipeline_mode = #tpu.pipeline_mode<synchronous>, transform_indices = @transform_6, window_bounds = array<i64: 4, 8, 32>}, {pipeline_mode = #tpu.pipeline_mode<synchronous>, transform_indices = @transform_7, window_bounds = array<i64: 1, 32>}, {pipeline_mode = #tpu.pipeline_mode<synchronous>, transform_indices = @transform_8, window_bounds = array<i64: 32, 128>}, {pipeline_mode = #tpu.pipeline_mode<synchronous>, transform_indices = @transform_9, window_bounds = array<i64: 1, 128>}, {pipeline_mode = #tpu.pipeline_mode<synchronous>, transform_indices = @transform_10, window_bounds = array<i64: 128, 32>}, {pipeline_mode = #tpu.pipeline_mode<synchronous>, transform_indices = @transform_11, window_bounds = array<i64: 1, 32>}, {pipeline_mode = #tpu.pipeline_mode<synchronous>, transform_indices = @transform_12, window_bounds = array<i64: 1, 32>}, {pipeline_mode = #tpu.pipeline_mode<synchronous>, transform_indices = @transform_13, window_bounds = array<i64: 1, 32>}, {pipeline_mode = #tpu.pipeline_mode<synchronous>, transform_indices = @transform_14, window_bounds = array<i64: 1, 32>}, {pipeline_mode = #tpu.pipeline_mode<synchronous>, transform_indices = @transform_15, window_bounds = array<i64: 1, 32>}, {transform_indices = @transform_16, window_bounds = array<i64: 1, 8, 32>}]} {
    %c0 = arith.constant 0 : index
    %c0_0 = arith.constant 0 : index
    %c0_1 = arith.constant 0 : index
    %0 = vector.load %arg3[%c0, %c0_0, %c0_1] : memref<1x8x32xf32, #tpu.memory_space<vmem>>, vector<1x8x32xf32>
    %1 = vector.shape_cast %0 : vector<1x8x32xf32> to vector<8x32xf32>
    %c0_i32 = arith.constant 0 : i32
    %2 = arith.cmpi eq, %arg2, %c0_i32 : i32
    %3 = arith.extui %2 : i1 to i32
    %c0_i32_2 = arith.constant 0 : i32
    %4 = arith.cmpi ne, %3, %c0_i32_2 : i32
    scf.if %4 {
      %c0_37 = arith.constant 0 : index
      %c0_38 = arith.constant 0 : index
      %45 = vector.load %arg5[%c0_37, %c0_38] : memref<32x32xf32, #tpu.memory_space<vmem>>, vector<32x32xf32>
      %cst_39 = arith.constant dense<0.000000e+00> : vector<8x32xf32>
      %46 = tpu.matmul %1, %45, %cst_39 {dimension_numbers = #tpu.dot_dimension_numbers<[1], [0], [0], [1], [0, 0, 1, 1], [], []>} : vector<8x32xf32>, vector<32x32xf32>, vector<8x32xf32> -> vector<8x32xf32>
      %c0_40 = arith.constant 0 : index
      %c0_41 = arith.constant 0 : index
      %47 = vector.load %arg7[%c0_40, %c0_41] : memref<1x32xf32, #tpu.memory_space<vmem>>, vector<1x32xf32>
      %48 = vector.broadcast %47 : vector<1x32xf32> to vector<8x32xf32>
      %49 = arith.addf %46, %48 : vector<8x32xf32>
      %50 = vector.shape_cast %49 : vector<8x32xf32> to vector<8x4x8xf32>
      %51 = tpu.transpose %50, [1, 0, 2] : vector<8x4x8xf32> -> vector<4x8x8xf32>
      %c0_42 = arith.constant 0 : index
      %c0_43 = arith.constant 0 : index
      %c0_44 = arith.constant 0 : index
      %52 = vector.load %arg20[%c0_42, %c0_43, %c0_44] : memref<4x8x8xf32, #tpu.memory_space<vmem>>, vector<4x8x8xf32>
      tpu.vector_store %arg20[%c0_42, %c0_43, %c0_44], %51 {strides = array<i32>} : memref<4x8x8xf32, #tpu.memory_space<vmem>>, vector<4x8x8xf32>,
      %cst_45 = arith.constant 0xFF800000 : f32
      %53 = vector.broadcast %cst_45 : f32 to vector<4x8x1xf32>
      %c0_46 = arith.constant 0 : index
      %c0_47 = arith.constant 0 : index
      %c0_48 = arith.constant 0 : index
      %54 = vector.load %arg21[%c0_46, %c0_47, %c0_48] : memref<4x8x1xf32, #tpu.memory_space<vmem>>, vector<4x8x1xf32>
      tpu.vector_store %arg21[%c0_46, %c0_47, %c0_48], %53 {strides = array<i32>} : memref<4x8x1xf32, #tpu.memory_space<vmem>>, vector<4x8x1xf32>,
      %cst_49 = arith.constant 0.000000e+00 : f32
      %55 = vector.broadcast %cst_49 : f32 to vector<4x8x1xf32>
      %c0_50 = arith.constant 0 : index
      %c0_51 = arith.constant 0 : index
      %c0_52 = arith.constant 0 : index
      %56 = vector.load %arg22[%c0_50, %c0_51, %c0_52] : memref<4x8x1xf32, #tpu.memory_space<vmem>>, vector<4x8x1xf32>
      tpu.vector_store %arg22[%c0_50, %c0_51, %c0_52], %55 {strides = array<i32>} : memref<4x8x1xf32, #tpu.memory_space<vmem>>, vector<4x8x1xf32>,
      %cst_53 = arith.constant 0.000000e+00 : f32
      %57 = vector.broadcast %cst_53 : f32 to vector<4x8x8xf32>
      %c0_54 = arith.constant 0 : index
      %c0_55 = arith.constant 0 : index
      %c0_56 = arith.constant 0 : index
      %58 = vector.load %arg23[%c0_54, %c0_55, %c0_56] : memref<4x8x8xf32, #tpu.memory_space<vmem>>, vector<4x8x8xf32>
      tpu.vector_store %arg23[%c0_54, %c0_55, %c0_56], %57 {strides = array<i32>} : memref<4x8x8xf32, #tpu.memory_space<vmem>>, vector<4x8x8xf32>,
    } else {
    }
    %c0_3 = arith.constant 0 : index
    %c0_4 = arith.constant 0 : index
    %c0_5 = arith.constant 0 : index
    %5 = vector.load %arg4[%c0_3, %c0_4, %c0_5] : memref<1x8x32xf32, #tpu.memory_space<vmem>>, vector<1x8x32xf32>
    %6 = vector.shape_cast %5 : vector<1x8x32xf32> to vector<8x32xf32>
    %c0_6 = arith.constant 0 : index
    %c0_7 = arith.constant 0 : index
    %7 = vector.load %arg6[%c0_6, %c0_7] : memref<32x64xf32, #tpu.memory_space<vmem>>, vector<32x64xf32>
    %cst = arith.constant dense<0.000000e+00> : vector<8x64xf32>
    %8 = tpu.matmul %6, %7, %cst {dimension_numbers = #tpu.dot_dimension_numbers<[1], [0], [0], [1], [0, 0, 1, 1], [], []>} : vector<8x32xf32>, vector<32x64xf32>, vector<8x64xf32> -> vector<8x64xf32>
    %c0_8 = arith.constant 0 : index
    %c0_9 = arith.constant 0 : index
    %9 = vector.load %arg8[%c0_8, %c0_9] : memref<1x64xf32, #tpu.memory_space<vmem>>, vector<1x64xf32>
    %10 = vector.broadcast %9 : vector<1x64xf32> to vector<8x64xf32>
    %11 = arith.addf %8, %10 : vector<8x64xf32>
    %12 = vector.extract_strided_slice %11 {offsets = [0, 0], sizes = [8, 32], strides = [1, 1]} : vector<8x64xf32> to vector<8x32xf32>
    %13 = vector.extract_strided_slice %11 {offsets = [0, 32], sizes = [8, 32], strides = [1, 1]} : vector<8x64xf32> to vector<8x32xf32>
    %14 = vector.shape_cast %12 : vector<8x32xf32> to vector<8x4x8xf32>
    %15 = tpu.transpose %14, [1, 0, 2] : vector<8x4x8xf32> -> vector<4x8x8xf32>
    %16 = vector.shape_cast %13 : vector<8x32xf32> to vector<8x4x8xf32>
    %17 = tpu.transpose %16, [1, 0, 2] : vector<8x4x8xf32> -> vector<4x8x8xf32>
    %c0_10 = arith.constant 0 : index
    %c0_11 = arith.constant 0 : index
    %c0_12 = arith.constant 0 : index
    %18 = vector.load %arg20[%c0_10, %c0_11, %c0_12] : memref<4x8x8xf32, #tpu.memory_space<vmem>>, vector<4x8x8xf32>
    "tpu.trace_start"() <{level = 10 : i32, message = "hqd,hkd->hqk"}> : () -> ()
    %cst_13 = arith.constant dense<0.000000e+00> : vector<4x8x8xf32>
    %19 = tpu.matmul %18, %15, %cst_13 {dimension_numbers = #tpu.dot_dimension_numbers<[2], [2], [1], [1], [0, 0, 0, 1, 1, 1], [0], [0]>} : vector<4x8x8xf32>, vector<4x8x8xf32>, vector<4x8x8xf32> -> vector<4x8x8xf32>
    "tpu.trace_stop"() : () -> ()
    %c0_14 = arith.constant 0 : index
    %c0_15 = arith.constant 0 : index
    %c0_16 = arith.constant 0 : index
    %20 = vector.load %arg21[%c0_14, %c0_15, %c0_16] : memref<4x8x1xf32, #tpu.memory_space<vmem>>, vector<4x8x1xf32>
    %cst_17 = arith.constant dense<0xFF800000> : vector<4x8xf32>
    %21 = vector.multi_reduction <maximumf>, %19, %cst_17 [2] : vector<4x8x8xf32> to vector<4x8xf32>
    %22 = vector.shape_cast %21 : vector<4x8xf32> to vector<4x8x1xf32>
    %23 = arith.maximumf %20, %22 : vector<4x8x1xf32>
    %24 = arith.subf %20, %23 : vector<4x8x1xf32>
    %25 = math.exp %24 : vector<4x8x1xf32>
    %26 = vector.broadcast %23 : vector<4x8x1xf32> to vector<4x8x8xf32>
    %27 = arith.subf %19, %26 : vector<4x8x8xf32>
    %28 = math.exp %27 : vector<4x8x8xf32>
    %c0_18 = arith.constant 0 : index
    %c0_19 = arith.constant 0 : index
    %c0_20 = arith.constant 0 : index
    %29 = vector.load %arg22[%c0_18, %c0_19, %c0_20] : memref<4x8x1xf32, #tpu.memory_space<vmem>>, vector<4x8x1xf32>
    %30 = arith.mulf %25, %29 : vector<4x8x1xf32>
    %cst_21 = arith.constant dense<0.000000e+00> : vector<4x8xf32>
    %31 = vector.multi_reduction <add>, %28, %cst_21 [2] : vector<4x8x8xf32> to vector<4x8xf32>
    %32 = vector.shape_cast %31 : vector<4x8xf32> to vector<4x8x1xf32>
    %33 = arith.addf %30, %32 : vector<4x8x1xf32>
    %c0_22 = arith.constant 0 : index
    %c0_23 = arith.constant 0 : index
    %c0_24 = arith.constant 0 : index
    %34 = vector.load %arg22[%c0_22, %c0_23, %c0_24] : memref<4x8x1xf32, #tpu.memory_space<vmem>>, vector<4x8x1xf32>
    tpu.vector_store %arg22[%c0_22, %c0_23, %c0_24], %33 {strides = array<i32>} : memref<4x8x1xf32, #tpu.memory_space<vmem>>, vector<4x8x1xf32>,
    %c0_25 = arith.constant 0 : index
    %c0_26 = arith.constant 0 : index
    %c0_27 = arith.constant 0 : index
    %35 = vector.load %arg23[%c0_25, %c0_26, %c0_27] : memref<4x8x8xf32, #tpu.memory_space<vmem>>, vector<4x8x8xf32>
    %36 = vector.broadcast %25 : vector<4x8x1xf32> to vector<4x8x8xf32>
    %37 = arith.mulf %36, %35 : vector<4x8x8xf32>
    "tpu.trace_start"() <{level = 10 : i32, message = "hqk,hkd->hqd"}> : () -> ()
    %cst_28 = arith.constant dense<0.000000e+00> : vector<4x8x8xf32>
    %38 = tpu.matmul %28, %17, %cst_28 {dimension_numbers = #tpu.dot_dimension_numbers<[2], [1], [1], [2], [0, 0, 0, 1, 1, 2], [0], [0]>} : vector<4x8x8xf32>, vector<4x8x8xf32>, vector<4x8x8xf32> -> vector<4x8x8xf32>
    "tpu.trace_stop"() : () -> ()
    %39 = arith.addf %37, %38 : vector<4x8x8xf32>
    %c0_29 = arith.constant 0 : index
    %c0_30 = arith.constant 0 : index
    %c0_31 = arith.constant 0 : index
    %40 = vector.load %arg23[%c0_29, %c0_30, %c0_31] : memref<4x8x8xf32, #tpu.memory_space<vmem>>, vector<4x8x8xf32>
    tpu.vector_store %arg23[%c0_29, %c0_30, %c0_31], %39 {strides = array<i32>} : memref<4x8x8xf32, #tpu.memory_space<vmem>>, vector<4x8x8xf32>,
    %c0_32 = arith.constant 0 : index
    %c0_33 = arith.constant 0 : index
    %c0_34 = arith.constant 0 : index
    %41 = vector.load %arg21[%c0_32, %c0_33, %c0_34] : memref<4x8x1xf32, #tpu.memory_space<vmem>>, vector<4x8x1xf32>
    tpu.vector_store %arg21[%c0_32, %c0_33, %c0_34], %23 {strides = array<i32>} : memref<4x8x1xf32, #tpu.memory_space<vmem>>, vector<4x8x1xf32>,
    %c0_i32_35 = arith.constant 0 : i32
    %42 = arith.cmpi eq, %arg2, %c0_i32_35 : i32
    %43 = arith.extui %42 : i1 to i32
    %c0_i32_36 = arith.constant 0 : i32
    %44 = arith.cmpi ne, %43, %c0_i32_36 : i32
    scf.if %44 {
      %c0_37 = arith.constant 0 : index
      %c0_38 = arith.constant 0 : index
      %c0_39 = arith.constant 0 : index
      %45 = vector.load %arg23[%c0_37, %c0_38, %c0_39] : memref<4x8x8xf32, #tpu.memory_space<vmem>>, vector<4x8x8xf32>
      %c0_40 = arith.constant 0 : index
      %c0_41 = arith.constant 0 : index
      %c0_42 = arith.constant 0 : index
      %46 = vector.load %arg22[%c0_40, %c0_41, %c0_42] : memref<4x8x1xf32, #tpu.memory_space<vmem>>, vector<4x8x1xf32>
      %47 = tpu.reciprocal %46 {approx = true} : vector<4x8x1xf32> -> vector<4x8x1xf32>
      %48 = vector.broadcast %47 : vector<4x8x1xf32> to vector<4x8x8xf32>
      %49 = arith.mulf %45, %48 : vector<4x8x8xf32>
      %c0_43 = arith.constant 0 : index
      %c0_44 = arith.constant 0 : index
      %c0_45 = arith.constant 0 : index
      %50 = vector.load %arg9[%c0_43, %c0_44, %c0_45] : memref<4x8x32xf32, #tpu.memory_space<vmem>>, vector<4x8x32xf32>
      "tpu.trace_start"() <{level = 10 : i32, message = "hqd,hde->hqe"}> : () -> ()
      %cst_46 = arith.constant dense<0.000000e+00> : vector<4x8x32xf32>
      %51 = tpu.matmul %49, %50, %cst_46 {dimension_numbers = #tpu.dot_dimension_numbers<[2], [1], [1], [2], [0, 0, 0, 1, 1, 2], [0], [0]>} : vector<4x8x8xf32>, vector<4x8x32xf32>, vector<4x8x32xf32> -> vector<4x8x32xf32>
      "tpu.trace_stop"() : () -> ()
      %cst_47 = arith.constant dense<0.000000e+00> : vector<8x32xf32>
      %52 = vector.multi_reduction <add>, %51, %cst_47 [0] : vector<4x8x32xf32> to vector<8x32xf32>
      %c0_48 = arith.constant 0 : index
      %c0_49 = arith.constant 0 : index
      %53 = vector.load %arg10[%c0_48, %c0_49] : memref<1x32xf32, #tpu.memory_space<vmem>>, vector<1x32xf32>
      %54 = vector.broadcast %53 : vector<1x32xf32> to vector<8x32xf32>
      %55 = arith.addf %52, %54 : vector<8x32xf32>
      %56 = arith.addf %1, %55 : vector<8x32xf32>
      %c0_50 = arith.constant 0 : index
      %c0_51 = arith.constant 0 : index
      %57 = vector.load %arg15[%c0_50, %c0_51] : memref<1x32xf32, #tpu.memory_space<vmem>>, vector<1x32xf32>
      %c0_52 = arith.constant 0 : index
      %c0_53 = arith.constant 0 : index
      %58 = vector.load %arg16[%c0_52, %c0_53] : memref<1x32xf32, #tpu.memory_space<vmem>>, vector<1x32xf32>
      %cst_54 = arith.constant dense<0.000000e+00> : vector<8xf32>
      %59 = vector.multi_reduction <add>, %56, %cst_54 [1] : vector<8x32xf32> to vector<8xf32>
      %60 = vector.shape_cast %59 : vector<8xf32> to vector<8x1xf32>
      %cst_55 = arith.constant 3.200000e+01 : f32
      %61 = vector.broadcast %cst_55 : f32 to vector<8x1xf32>
      %62 = arith.divf %60, %61 : vector<8x1xf32>
      %63 = vector.broadcast %62 : vector<8x1xf32> to vector<8x32xf32>
      %64 = arith.subf %56, %63 : vector<8x32xf32>
      %65 = arith.mulf %64, %64 : vector<8x32xf32>
      %cst_56 = arith.constant dense<0.000000e+00> : vector<8xf32>
      %66 = vector.multi_reduction <add>, %65, %cst_56 [1] : vector<8x32xf32> to vector<8xf32>
      %67 = vector.shape_cast %66 : vector<8xf32> to vector<8x1xf32>
      %cst_57 = arith.constant 3.200000e+01 : f32
      %68 = vector.broadcast %cst_57 : f32 to vector<8x1xf32>
      %69 = arith.divf %67, %68 : vector<8x1xf32>
      %70 = vector.broadcast %62 : vector<8x1xf32> to vector<8x32xf32>
      %71 = arith.subf %56, %70 : vector<8x32xf32>
      %cst_58 = arith.constant 9.99999974E-6 : f32
      %72 = vector.broadcast %cst_58 : f32 to vector<8x1xf32>
      %73 = arith.addf %69, %72 : vector<8x1xf32>
      %74 = math.rsqrt %73 : vector<8x1xf32>
      %75 = vector.broadcast %74 : vector<8x1xf32> to vector<8x32xf32>
      %76 = arith.mulf %71, %75 : vector<8x32xf32>
      %77 = vector.broadcast %57 : vector<1x32xf32> to vector<8x32xf32>
      %78 = arith.mulf %76, %77 : vector<8x32xf32>
      %79 = vector.broadcast %58 : vector<1x32xf32> to vector<8x32xf32>
      %80 = arith.addf %78, %79 : vector<8x32xf32>
      %c0_59 = arith.constant 0 : index
      %c0_60 = arith.constant 0 : index
      %81 = vector.load %arg11[%c0_59, %c0_60] : memref<32x128xf32, #tpu.memory_space<vmem>>, vector<32x128xf32>
      %cst_61 = arith.constant dense<0.000000e+00> : vector<8x128xf32>
      %82 = tpu.matmul %80, %81, %cst_61 {dimension_numbers = #tpu.dot_dimension_numbers<[1], [0], [0], [1], [0, 0, 1, 1], [], []>} : vector<8x32xf32>, vector<32x128xf32>, vector<8x128xf32> -> vector<8x128xf32>
      %c0_62 = arith.constant 0 : index
      %c0_63 = arith.constant 0 : index
      %83 = vector.load %arg12[%c0_62, %c0_63] : memref<1x128xf32, #tpu.memory_space<vmem>>, vector<1x128xf32>
      %84 = vector.broadcast %83 : vector<1x128xf32> to vector<8x128xf32>
      %85 = arith.addf %82, %84 : vector<8x128xf32>
      %cst_64 = arith.constant 0.000000e+00 : f32
      %86 = vector.broadcast %cst_64 : f32 to vector<8x128xf32>
      %87 = arith.maximumf %85, %86 : vector<8x128xf32>
      %c0_65 = arith.constant 0 : index
      %c0_66 = arith.constant 0 : index
      %88 = vector.load %arg13[%c0_65, %c0_66] : memref<128x32xf32, #tpu.memory_space<vmem>>, vector<128x32xf32>
      %cst_67 = arith.constant dense<0.000000e+00> : vector<8x32xf32>
      %89 = tpu.matmul %87, %88, %cst_67 {dimension_numbers = #tpu.dot_dimension_numbers<[1], [0], [0], [1], [0, 0, 1, 1], [], []>} : vector<8x128xf32>, vector<128x32xf32>, vector<8x32xf32> -> vector<8x32xf32>
      %c0_68 = arith.constant 0 : index
      %c0_69 = arith.constant 0 : index
      %90 = vector.load %arg14[%c0_68, %c0_69] : memref<1x32xf32, #tpu.memory_space<vmem>>, vector<1x32xf32>
      %91 = vector.broadcast %90 : vector<1x32xf32> to vector<8x32xf32>
      %92 = arith.addf %89, %91 : vector<8x32xf32>
      %93 = arith.addf %80, %92 : vector<8x32xf32>
      %c0_70 = arith.constant 0 : index
      %c0_71 = arith.constant 0 : index
      %94 = vector.load %arg17[%c0_70, %c0_71] : memref<1x32xf32, #tpu.memory_space<vmem>>, vector<1x32xf32>
      %c0_72 = arith.constant 0 : index
      %c0_73 = arith.constant 0 : index
      %95 = vector.load %arg18[%c0_72, %c0_73] : memref<1x32xf32, #tpu.memory_space<vmem>>, vector<1x32xf32>
      %cst_74 = arith.constant dense<0.000000e+00> : vector<8xf32>
      %96 = vector.multi_reduction <add>, %93, %cst_74 [1] : vector<8x32xf32> to vector<8xf32>
      %97 = vector.shape_cast %96 : vector<8xf32> to vector<8x1xf32>
      %cst_75 = arith.constant 3.200000e+01 : f32
      %98 = vector.broadcast %cst_75 : f32 to vector<8x1xf32>
      %99 = arith.divf %97, %98 : vector<8x1xf32>
      %100 = vector.broadcast %99 : vector<8x1xf32> to vector<8x32xf32>
      %101 = arith.subf %93, %100 : vector<8x32xf32>
      %102 = arith.mulf %101, %101 : vector<8x32xf32>
      %cst_76 = arith.constant dense<0.000000e+00> : vector<8xf32>
      %103 = vector.multi_reduction <add>, %102, %cst_76 [1] : vector<8x32xf32> to vector<8xf32>
      %104 = vector.shape_cast %103 : vector<8xf32> to vector<8x1xf32>
      %cst_77 = arith.constant 3.200000e+01 : f32
      %105 = vector.broadcast %cst_77 : f32 to vector<8x1xf32>
      %106 = arith.divf %104, %105 : vector<8x1xf32>
      %107 = vector.broadcast %99 : vector<8x1xf32> to vector<8x32xf32>
      %108 = arith.subf %93, %107 : vector<8x32xf32>
      %cst_78 = arith.constant 9.99999974E-6 : f32
      %109 = vector.broadcast %cst_78 : f32 to vector<8x1xf32>
      %110 = arith.addf %106, %109 : vector<8x1xf32>
      %111 = math.rsqrt %110 : vector<8x1xf32>
      %112 = vector.broadcast %111 : vector<8x1xf32> to vector<8x32xf32>
      %113 = arith.mulf %108, %112 : vector<8x32xf32>
      %114 = vector.broadcast %94 : vector<1x32xf32> to vector<8x32xf32>
      %115 = arith.mulf %113, %114 : vector<8x32xf32>
      %116 = vector.broadcast %95 : vector<1x32xf32> to vector<8x32xf32>
      %117 = arith.addf %115, %116 : vector<8x32xf32>
      %c0_79 = arith.constant 0 : index
      %c0_80 = arith.constant 0 : index
      %c0_81 = arith.constant 0 : index
      %118 = vector.load %arg19[%c0_79, %c0_80, %c0_81] : memref<1x8x32xf32, #tpu.memory_space<vmem>>, vector<1x8x32xf32>
      %119 = vector.shape_cast %118 : vector<1x8x32xf32> to vector<8x32xf32>
      %120 = vector.shape_cast %117 : vector<8x32xf32> to vector<1x8x32xf32>
      tpu.vector_store %arg19[%c0_79, %c0_80, %c0_81], %120 {strides = array<i32>} : memref<1x8x32xf32, #tpu.memory_space<vmem>>, vector<1x8x32xf32>,
    } else {
    }
    return
  }
  func.func @transform_0(%arg0: i32, %arg1: i32, %arg2: i32) -> (i32, i32, i32) {
    %c0_i32 = arith.constant 0 : i32
    %c0_i32_0 = arith.constant 0 : i32
    return %arg0, %arg1, %c0_i32 : i32, i32, i32
  }
  func.func @transform_1(%arg0: i32, %arg1: i32, %arg2: i32) -> (i32, i32, i32) {
    %c0_i32 = arith.constant 0 : i32
    %c0_i32_0 = arith.constant 0 : i32
    return %arg0, %arg2, %c0_i32 : i32, i32, i32
  }
  func.func @transform_2(%arg0: i32, %arg1: i32, %arg2: i32) -> (i32, i32) {
    %c0_i32 = arith.constant 0 : i32
    %c0_i32_0 = arith.constant 0 : i32
    %c0_i32_1 = arith.constant 0 : i32
    return %c0_i32, %c0_i32_0 : i32, i32
  }
  func.func @transform_3(%arg0: i32, %arg1: i32, %arg2: i32) -> (i32, i32) {
    %c0_i32 = arith.constant 0 : i32
    %c0_i32_0 = arith.constant 0 : i32
    %c0_i32_1 = arith.constant 0 : i32
    return %c0_i32, %c0_i32_0 : i32, i32
  }
  func.func @transform_4(%arg0: i32, %arg1: i32, %arg2: i32) -> (i32, i32) {
    %c0_i32 = arith.constant 0 : i32
    %c0_i32_0 = arith.constant 0 : i32
    %c0_i32_1 = arith.constant 0 : i32
    return %c0_i32, %c0_i32_0 : i32, i32
  }
  func.func @transform_5(%arg0: i32, %arg1: i32, %arg2: i32) -> (i32, i32) {
    %c0_i32 = arith.constant 0 : i32
    %c0_i32_0 = arith.constant 0 : i32
    %c0_i32_1 = arith.constant 0 : i32
    return %c0_i32, %c0_i32_0 : i32, i32
  }
  func.func @transform_6(%arg0: i32, %arg1: i32, %arg2: i32) -> (i32, i32, i32) {
    %c0_i32 = arith.constant 0 : i32
    %c0_i32_0 = arith.constant 0 : i32
    %c0_i32_1 = arith.constant 0 : i32
    %c0_i32_2 = arith.constant 0 : i32
    return %c0_i32, %c0_i32_0, %c0_i32_1 : i32, i32, i32
  }
  func.func @transform_7(%arg0: i32, %arg1: i32, %arg2: i32) -> (i32, i32) {
    %c0_i32 = arith.constant 0 : i32
    %c0_i32_0 = arith.constant 0 : i32
    %c0_i32_1 = arith.constant 0 : i32
    return %c0_i32, %c0_i32_0 : i32, i32
  }
  func.func @transform_8(%arg0: i32, %arg1: i32, %arg2: i32) -> (i32, i32) {
    %c0_i32 = arith.constant 0 : i32
    %c0_i32_0 = arith.constant 0 : i32
    %c0_i32_1 = arith.constant 0 : i32
    return %c0_i32, %c0_i32_0 : i32, i32
  }
  func.func @transform_9(%arg0: i32, %arg1: i32, %arg2: i32) -> (i32, i32) {
    %c0_i32 = arith.constant 0 : i32
    %c0_i32_0 = arith.constant 0 : i32
    %c0_i32_1 = arith.constant 0 : i32
    return %c0_i32, %c0_i32_0 : i32, i32
  }
  func.func @transform_10(%arg0: i32, %arg1: i32, %arg2: i32) -> (i32, i32) {
    %c0_i32 = arith.constant 0 : i32
    %c0_i32_0 = arith.constant 0 : i32
    %c0_i32_1 = arith.constant 0 : i32
    return %c0_i32, %c0_i32_0 : i32, i32
  }
  func.func @transform_11(%arg0: i32, %arg1: i32, %arg2: i32) -> (i32, i32) {
    %c0_i32 = arith.constant 0 : i32
    %c0_i32_0 = arith.constant 0 : i32
    %c0_i32_1 = arith.constant 0 : i32
    return %c0_i32, %c0_i32_0 : i32, i32
  }
  func.func @transform_12(%arg0: i32, %arg1: i32, %arg2: i32) -> (i32, i32) {
    %c0_i32 = arith.constant 0 : i32
    %c0_i32_0 = arith.constant 0 : i32
    %c0_i32_1 = arith.constant 0 : i32
    return %c0_i32, %c0_i32_0 : i32, i32
  }
  func.func @transform_13(%arg0: i32, %arg1: i32, %arg2: i32) -> (i32, i32) {
    %c0_i32 = arith.constant 0 : i32
    %c0_i32_0 = arith.constant 0 : i32
    %c0_i32_1 = arith.constant 0 : i32
    return %c0_i32, %c0_i32_0 : i32, i32
  }
  func.func @transform_14(%arg0: i32, %arg1: i32, %arg2: i32) -> (i32, i32) {
    %c0_i32 = arith.constant 0 : i32
    %c0_i32_0 = arith.constant 0 : i32
    %c0_i32_1 = arith.constant 0 : i32
    return %c0_i32, %c0_i32_0 : i32, i32
  }
  func.func @transform_15(%arg0: i32, %arg1: i32, %arg2: i32) -> (i32, i32) {
    %c0_i32 = arith.constant 0 : i32
    %c0_i32_0 = arith.constant 0 : i32
    %c0_i32_1 = arith.constant 0 : i32
    return %c0_i32, %c0_i32_0 : i32, i32
  }
  func.func @transform_16(%arg0: i32, %arg1: i32, %arg2: i32) -> (i32, i32, i32) {
    %c0_i32 = arith.constant 0 : i32
    %c0_i32_0 = arith.constant 0 : i32
    return %arg0, %arg1, %c0_i32 : i32, i32, i32
  }
}

module attributes {stable_mosaic.version = 11 : i64} {
  func.func @_encoder_layer_kernel(%arg0: i32, %arg1: i32, %arg2: i32, %arg3: memref<1x8x32xf32, #tpu.memory_space<vmem>>, %arg4: memref<1x8x32xf32, #tpu.memory_space<vmem>>, %arg5: memref<32x32xf32, #tpu.memory_space<vmem>>, %arg6: memref<32x64xf32, #tpu.memory_space<vmem>>, %arg7: memref<1x32xf32, #tpu.memory_space<vmem>>, %arg8: memref<1x64xf32, #tpu.memory_space<vmem>>, %arg9: memref<4x8x32xf32, #tpu.memory_space<vmem>>, %arg10: memref<1x32xf32, #tpu.memory_space<vmem>>, %arg11: memref<32x128xf32, #tpu.memory_space<vmem>>, %arg12: memref<1x128xf32, #tpu.memory_space<vmem>>, %arg13: memref<128x32xf32, #tpu.memory_space<vmem>>, %arg14: memref<1x32xf32, #tpu.memory_space<vmem>>, %arg15: memref<1x32xf32, #tpu.memory_space<vmem>>, %arg16: memref<1x32xf32, #tpu.memory_space<vmem>>, %arg17: memref<1x32xf32, #tpu.memory_space<vmem>>, %arg18: memref<1x32xf32, #tpu.memory_space<vmem>>, %arg19: memref<1x8x32xf32, #tpu.memory_space<vmem>>, %arg20: memref<4x8x8xf32, #tpu.memory_space<vmem>>, %arg21: memref<4x8x1xf32, #tpu.memory_space<vmem>>, %arg22: memref<4x8x1xf32, #tpu.memory_space<vmem>>, %arg23: memref<4x8x8xf32, #tpu.memory_space<vmem>>) attributes {dimension_semantics = [#tpu.dimension_semantics<parallel>, #tpu.dimension_semantics<parallel>, #tpu.dimension_semantics<arbitrary>], iteration_bounds = array<i64: 2, 1, 1>, scalar_prefetch = 0 : i64, scratch_operands = 4 : i64, tpu.core_type = #tpu.core_type<tc>, window_params = [{transform_indices = @transform_0, window_bounds = array<i64: 1, 8, 32>}, {transform_indices = @transform_1, window_bounds = array<i64: 1, 8, 32>}, {pipeline_mode = #tpu.pipeline_mode<synchronous>, transform_indices = @transform_2, window_bounds = array<i64: 32, 32>}, {pipeline_mode = #tpu.pipeline_mode<synchronous>, transform_indices = @transform_3, window_bounds = array<i64: 32, 64>}, {pipeline_mode = #tpu.pipeline_mode<synchronous>, transform_indices = @transform_4, window_bounds = array<i64: 1, 32>}, {pipeline_mode = #tpu.pipeline_mode<synchronous>, transform_indices = @transform_5, window_bounds = array<i64: 1, 64>}, {pipeline_mode = #tpu.pipeline_mode<synchronous>, transform_indices = @transform_6, window_bounds = array<i64: 4, 8, 32>}, {pipeline_mode = #tpu.pipeline_mode<synchronous>, transform_indices = @transform_7, window_bounds = array<i64: 1, 32>}, {pipeline_mode = #tpu.pipeline_mode<synchronous>, transform_indices = @transform_8, window_bounds = array<i64: 32, 128>}, {pipeline_mode = #tpu.pipeline_mode<synchronous>, transform_indices = @transform_9, window_bounds = array<i64: 1, 128>}, {pipeline_mode = #tpu.pipeline_mode<synchronous>, transform_indices = @transform_10, window_bounds = array<i64: 128, 32>}, {pipeline_mode = #tpu.pipeline_mode<synchronous>, transform_indices = @transform_11, window_bounds = array<i64: 1, 32>}, {pipeline_mode = #tpu.pipeline_mode<synchronous>, transform_indices = @transform_12, window_bounds = array<i64: 1, 32>}, {pipeline_mode = #tpu.pipeline_mode<synchronous>, transform_indices = @transform_13, window_bounds = array<i64: 1, 32>}, {pipeline_mode = #tpu.pipeline_mode<synchronous>, transform_indices = @transform_14, window_bounds = array<i64: 1, 32>}, {pipeline_mode = #tpu.pipeline_mode<synchronous>, transform_indices = @transform_15, window_bounds = array<i64: 1, 32>}, {transform_indices = @transform_16, window_bounds = array<i64: 1, 8, 32>}]} {
    %c0 = arith.constant 0 : index
    %c0_0 = arith.constant 0 : index
    %c0_1 = arith.constant 0 : index
    %0 = vector.load %arg3[%c0, %c0_0, %c0_1] : memref<1x8x32xf32, #tpu.memory_space<vmem>>, vector<1x8x32xf32>
    %1 = vector.shape_cast %0 : vector<1x8x32xf32> to vector<8x32xf32>
    %c0_i32 = arith.constant 0 : i32
    %2 = arith.cmpi eq, %arg2, %c0_i32 : i32
    %3 = arith.extui %2 : i1 to i32
    %c0_i32_2 = arith.constant 0 : i32
    %4 = arith.cmpi ne, %3, %c0_i32_2 : i32
    scf.if %4 {
      %c0_37 = arith.constant 0 : index
      %c0_38 = arith.constant 0 : index
      %45 = vector.load %arg5[%c0_37, %c0_38] : memref<32x32xf32, #tpu.memory_space<vmem>>, vector<32x32xf32>
      %cst_39 = arith.constant dense<0.000000e+00> : vector<8x32xf32>
      %46 = tpu.matmul %1, %45, %cst_39 {dimension_numbers = #tpu.dot_dimension_numbers<[1], [0], [0], [1], [0, 0, 1, 1], [], []>} : vector<8x32xf32>, vector<32x32xf32>, vector<8x32xf32> -> vector<8x32xf32>
      %c0_40 = arith.constant 0 : index
      %c0_41 = arith.constant 0 : index
      %47 = vector.load %arg7[%c0_40, %c0_41] : memref<1x32xf32, #tpu.memory_space<vmem>>, vector<1x32xf32>
      %48 = vector.broadcast %47 : vector<1x32xf32> to vector<8x32xf32>
      %49 = arith.addf %46, %48 : vector<8x32xf32>
      %50 = vector.shape_cast %49 : vector<8x32xf32> to vector<8x4x8xf32>
      %51 = tpu.transpose %50, [1, 0, 2] : vector<8x4x8xf32> -> vector<4x8x8xf32>
      %c0_42 = arith.constant 0 : index
      %c0_43 = arith.constant 0 : index
      %c0_44 = arith.constant 0 : index
      %52 = vector.load %arg20[%c0_42, %c0_43, %c0_44] : memref<4x8x8xf32, #tpu.memory_space<vmem>>, vector<4x8x8xf32>
      tpu.vector_store %arg20[%c0_42, %c0_43, %c0_44], %51 {strides = array<i32>} : memref<4x8x8xf32, #tpu.memory_space<vmem>>, vector<4x8x8xf32>,
      %cst_45 = arith.constant 0xFF800000 : f32
      %53 = vector.broadcast %cst_45 : f32 to vector<4x8x1xf32>
      %c0_46 = arith.constant 0 : index
      %c0_47 = arith.constant 0 : index
      %c0_48 = arith.constant 0 : index
      %54 = vector.load %arg21[%c0_46, %c0_47, %c0_48] : memref<4x8x1xf32, #tpu.memory_space<vmem>>, vector<4x8x1xf32>
      tpu.vector_store %arg21[%c0_46, %c0_47, %c0_48], %53 {strides = array<i32>} : memref<4x8x1xf32, #tpu.memory_space<vmem>>, vector<4x8x1xf32>,
      %cst_49 = arith.constant 0.000000e+00 : f32
      %55 = vector.broadcast %cst_49 : f32 to vector<4x8x1xf32>
      %c0_50 = arith.constant 0 : index
      %c0_51 = arith.constant 0 : index
      %c0_52 = arith.constant 0 : index
      %56 = vector.load %arg22[%c0_50, %c0_51, %c0_52] : memref<4x8x1xf32, #tpu.memory_space<vmem>>, vector<4x8x1xf32>
      tpu.vector_store %arg22[%c0_50, %c0_51, %c0_52], %55 {strides = array<i32>} : memref<4x8x1xf32, #tpu.memory_space<vmem>>, vector<4x8x1xf32>,
      %cst_53 = arith.constant 0.000000e+00 : f32
      %57 = vector.broadcast %cst_53 : f32 to vector<4x8x8xf32>
      %c0_54 = arith.constant 0 : index
      %c0_55 = arith.constant 0 : index
      %c0_56 = arith.constant 0 : index
      %58 = vector.load %arg23[%c0_54, %c0_55, %c0_56] : memref<4x8x8xf32, #tpu.memory_space<vmem>>, vector<4x8x8xf32>
      tpu.vector_store %arg23[%c0_54, %c0_55, %c0_56], %57 {strides = array<i32>} : memref<4x8x8xf32, #tpu.memory_space<vmem>>, vector<4x8x8xf32>,
    } else {
    }
    %c0_3 = arith.constant 0 : index
    %c0_4 = arith.constant 0 : index
    %c0_5 = arith.constant 0 : index
    %5 = vector.load %arg4[%c0_3, %c0_4, %c0_5] : memref<1x8x32xf32, #tpu.memory_space<vmem>>, vector<1x8x32xf32>
    %6 = vector.shape_cast %5 : vector<1x8x32xf32> to vector<8x32xf32>
    %c0_6 = arith.constant 0 : index
    %c0_7 = arith.constant 0 : index
    %7 = vector.load %arg6[%c0_6, %c0_7] : memref<32x64xf32, #tpu.memory_space<vmem>>, vector<32x64xf32>
    %cst = arith.constant dense<0.000000e+00> : vector<8x64xf32>
    %8 = tpu.matmul %6, %7, %cst {dimension_numbers = #tpu.dot_dimension_numbers<[1], [0], [0], [1], [0, 0, 1, 1], [], []>} : vector<8x32xf32>, vector<32x64xf32>, vector<8x64xf32> -> vector<8x64xf32>
    %c0_8 = arith.constant 0 : index
    %c0_9 = arith.constant 0 : index
    %9 = vector.load %arg8[%c0_8, %c0_9] : memref<1x64xf32, #tpu.memory_space<vmem>>, vector<1x64xf32>
    %10 = vector.broadcast %9 : vector<1x64xf32> to vector<8x64xf32>
    %11 = arith.addf %8, %10 : vector<8x64xf32>
    %12 = vector.extract_strided_slice %11 {offsets = [0, 0], sizes = [8, 32], strides = [1, 1]} : vector<8x64xf32> to vector<8x32xf32>
    %13 = vector.extract_strided_slice %11 {offsets = [0, 32], sizes = [8, 32], strides = [1, 1]} : vector<8x64xf32> to vector<8x32xf32>
    %14 = vector.shape_cast %12 : vector<8x32xf32> to vector<8x4x8xf32>
    %15 = tpu.transpose %14, [1, 0, 2] : vector<8x4x8xf32> -> vector<4x8x8xf32>
    %16 = vector.shape_cast %13 : vector<8x32xf32> to vector<8x4x8xf32>
    %17 = tpu.transpose %16, [1, 0, 2] : vector<8x4x8xf32> -> vector<4x8x8xf32>
    %c0_10 = arith.constant 0 : index
    %c0_11 = arith.constant 0 : index
    %c0_12 = arith.constant 0 : index
    %18 = vector.load %arg20[%c0_10, %c0_11, %c0_12] : memref<4x8x8xf32, #tpu.memory_space<vmem>>, vector<4x8x8xf32>
    "tpu.trace_start"() <{level = 10 : i32, message = "hqd,hkd->hqk"}> : () -> ()
    %cst_13 = arith.constant dense<0.000000e+00> : vector<4x8x8xf32>
    %19 = tpu.matmul %18, %15, %cst_13 {dimension_numbers = #tpu.dot_dimension_numbers<[2], [2], [1], [1], [0, 0, 0, 1, 1, 1], [0], [0]>} : vector<4x8x8xf32>, vector<4x8x8xf32>, vector<4x8x8xf32> -> vector<4x8x8xf32>
    "tpu.trace_stop"() : () -> ()
    %c0_14 = arith.constant 0 : index
    %c0_15 = arith.constant 0 : index
    %c0_16 = arith.constant 0 : index
    %20 = vector.load %arg21[%c0_14, %c0_15, %c0_16] : memref<4x8x1xf32, #tpu.memory_space<vmem>>, vector<4x8x1xf32>
    %cst_17 = arith.constant dense<0xFF800000> : vector<4x8xf32>
    %21 = vector.multi_reduction <maximumf>, %19, %cst_17 [2] : vector<4x8x8xf32> to vector<4x8xf32>
    %22 = vector.shape_cast %21 : vector<4x8xf32> to vector<4x8x1xf32>
    %23 = arith.maximumf %20, %22 : vector<4x8x1xf32>
    %24 = arith.subf %20, %23 : vector<4x8x1xf32>
    %25 = math.exp %24 : vector<4x8x1xf32>
    %26 = vector.broadcast %23 : vector<4x8x1xf32> to vector<4x8x8xf32>
    %27 = arith.subf %19, %26 : vector<4x8x8xf32>
    %28 = math.exp %27 : vector<4x8x8xf32>
    %c0_18 = arith.constant 0 : index
    %c0_19 = arith.constant 0 : index
    %c0_20 = arith.constant 0 : index
    %29 = vector.load %arg22[%c0_18, %c0_19, %c0_20] : memref<4x8x1xf32, #tpu.memory_space<vmem>>, vector<4x8x1xf32>
    %30 = arith.mulf %25, %29 : vector<4x8x1xf32>
    %cst_21 = arith.constant dense<0.000000e+00> : vector<4x8xf32>
    %31 = vector.multi_reduction <add>, %28, %cst_21 [2] : vector<4x8x8xf32> to vector<4x8xf32>
    %32 = vector.shape_cast %31 : vector<4x8xf32> to vector<4x8x1xf32>
    %33 = arith.addf %30, %32 : vector<4x8x1xf32>
    %c0_22 = arith.constant 0 : index
    %c0_23 = arith.constant 0 : index
    %c0_24 = arith.constant 0 : index
    %34 = vector.load %arg22[%c0_22, %c0_23, %c0_24] : memref<4x8x1xf32, #tpu.memory_space<vmem>>, vector<4x8x1xf32>
    tpu.vector_store %arg22[%c0_22, %c0_23, %c0_24], %33 {strides = array<i32>} : memref<4x8x1xf32, #tpu.memory_space<vmem>>, vector<4x8x1xf32>,
    %c0_25 = arith.constant 0 : index
    %c0_26 = arith.constant 0 : index
    %c0_27 = arith.constant 0 : index
    %35 = vector.load %arg23[%c0_25, %c0_26, %c0_27] : memref<4x8x8xf32, #tpu.memory_space<vmem>>, vector<4x8x8xf32>
    %36 = vector.broadcast %25 : vector<4x8x1xf32> to vector<4x8x8xf32>
    %37 = arith.mulf %36, %35 : vector<4x8x8xf32>
    "tpu.trace_start"() <{level = 10 : i32, message = "hqk,hkd->hqd"}> : () -> ()
    %cst_28 = arith.constant dense<0.000000e+00> : vector<4x8x8xf32>
    %38 = tpu.matmul %28, %17, %cst_28 {dimension_numbers = #tpu.dot_dimension_numbers<[2], [1], [1], [2], [0, 0, 0, 1, 1, 2], [0], [0]>} : vector<4x8x8xf32>, vector<4x8x8xf32>, vector<4x8x8xf32> -> vector<4x8x8xf32>
    "tpu.trace_stop"() : () -> ()
    %39 = arith.addf %37, %38 : vector<4x8x8xf32>
    %c0_29 = arith.constant 0 : index
    %c0_30 = arith.constant 0 : index
    %c0_31 = arith.constant 0 : index
    %40 = vector.load %arg23[%c0_29, %c0_30, %c0_31] : memref<4x8x8xf32, #tpu.memory_space<vmem>>, vector<4x8x8xf32>
    tpu.vector_store %arg23[%c0_29, %c0_30, %c0_31], %39 {strides = array<i32>} : memref<4x8x8xf32, #tpu.memory_space<vmem>>, vector<4x8x8xf32>,
    %c0_32 = arith.constant 0 : index
    %c0_33 = arith.constant 0 : index
    %c0_34 = arith.constant 0 : index
    %41 = vector.load %arg21[%c0_32, %c0_33, %c0_34] : memref<4x8x1xf32, #tpu.memory_space<vmem>>, vector<4x8x1xf32>
    tpu.vector_store %arg21[%c0_32, %c0_33, %c0_34], %23 {strides = array<i32>} : memref<4x8x1xf32, #tpu.memory_space<vmem>>, vector<4x8x1xf32>,
    %c0_i32_35 = arith.constant 0 : i32
    %42 = arith.cmpi eq, %arg2, %c0_i32_35 : i32
    %43 = arith.extui %42 : i1 to i32
    %c0_i32_36 = arith.constant 0 : i32
    %44 = arith.cmpi ne, %43, %c0_i32_36 : i32
    scf.if %44 {
      %c0_37 = arith.constant 0 : index
      %c0_38 = arith.constant 0 : index
      %c0_39 = arith.constant 0 : index
      %45 = vector.load %arg23[%c0_37, %c0_38, %c0_39] : memref<4x8x8xf32, #tpu.memory_space<vmem>>, vector<4x8x8xf32>
      %c0_40 = arith.constant 0 : index
      %c0_41 = arith.constant 0 : index
      %c0_42 = arith.constant 0 : index
      %46 = vector.load %arg22[%c0_40, %c0_41, %c0_42] : memref<4x8x1xf32, #tpu.memory_space<vmem>>, vector<4x8x1xf32>
      %47 = tpu.reciprocal %46 {approx = true} : vector<4x8x1xf32> -> vector<4x8x1xf32>
      %48 = vector.broadcast %47 : vector<4x8x1xf32> to vector<4x8x8xf32>
      %49 = arith.mulf %45, %48 : vector<4x8x8xf32>
      %c0_43 = arith.constant 0 : index
      %c0_44 = arith.constant 0 : index
      %c0_45 = arith.constant 0 : index
      %50 = vector.load %arg9[%c0_43, %c0_44, %c0_45] : memref<4x8x32xf32, #tpu.memory_space<vmem>>, vector<4x8x32xf32>
      "tpu.trace_start"() <{level = 10 : i32, message = "hqd,hde->hqe"}> : () -> ()
      %cst_46 = arith.constant dense<0.000000e+00> : vector<4x8x32xf32>
      %51 = tpu.matmul %49, %50, %cst_46 {dimension_numbers = #tpu.dot_dimension_numbers<[2], [1], [1], [2], [0, 0, 0, 1, 1, 2], [0], [0]>} : vector<4x8x8xf32>, vector<4x8x32xf32>, vector<4x8x32xf32> -> vector<4x8x32xf32>
      "tpu.trace_stop"() : () -> ()
      %cst_47 = arith.constant dense<0.000000e+00> : vector<8x32xf32>
      %52 = vector.multi_reduction <add>, %51, %cst_47 [0] : vector<4x8x32xf32> to vector<8x32xf32>
      %c0_48 = arith.constant 0 : index
      %c0_49 = arith.constant 0 : index
      %53 = vector.load %arg10[%c0_48, %c0_49] : memref<1x32xf32, #tpu.memory_space<vmem>>, vector<1x32xf32>
      %54 = vector.broadcast %53 : vector<1x32xf32> to vector<8x32xf32>
      %55 = arith.addf %52, %54 : vector<8x32xf32>
      %56 = arith.addf %1, %55 : vector<8x32xf32>
      %c0_50 = arith.constant 0 : index
      %c0_51 = arith.constant 0 : index
      %57 = vector.load %arg15[%c0_50, %c0_51] : memref<1x32xf32, #tpu.memory_space<vmem>>, vector<1x32xf32>
      %c0_52 = arith.constant 0 : index
      %c0_53 = arith.constant 0 : index
      %58 = vector.load %arg16[%c0_52, %c0_53] : memref<1x32xf32, #tpu.memory_space<vmem>>, vector<1x32xf32>
      %cst_54 = arith.constant dense<0.000000e+00> : vector<8xf32>
      %59 = vector.multi_reduction <add>, %56, %cst_54 [1] : vector<8x32xf32> to vector<8xf32>
      %60 = vector.shape_cast %59 : vector<8xf32> to vector<8x1xf32>
      %cst_55 = arith.constant 3.200000e+01 : f32
      %61 = vector.broadcast %cst_55 : f32 to vector<8x1xf32>
      %62 = arith.divf %60, %61 : vector<8x1xf32>
      %63 = vector.broadcast %62 : vector<8x1xf32> to vector<8x32xf32>
      %64 = arith.subf %56, %63 : vector<8x32xf32>
      %65 = arith.mulf %64, %64 : vector<8x32xf32>
      %cst_56 = arith.constant dense<0.000000e+00> : vector<8xf32>
      %66 = vector.multi_reduction <add>, %65, %cst_56 [1] : vector<8x32xf32> to vector<8xf32>
      %67 = vector.shape_cast %66 : vector<8xf32> to vector<8x1xf32>
      %cst_57 = arith.constant 3.200000e+01 : f32
      %68 = vector.broadcast %cst_57 : f32 to vector<8x1xf32>
      %69 = arith.divf %67, %68 : vector<8x1xf32>
      %70 = vector.broadcast %62 : vector<8x1xf32> to vector<8x32xf32>
      %71 = arith.subf %56, %70 : vector<8x32xf32>
      %cst_58 = arith.constant 9.99999974E-6 : f32
      %72 = vector.broadcast %cst_58 : f32 to vector<8x1xf32>
      %73 = arith.addf %69, %72 : vector<8x1xf32>
      %74 = math.rsqrt %73 : vector<8x1xf32>
      %75 = vector.broadcast %74 : vector<8x1xf32> to vector<8x32xf32>
      %76 = arith.mulf %71, %75 : vector<8x32xf32>
      %77 = vector.broadcast %57 : vector<1x32xf32> to vector<8x32xf32>
      %78 = arith.mulf %76, %77 : vector<8x32xf32>
      %79 = vector.broadcast %58 : vector<1x32xf32> to vector<8x32xf32>
      %80 = arith.addf %78, %79 : vector<8x32xf32>
      %c0_59 = arith.constant 0 : index
      %c0_60 = arith.constant 0 : index
      %81 = vector.load %arg11[%c0_59, %c0_60] : memref<32x128xf32, #tpu.memory_space<vmem>>, vector<32x128xf32>
      %cst_61 = arith.constant dense<0.000000e+00> : vector<8x128xf32>
      %82 = tpu.matmul %80, %81, %cst_61 {dimension_numbers = #tpu.dot_dimension_numbers<[1], [0], [0], [1], [0, 0, 1, 1], [], []>} : vector<8x32xf32>, vector<32x128xf32>, vector<8x128xf32> -> vector<8x128xf32>
      %c0_62 = arith.constant 0 : index
      %c0_63 = arith.constant 0 : index
      %83 = vector.load %arg12[%c0_62, %c0_63] : memref<1x128xf32, #tpu.memory_space<vmem>>, vector<1x128xf32>
      %84 = vector.broadcast %83 : vector<1x128xf32> to vector<8x128xf32>
      %85 = arith.addf %82, %84 : vector<8x128xf32>
      %cst_64 = arith.constant 0.000000e+00 : f32
      %86 = vector.broadcast %cst_64 : f32 to vector<8x128xf32>
      %87 = arith.maximumf %85, %86 : vector<8x128xf32>
      %c0_65 = arith.constant 0 : index
      %c0_66 = arith.constant 0 : index
      %88 = vector.load %arg13[%c0_65, %c0_66] : memref<128x32xf32, #tpu.memory_space<vmem>>, vector<128x32xf32>
      %cst_67 = arith.constant dense<0.000000e+00> : vector<8x32xf32>
      %89 = tpu.matmul %87, %88, %cst_67 {dimension_numbers = #tpu.dot_dimension_numbers<[1], [0], [0], [1], [0, 0, 1, 1], [], []>} : vector<8x128xf32>, vector<128x32xf32>, vector<8x32xf32> -> vector<8x32xf32>
      %c0_68 = arith.constant 0 : index
      %c0_69 = arith.constant 0 : index
      %90 = vector.load %arg14[%c0_68, %c0_69] : memref<1x32xf32, #tpu.memory_space<vmem>>, vector<1x32xf32>
      %91 = vector.broadcast %90 : vector<1x32xf32> to vector<8x32xf32>
      %92 = arith.addf %89, %91 : vector<8x32xf32>
      %93 = arith.addf %80, %92 : vector<8x32xf32>
      %c0_70 = arith.constant 0 : index
      %c0_71 = arith.constant 0 : index
      %94 = vector.load %arg17[%c0_70, %c0_71] : memref<1x32xf32, #tpu.memory_space<vmem>>, vector<1x32xf32>
      %c0_72 = arith.constant 0 : index
      %c0_73 = arith.constant 0 : index
      %95 = vector.load %arg18[%c0_72, %c0_73] : memref<1x32xf32, #tpu.memory_space<vmem>>, vector<1x32xf32>
      %cst_74 = arith.constant dense<0.000000e+00> : vector<8xf32>
      %96 = vector.multi_reduction <add>, %93, %cst_74 [1] : vector<8x32xf32> to vector<8xf32>
      %97 = vector.shape_cast %96 : vector<8xf32> to vector<8x1xf32>
      %cst_75 = arith.constant 3.200000e+01 : f32
      %98 = vector.broadcast %cst_75 : f32 to vector<8x1xf32>
      %99 = arith.divf %97, %98 : vector<8x1xf32>
      %100 = vector.broadcast %99 : vector<8x1xf32> to vector<8x32xf32>
      %101 = arith.subf %93, %100 : vector<8x32xf32>
      %102 = arith.mulf %101, %101 : vector<8x32xf32>
      %cst_76 = arith.constant dense<0.000000e+00> : vector<8xf32>
      %103 = vector.multi_reduction <add>, %102, %cst_76 [1] : vector<8x32xf32> to vector<8xf32>
      %104 = vector.shape_cast %103 : vector<8xf32> to vector<8x1xf32>
      %cst_77 = arith.constant 3.200000e+01 : f32
      %105 = vector.broadcast %cst_77 : f32 to vector<8x1xf32>
      %106 = arith.divf %104, %105 : vector<8x1xf32>
      %107 = vector.broadcast %99 : vector<8x1xf32> to vector<8x32xf32>
      %108 = arith.subf %93, %107 : vector<8x32xf32>
      %cst_78 = arith.constant 9.99999974E-6 : f32
      %109 = vector.broadcast %cst_78 : f32 to vector<8x1xf32>
      %110 = arith.addf %106, %109 : vector<8x1xf32>
      %111 = math.rsqrt %110 : vector<8x1xf32>
      %112 = vector.broadcast %111 : vector<8x1xf32> to vector<8x32xf32>
      %113 = arith.mulf %108, %112 : vector<8x32xf32>
      %114 = vector.broadcast %94 : vector<1x32xf32> to vector<8x32xf32>
      %115 = arith.mulf %113, %114 : vector<8x32xf32>
      %116 = vector.broadcast %95 : vector<1x32xf32> to vector<8x32xf32>
      %117 = arith.addf %115, %116 : vector<8x32xf32>
      %c0_79 = arith.constant 0 : index
      %c0_80 = arith.constant 0 : index
      %c0_81 = arith.constant 0 : index
      %118 = vector.load %arg19[%c0_79, %c0_80, %c0_81] : memref<1x8x32xf32, #tpu.memory_space<vmem>>, vector<1x8x32xf32>
      %119 = vector.shape_cast %118 : vector<1x8x32xf32> to vector<8x32xf32>
      %120 = vector.shape_cast %117 : vector<8x32xf32> to vector<1x8x32xf32>
      tpu.vector_store %arg19[%c0_79, %c0_80, %c0_81], %120 {strides = array<i32>} : memref<1x8x32xf32, #tpu.memory_space<vmem>>, vector<1x8x32xf32>,
    } else {
    }
    return
  }
  func.func @transform_0(%arg0: i32, %arg1: i32, %arg2: i32) -> (i32, i32, i32) {
    %c0_i32 = arith.constant 0 : i32
    %c0_i32_0 = arith.constant 0 : i32
    return %arg0, %arg1, %c0_i32 : i32, i32, i32
  }
  func.func @transform_1(%arg0: i32, %arg1: i32, %arg2: i32) -> (i32, i32, i32) {
    %c0_i32 = arith.constant 0 : i32
    %c0_i32_0 = arith.constant 0 : i32
    return %arg0, %arg2, %c0_i32 : i32, i32, i32
  }
  func.func @transform_2(%arg0: i32, %arg1: i32, %arg2: i32) -> (i32, i32) {
    %c0_i32 = arith.constant 0 : i32
    %c0_i32_0 = arith.constant 0 : i32
    %c0_i32_1 = arith.constant 0 : i32
    return %c0_i32, %c0_i32_0 : i32, i32
  }
  func.func @transform_3(%arg0: i32, %arg1: i32, %arg2: i32) -> (i32, i32) {
    %c0_i32 = arith.constant 0 : i32
    %c0_i32_0 = arith.constant 0 : i32
    %c0_i32_1 = arith.constant 0 : i32
    return %c0_i32, %c0_i32_0 : i32, i32
  }
  func.func @transform_4(%arg0: i32, %arg1: i32, %arg2: i32) -> (i32, i32) {
    %c0_i32 = arith.constant 0 : i32
    %c0_i32_0 = arith.constant 0 : i32
    %c0_i32_1 = arith.constant 0 : i32
    return %c0_i32, %c0_i32_0 : i32, i32
  }
  func.func @transform_5(%arg0: i32, %arg1: i32, %arg2: i32) -> (i32, i32) {
    %c0_i32 = arith.constant 0 : i32
    %c0_i32_0 = arith.constant 0 : i32
    %c0_i32_1 = arith.constant 0 : i32
    return %c0_i32, %c0_i32_0 : i32, i32
  }
  func.func @transform_6(%arg0: i32, %arg1: i32, %arg2: i32) -> (i32, i32, i32) {
    %c0_i32 = arith.constant 0 : i32
    %c0_i32_0 = arith.constant 0 : i32
    %c0_i32_1 = arith.constant 0 : i32
    %c0_i32_2 = arith.constant 0 : i32
    return %c0_i32, %c0_i32_0, %c0_i32_1 : i32, i32, i32
  }
  func.func @transform_7(%arg0: i32, %arg1: i32, %arg2: i32) -> (i32, i32) {
    %c0_i32 = arith.constant 0 : i32
    %c0_i32_0 = arith.constant 0 : i32
    %c0_i32_1 = arith.constant 0 : i32
    return %c0_i32, %c0_i32_0 : i32, i32
  }
  func.func @transform_8(%arg0: i32, %arg1: i32, %arg2: i32) -> (i32, i32) {
    %c0_i32 = arith.constant 0 : i32
    %c0_i32_0 = arith.constant 0 : i32
    %c0_i32_1 = arith.constant 0 : i32
    return %c0_i32, %c0_i32_0 : i32, i32
  }
  func.func @transform_9(%arg0: i32, %arg1: i32, %arg2: i32) -> (i32, i32) {
    %c0_i32 = arith.constant 0 : i32
    %c0_i32_0 = arith.constant 0 : i32
    %c0_i32_1 = arith.constant 0 : i32
    return %c0_i32, %c0_i32_0 : i32, i32
  }
  func.func @transform_10(%arg0: i32, %arg1: i32, %arg2: i32) -> (i32, i32) {
    %c0_i32 = arith.constant 0 : i32
    %c0_i32_0 = arith.constant 0 : i32
    %c0_i32_1 = arith.constant 0 : i32
    return %c0_i32, %c0_i32_0 : i32, i32
  }
  func.func @transform_11(%arg0: i32, %arg1: i32, %arg2: i32) -> (i32, i32) {
    %c0_i32 = arith.constant 0 : i32
    %c0_i32_0 = arith.constant 0 : i32
    %c0_i32_1 = arith.constant 0 : i32
    return %c0_i32, %c0_i32_0 : i32, i32
  }
  func.func @transform_12(%arg0: i32, %arg1: i32, %arg2: i32) -> (i32, i32) {
    %c0_i32 = arith.constant 0 : i32
    %c0_i32_0 = arith.constant 0 : i32
    %c0_i32_1 = arith.constant 0 : i32
    return %c0_i32, %c0_i32_0 : i32, i32
  }
  func.func @transform_13(%arg0: i32, %arg1: i32, %arg2: i32) -> (i32, i32) {
    %c0_i32 = arith.constant 0 : i32
    %c0_i32_0 = arith.constant 0 : i32
    %c0_i32_1 = arith.constant 0 : i32
    return %c0_i32, %c0_i32_0 : i32, i32
  }
  func.func @transform_14(%arg0: i32, %arg1: i32, %arg2: i32) -> (i32, i32) {
    %c0_i32 = arith.constant 0 : i32
    %c0_i32_0 = arith.constant 0 : i32
    %c0_i32_1 = arith.constant 0 : i32
    return %c0_i32, %c0_i32_0 : i32, i32
  }
  func.func @transform_15(%arg0: i32, %arg1: i32, %arg2: i32) -> (i32, i32) {
    %c0_i32 = arith.constant 0 : i32
    %c0_i32_0 = arith.constant 0 : i32
    %c0_i32_1 = arith.constant 0 : i32
    return %c0_i32, %c0_i32_0 : i32, i32
  }
  func.func @transform_16(%arg0: i32, %arg1: i32, %arg2: i32) -> (i32, i32, i32) {
    %c0_i32 = arith.constant 0 : i32
    %c0_i32_0 = arith.constant 0 : i32
    return %arg0, %arg1, %c0_i32 : i32, i32, i32
  }
}

module attributes {stable_mosaic.version = 11 : i64} {
  func.func @_encoder_layer_kernel(%arg0: i32, %arg1: i32, %arg2: i32, %arg3: memref<1x8x32xf32, #tpu.memory_space<vmem>>, %arg4: memref<1x8x32xf32, #tpu.memory_space<vmem>>, %arg5: memref<32x32xf32, #tpu.memory_space<vmem>>, %arg6: memref<32x64xf32, #tpu.memory_space<vmem>>, %arg7: memref<1x32xf32, #tpu.memory_space<vmem>>, %arg8: memref<1x64xf32, #tpu.memory_space<vmem>>, %arg9: memref<4x8x32xf32, #tpu.memory_space<vmem>>, %arg10: memref<1x32xf32, #tpu.memory_space<vmem>>, %arg11: memref<32x128xf32, #tpu.memory_space<vmem>>, %arg12: memref<1x128xf32, #tpu.memory_space<vmem>>, %arg13: memref<128x32xf32, #tpu.memory_space<vmem>>, %arg14: memref<1x32xf32, #tpu.memory_space<vmem>>, %arg15: memref<1x32xf32, #tpu.memory_space<vmem>>, %arg16: memref<1x32xf32, #tpu.memory_space<vmem>>, %arg17: memref<1x32xf32, #tpu.memory_space<vmem>>, %arg18: memref<1x32xf32, #tpu.memory_space<vmem>>, %arg19: memref<1x8x32xf32, #tpu.memory_space<vmem>>, %arg20: memref<4x8x8xf32, #tpu.memory_space<vmem>>, %arg21: memref<4x8x1xf32, #tpu.memory_space<vmem>>, %arg22: memref<4x8x1xf32, #tpu.memory_space<vmem>>, %arg23: memref<4x8x8xf32, #tpu.memory_space<vmem>>) attributes {dimension_semantics = [#tpu.dimension_semantics<parallel>, #tpu.dimension_semantics<parallel>, #tpu.dimension_semantics<arbitrary>], iteration_bounds = array<i64: 2, 1, 1>, scalar_prefetch = 0 : i64, scratch_operands = 4 : i64, tpu.core_type = #tpu.core_type<tc>, window_params = [{transform_indices = @transform_0, window_bounds = array<i64: 1, 8, 32>}, {transform_indices = @transform_1, window_bounds = array<i64: 1, 8, 32>}, {pipeline_mode = #tpu.pipeline_mode<synchronous>, transform_indices = @transform_2, window_bounds = array<i64: 32, 32>}, {pipeline_mode = #tpu.pipeline_mode<synchronous>, transform_indices = @transform_3, window_bounds = array<i64: 32, 64>}, {pipeline_mode = #tpu.pipeline_mode<synchronous>, transform_indices = @transform_4, window_bounds = array<i64: 1, 32>}, {pipeline_mode = #tpu.pipeline_mode<synchronous>, transform_indices = @transform_5, window_bounds = array<i64: 1, 64>}, {pipeline_mode = #tpu.pipeline_mode<synchronous>, transform_indices = @transform_6, window_bounds = array<i64: 4, 8, 32>}, {pipeline_mode = #tpu.pipeline_mode<synchronous>, transform_indices = @transform_7, window_bounds = array<i64: 1, 32>}, {pipeline_mode = #tpu.pipeline_mode<synchronous>, transform_indices = @transform_8, window_bounds = array<i64: 32, 128>}, {pipeline_mode = #tpu.pipeline_mode<synchronous>, transform_indices = @transform_9, window_bounds = array<i64: 1, 128>}, {pipeline_mode = #tpu.pipeline_mode<synchronous>, transform_indices = @transform_10, window_bounds = array<i64: 128, 32>}, {pipeline_mode = #tpu.pipeline_mode<synchronous>, transform_indices = @transform_11, window_bounds = array<i64: 1, 32>}, {pipeline_mode = #tpu.pipeline_mode<synchronous>, transform_indices = @transform_12, window_bounds = array<i64: 1, 32>}, {pipeline_mode = #tpu.pipeline_mode<synchronous>, transform_indices = @transform_13, window_bounds = array<i64: 1, 32>}, {pipeline_mode = #tpu.pipeline_mode<synchronous>, transform_indices = @transform_14, window_bounds = array<i64: 1, 32>}, {pipeline_mode = #tpu.pipeline_mode<synchronous>, transform_indices = @transform_15, window_bounds = array<i64: 1, 32>}, {transform_indices = @transform_16, window_bounds = array<i64: 1, 8, 32>}]} {
    %c0 = arith.constant 0 : index
    %c0_0 = arith.constant 0 : index
    %c0_1 = arith.constant 0 : index
    %0 = vector.load %arg3[%c0, %c0_0, %c0_1] : memref<1x8x32xf32, #tpu.memory_space<vmem>>, vector<1x8x32xf32>
    %1 = vector.shape_cast %0 : vector<1x8x32xf32> to vector<8x32xf32>
    %c0_i32 = arith.constant 0 : i32
    %2 = arith.cmpi eq, %arg2, %c0_i32 : i32
    %3 = arith.extui %2 : i1 to i32
    %c0_i32_2 = arith.constant 0 : i32
    %4 = arith.cmpi ne, %3, %c0_i32_2 : i32
    scf.if %4 {
      %c0_37 = arith.constant 0 : index
      %c0_38 = arith.constant 0 : index
      %45 = vector.load %arg5[%c0_37, %c0_38] : memref<32x32xf32, #tpu.memory_space<vmem>>, vector<32x32xf32>
      %cst_39 = arith.constant dense<0.000000e+00> : vector<8x32xf32>
      %46 = tpu.matmul %1, %45, %cst_39 {dimension_numbers = #tpu.dot_dimension_numbers<[1], [0], [0], [1], [0, 0, 1, 1], [], []>} : vector<8x32xf32>, vector<32x32xf32>, vector<8x32xf32> -> vector<8x32xf32>
      %c0_40 = arith.constant 0 : index
      %c0_41 = arith.constant 0 : index
      %47 = vector.load %arg7[%c0_40, %c0_41] : memref<1x32xf32, #tpu.memory_space<vmem>>, vector<1x32xf32>
      %48 = vector.broadcast %47 : vector<1x32xf32> to vector<8x32xf32>
      %49 = arith.addf %46, %48 : vector<8x32xf32>
      %50 = vector.shape_cast %49 : vector<8x32xf32> to vector<8x4x8xf32>
      %51 = tpu.transpose %50, [1, 0, 2] : vector<8x4x8xf32> -> vector<4x8x8xf32>
      %c0_42 = arith.constant 0 : index
      %c0_43 = arith.constant 0 : index
      %c0_44 = arith.constant 0 : index
      %52 = vector.load %arg20[%c0_42, %c0_43, %c0_44] : memref<4x8x8xf32, #tpu.memory_space<vmem>>, vector<4x8x8xf32>
      tpu.vector_store %arg20[%c0_42, %c0_43, %c0_44], %51 {strides = array<i32>} : memref<4x8x8xf32, #tpu.memory_space<vmem>>, vector<4x8x8xf32>,
      %cst_45 = arith.constant 0xFF800000 : f32
      %53 = vector.broadcast %cst_45 : f32 to vector<4x8x1xf32>
      %c0_46 = arith.constant 0 : index
      %c0_47 = arith.constant 0 : index
      %c0_48 = arith.constant 0 : index
      %54 = vector.load %arg21[%c0_46, %c0_47, %c0_48] : memref<4x8x1xf32, #tpu.memory_space<vmem>>, vector<4x8x1xf32>
      tpu.vector_store %arg21[%c0_46, %c0_47, %c0_48], %53 {strides = array<i32>} : memref<4x8x1xf32, #tpu.memory_space<vmem>>, vector<4x8x1xf32>,
      %cst_49 = arith.constant 0.000000e+00 : f32
      %55 = vector.broadcast %cst_49 : f32 to vector<4x8x1xf32>
      %c0_50 = arith.constant 0 : index
      %c0_51 = arith.constant 0 : index
      %c0_52 = arith.constant 0 : index
      %56 = vector.load %arg22[%c0_50, %c0_51, %c0_52] : memref<4x8x1xf32, #tpu.memory_space<vmem>>, vector<4x8x1xf32>
      tpu.vector_store %arg22[%c0_50, %c0_51, %c0_52], %55 {strides = array<i32>} : memref<4x8x1xf32, #tpu.memory_space<vmem>>, vector<4x8x1xf32>,
      %cst_53 = arith.constant 0.000000e+00 : f32
      %57 = vector.broadcast %cst_53 : f32 to vector<4x8x8xf32>
      %c0_54 = arith.constant 0 : index
      %c0_55 = arith.constant 0 : index
      %c0_56 = arith.constant 0 : index
      %58 = vector.load %arg23[%c0_54, %c0_55, %c0_56] : memref<4x8x8xf32, #tpu.memory_space<vmem>>, vector<4x8x8xf32>
      tpu.vector_store %arg23[%c0_54, %c0_55, %c0_56], %57 {strides = array<i32>} : memref<4x8x8xf32, #tpu.memory_space<vmem>>, vector<4x8x8xf32>,
    } else {
    }
    %c0_3 = arith.constant 0 : index
    %c0_4 = arith.constant 0 : index
    %c0_5 = arith.constant 0 : index
    %5 = vector.load %arg4[%c0_3, %c0_4, %c0_5] : memref<1x8x32xf32, #tpu.memory_space<vmem>>, vector<1x8x32xf32>
    %6 = vector.shape_cast %5 : vector<1x8x32xf32> to vector<8x32xf32>
    %c0_6 = arith.constant 0 : index
    %c0_7 = arith.constant 0 : index
    %7 = vector.load %arg6[%c0_6, %c0_7] : memref<32x64xf32, #tpu.memory_space<vmem>>, vector<32x64xf32>
    %cst = arith.constant dense<0.000000e+00> : vector<8x64xf32>
    %8 = tpu.matmul %6, %7, %cst {dimension_numbers = #tpu.dot_dimension_numbers<[1], [0], [0], [1], [0, 0, 1, 1], [], []>} : vector<8x32xf32>, vector<32x64xf32>, vector<8x64xf32> -> vector<8x64xf32>
    %c0_8 = arith.constant 0 : index
    %c0_9 = arith.constant 0 : index
    %9 = vector.load %arg8[%c0_8, %c0_9] : memref<1x64xf32, #tpu.memory_space<vmem>>, vector<1x64xf32>
    %10 = vector.broadcast %9 : vector<1x64xf32> to vector<8x64xf32>
    %11 = arith.addf %8, %10 : vector<8x64xf32>
    %12 = vector.extract_strided_slice %11 {offsets = [0, 0], sizes = [8, 32], strides = [1, 1]} : vector<8x64xf32> to vector<8x32xf32>
    %13 = vector.extract_strided_slice %11 {offsets = [0, 32], sizes = [8, 32], strides = [1, 1]} : vector<8x64xf32> to vector<8x32xf32>
    %14 = vector.shape_cast %12 : vector<8x32xf32> to vector<8x4x8xf32>
    %15 = tpu.transpose %14, [1, 0, 2] : vector<8x4x8xf32> -> vector<4x8x8xf32>
    %16 = vector.shape_cast %13 : vector<8x32xf32> to vector<8x4x8xf32>
    %17 = tpu.transpose %16, [1, 0, 2] : vector<8x4x8xf32> -> vector<4x8x8xf32>
    %c0_10 = arith.constant 0 : index
    %c0_11 = arith.constant 0 : index
    %c0_12 = arith.constant 0 : index
    %18 = vector.load %arg20[%c0_10, %c0_11, %c0_12] : memref<4x8x8xf32, #tpu.memory_space<vmem>>, vector<4x8x8xf32>
    "tpu.trace_start"() <{level = 10 : i32, message = "hqd,hkd->hqk"}> : () -> ()
    %cst_13 = arith.constant dense<0.000000e+00> : vector<4x8x8xf32>
    %19 = tpu.matmul %18, %15, %cst_13 {dimension_numbers = #tpu.dot_dimension_numbers<[2], [2], [1], [1], [0, 0, 0, 1, 1, 1], [0], [0]>} : vector<4x8x8xf32>, vector<4x8x8xf32>, vector<4x8x8xf32> -> vector<4x8x8xf32>
    "tpu.trace_stop"() : () -> ()
    %c0_14 = arith.constant 0 : index
    %c0_15 = arith.constant 0 : index
    %c0_16 = arith.constant 0 : index
    %20 = vector.load %arg21[%c0_14, %c0_15, %c0_16] : memref<4x8x1xf32, #tpu.memory_space<vmem>>, vector<4x8x1xf32>
    %cst_17 = arith.constant dense<0xFF800000> : vector<4x8xf32>
    %21 = vector.multi_reduction <maximumf>, %19, %cst_17 [2] : vector<4x8x8xf32> to vector<4x8xf32>
    %22 = vector.shape_cast %21 : vector<4x8xf32> to vector<4x8x1xf32>
    %23 = arith.maximumf %20, %22 : vector<4x8x1xf32>
    %24 = arith.subf %20, %23 : vector<4x8x1xf32>
    %25 = math.exp %24 : vector<4x8x1xf32>
    %26 = vector.broadcast %23 : vector<4x8x1xf32> to vector<4x8x8xf32>
    %27 = arith.subf %19, %26 : vector<4x8x8xf32>
    %28 = math.exp %27 : vector<4x8x8xf32>
    %c0_18 = arith.constant 0 : index
    %c0_19 = arith.constant 0 : index
    %c0_20 = arith.constant 0 : index
    %29 = vector.load %arg22[%c0_18, %c0_19, %c0_20] : memref<4x8x1xf32, #tpu.memory_space<vmem>>, vector<4x8x1xf32>
    %30 = arith.mulf %25, %29 : vector<4x8x1xf32>
    %cst_21 = arith.constant dense<0.000000e+00> : vector<4x8xf32>
    %31 = vector.multi_reduction <add>, %28, %cst_21 [2] : vector<4x8x8xf32> to vector<4x8xf32>
    %32 = vector.shape_cast %31 : vector<4x8xf32> to vector<4x8x1xf32>
    %33 = arith.addf %30, %32 : vector<4x8x1xf32>
    %c0_22 = arith.constant 0 : index
    %c0_23 = arith.constant 0 : index
    %c0_24 = arith.constant 0 : index
    %34 = vector.load %arg22[%c0_22, %c0_23, %c0_24] : memref<4x8x1xf32, #tpu.memory_space<vmem>>, vector<4x8x1xf32>
    tpu.vector_store %arg22[%c0_22, %c0_23, %c0_24], %33 {strides = array<i32>} : memref<4x8x1xf32, #tpu.memory_space<vmem>>, vector<4x8x1xf32>,
    %c0_25 = arith.constant 0 : index
    %c0_26 = arith.constant 0 : index
    %c0_27 = arith.constant 0 : index
    %35 = vector.load %arg23[%c0_25, %c0_26, %c0_27] : memref<4x8x8xf32, #tpu.memory_space<vmem>>, vector<4x8x8xf32>
    %36 = vector.broadcast %25 : vector<4x8x1xf32> to vector<4x8x8xf32>
    %37 = arith.mulf %36, %35 : vector<4x8x8xf32>
    "tpu.trace_start"() <{level = 10 : i32, message = "hqk,hkd->hqd"}> : () -> ()
    %cst_28 = arith.constant dense<0.000000e+00> : vector<4x8x8xf32>
    %38 = tpu.matmul %28, %17, %cst_28 {dimension_numbers = #tpu.dot_dimension_numbers<[2], [1], [1], [2], [0, 0, 0, 1, 1, 2], [0], [0]>} : vector<4x8x8xf32>, vector<4x8x8xf32>, vector<4x8x8xf32> -> vector<4x8x8xf32>
    "tpu.trace_stop"() : () -> ()
    %39 = arith.addf %37, %38 : vector<4x8x8xf32>
    %c0_29 = arith.constant 0 : index
    %c0_30 = arith.constant 0 : index
    %c0_31 = arith.constant 0 : index
    %40 = vector.load %arg23[%c0_29, %c0_30, %c0_31] : memref<4x8x8xf32, #tpu.memory_space<vmem>>, vector<4x8x8xf32>
    tpu.vector_store %arg23[%c0_29, %c0_30, %c0_31], %39 {strides = array<i32>} : memref<4x8x8xf32, #tpu.memory_space<vmem>>, vector<4x8x8xf32>,
    %c0_32 = arith.constant 0 : index
    %c0_33 = arith.constant 0 : index
    %c0_34 = arith.constant 0 : index
    %41 = vector.load %arg21[%c0_32, %c0_33, %c0_34] : memref<4x8x1xf32, #tpu.memory_space<vmem>>, vector<4x8x1xf32>
    tpu.vector_store %arg21[%c0_32, %c0_33, %c0_34], %23 {strides = array<i32>} : memref<4x8x1xf32, #tpu.memory_space<vmem>>, vector<4x8x1xf32>,
    %c0_i32_35 = arith.constant 0 : i32
    %42 = arith.cmpi eq, %arg2, %c0_i32_35 : i32
    %43 = arith.extui %42 : i1 to i32
    %c0_i32_36 = arith.constant 0 : i32
    %44 = arith.cmpi ne, %43, %c0_i32_36 : i32
    scf.if %44 {
      %c0_37 = arith.constant 0 : index
      %c0_38 = arith.constant 0 : index
      %c0_39 = arith.constant 0 : index
      %45 = vector.load %arg23[%c0_37, %c0_38, %c0_39] : memref<4x8x8xf32, #tpu.memory_space<vmem>>, vector<4x8x8xf32>
      %c0_40 = arith.constant 0 : index
      %c0_41 = arith.constant 0 : index
      %c0_42 = arith.constant 0 : index
      %46 = vector.load %arg22[%c0_40, %c0_41, %c0_42] : memref<4x8x1xf32, #tpu.memory_space<vmem>>, vector<4x8x1xf32>
      %47 = tpu.reciprocal %46 {approx = true} : vector<4x8x1xf32> -> vector<4x8x1xf32>
      %48 = vector.broadcast %47 : vector<4x8x1xf32> to vector<4x8x8xf32>
      %49 = arith.mulf %45, %48 : vector<4x8x8xf32>
      %c0_43 = arith.constant 0 : index
      %c0_44 = arith.constant 0 : index
      %c0_45 = arith.constant 0 : index
      %50 = vector.load %arg9[%c0_43, %c0_44, %c0_45] : memref<4x8x32xf32, #tpu.memory_space<vmem>>, vector<4x8x32xf32>
      "tpu.trace_start"() <{level = 10 : i32, message = "hqd,hde->hqe"}> : () -> ()
      %cst_46 = arith.constant dense<0.000000e+00> : vector<4x8x32xf32>
      %51 = tpu.matmul %49, %50, %cst_46 {dimension_numbers = #tpu.dot_dimension_numbers<[2], [1], [1], [2], [0, 0, 0, 1, 1, 2], [0], [0]>} : vector<4x8x8xf32>, vector<4x8x32xf32>, vector<4x8x32xf32> -> vector<4x8x32xf32>
      "tpu.trace_stop"() : () -> ()
      %cst_47 = arith.constant dense<0.000000e+00> : vector<8x32xf32>
      %52 = vector.multi_reduction <add>, %51, %cst_47 [0] : vector<4x8x32xf32> to vector<8x32xf32>
      %c0_48 = arith.constant 0 : index
      %c0_49 = arith.constant 0 : index
      %53 = vector.load %arg10[%c0_48, %c0_49] : memref<1x32xf32, #tpu.memory_space<vmem>>, vector<1x32xf32>
      %54 = vector.broadcast %53 : vector<1x32xf32> to vector<8x32xf32>
      %55 = arith.addf %52, %54 : vector<8x32xf32>
      %56 = arith.addf %1, %55 : vector<8x32xf32>
      %c0_50 = arith.constant 0 : index
      %c0_51 = arith.constant 0 : index
      %57 = vector.load %arg15[%c0_50, %c0_51] : memref<1x32xf32, #tpu.memory_space<vmem>>, vector<1x32xf32>
      %c0_52 = arith.constant 0 : index
      %c0_53 = arith.constant 0 : index
      %58 = vector.load %arg16[%c0_52, %c0_53] : memref<1x32xf32, #tpu.memory_space<vmem>>, vector<1x32xf32>
      %cst_54 = arith.constant dense<0.000000e+00> : vector<8xf32>
      %59 = vector.multi_reduction <add>, %56, %cst_54 [1] : vector<8x32xf32> to vector<8xf32>
      %60 = vector.shape_cast %59 : vector<8xf32> to vector<8x1xf32>
      %cst_55 = arith.constant 3.200000e+01 : f32
      %61 = vector.broadcast %cst_55 : f32 to vector<8x1xf32>
      %62 = arith.divf %60, %61 : vector<8x1xf32>
      %63 = vector.broadcast %62 : vector<8x1xf32> to vector<8x32xf32>
      %64 = arith.subf %56, %63 : vector<8x32xf32>
      %65 = arith.mulf %64, %64 : vector<8x32xf32>
      %cst_56 = arith.constant dense<0.000000e+00> : vector<8xf32>
      %66 = vector.multi_reduction <add>, %65, %cst_56 [1] : vector<8x32xf32> to vector<8xf32>
      %67 = vector.shape_cast %66 : vector<8xf32> to vector<8x1xf32>
      %cst_57 = arith.constant 3.200000e+01 : f32
      %68 = vector.broadcast %cst_57 : f32 to vector<8x1xf32>
      %69 = arith.divf %67, %68 : vector<8x1xf32>
      %70 = vector.broadcast %62 : vector<8x1xf32> to vector<8x32xf32>
      %71 = arith.subf %56, %70 : vector<8x32xf32>
      %cst_58 = arith.constant 9.99999974E-6 : f32
      %72 = vector.broadcast %cst_58 : f32 to vector<8x1xf32>
      %73 = arith.addf %69, %72 : vector<8x1xf32>
      %74 = math.rsqrt %73 : vector<8x1xf32>
      %75 = vector.broadcast %74 : vector<8x1xf32> to vector<8x32xf32>
      %76 = arith.mulf %71, %75 : vector<8x32xf32>
      %77 = vector.broadcast %57 : vector<1x32xf32> to vector<8x32xf32>
      %78 = arith.mulf %76, %77 : vector<8x32xf32>
      %79 = vector.broadcast %58 : vector<1x32xf32> to vector<8x32xf32>
      %80 = arith.addf %78, %79 : vector<8x32xf32>
      %c0_59 = arith.constant 0 : index
      %c0_60 = arith.constant 0 : index
      %81 = vector.load %arg11[%c0_59, %c0_60] : memref<32x128xf32, #tpu.memory_space<vmem>>, vector<32x128xf32>
      %cst_61 = arith.constant dense<0.000000e+00> : vector<8x128xf32>
      %82 = tpu.matmul %80, %81, %cst_61 {dimension_numbers = #tpu.dot_dimension_numbers<[1], [0], [0], [1], [0, 0, 1, 1], [], []>} : vector<8x32xf32>, vector<32x128xf32>, vector<8x128xf32> -> vector<8x128xf32>
      %c0_62 = arith.constant 0 : index
      %c0_63 = arith.constant 0 : index
      %83 = vector.load %arg12[%c0_62, %c0_63] : memref<1x128xf32, #tpu.memory_space<vmem>>, vector<1x128xf32>
      %84 = vector.broadcast %83 : vector<1x128xf32> to vector<8x128xf32>
      %85 = arith.addf %82, %84 : vector<8x128xf32>
      %cst_64 = arith.constant 0.000000e+00 : f32
      %86 = vector.broadcast %cst_64 : f32 to vector<8x128xf32>
      %87 = arith.maximumf %85, %86 : vector<8x128xf32>
      %c0_65 = arith.constant 0 : index
      %c0_66 = arith.constant 0 : index
      %88 = vector.load %arg13[%c0_65, %c0_66] : memref<128x32xf32, #tpu.memory_space<vmem>>, vector<128x32xf32>
      %cst_67 = arith.constant dense<0.000000e+00> : vector<8x32xf32>
      %89 = tpu.matmul %87, %88, %cst_67 {dimension_numbers = #tpu.dot_dimension_numbers<[1], [0], [0], [1], [0, 0, 1, 1], [], []>} : vector<8x128xf32>, vector<128x32xf32>, vector<8x32xf32> -> vector<8x32xf32>
      %c0_68 = arith.constant 0 : index
      %c0_69 = arith.constant 0 : index
      %90 = vector.load %arg14[%c0_68, %c0_69] : memref<1x32xf32, #tpu.memory_space<vmem>>, vector<1x32xf32>
      %91 = vector.broadcast %90 : vector<1x32xf32> to vector<8x32xf32>
      %92 = arith.addf %89, %91 : vector<8x32xf32>
      %93 = arith.addf %80, %92 : vector<8x32xf32>
      %c0_70 = arith.constant 0 : index
      %c0_71 = arith.constant 0 : index
      %94 = vector.load %arg17[%c0_70, %c0_71] : memref<1x32xf32, #tpu.memory_space<vmem>>, vector<1x32xf32>
      %c0_72 = arith.constant 0 : index
      %c0_73 = arith.constant 0 : index
      %95 = vector.load %arg18[%c0_72, %c0_73] : memref<1x32xf32, #tpu.memory_space<vmem>>, vector<1x32xf32>
      %cst_74 = arith.constant dense<0.000000e+00> : vector<8xf32>
      %96 = vector.multi_reduction <add>, %93, %cst_74 [1] : vector<8x32xf32> to vector<8xf32>
      %97 = vector.shape_cast %96 : vector<8xf32> to vector<8x1xf32>
      %cst_75 = arith.constant 3.200000e+01 : f32
      %98 = vector.broadcast %cst_75 : f32 to vector<8x1xf32>
      %99 = arith.divf %97, %98 : vector<8x1xf32>
      %100 = vector.broadcast %99 : vector<8x1xf32> to vector<8x32xf32>
      %101 = arith.subf %93, %100 : vector<8x32xf32>
      %102 = arith.mulf %101, %101 : vector<8x32xf32>
      %cst_76 = arith.constant dense<0.000000e+00> : vector<8xf32>
      %103 = vector.multi_reduction <add>, %102, %cst_76 [1] : vector<8x32xf32> to vector<8xf32>
      %104 = vector.shape_cast %103 : vector<8xf32> to vector<8x1xf32>
      %cst_77 = arith.constant 3.200000e+01 : f32
      %105 = vector.broadcast %cst_77 : f32 to vector<8x1xf32>
      %106 = arith.divf %104, %105 : vector<8x1xf32>
      %107 = vector.broadcast %99 : vector<8x1xf32> to vector<8x32xf32>
      %108 = arith.subf %93, %107 : vector<8x32xf32>
      %cst_78 = arith.constant 9.99999974E-6 : f32
      %109 = vector.broadcast %cst_78 : f32 to vector<8x1xf32>
      %110 = arith.addf %106, %109 : vector<8x1xf32>
      %111 = math.rsqrt %110 : vector<8x1xf32>
      %112 = vector.broadcast %111 : vector<8x1xf32> to vector<8x32xf32>
      %113 = arith.mulf %108, %112 : vector<8x32xf32>
      %114 = vector.broadcast %94 : vector<1x32xf32> to vector<8x32xf32>
      %115 = arith.mulf %113, %114 : vector<8x32xf32>
      %116 = vector.broadcast %95 : vector<1x32xf32> to vector<8x32xf32>
      %117 = arith.addf %115, %116 : vector<8x32xf32>
      %c0_79 = arith.constant 0 : index
      %c0_80 = arith.constant 0 : index
      %c0_81 = arith.constant 0 : index
      %118 = vector.load %arg19[%c0_79, %c0_80, %c0_81] : memref<1x8x32xf32, #tpu.memory_space<vmem>>, vector<1x8x32xf32>
      %119 = vector.shape_cast %118 : vector<1x8x32xf32> to vector<8x32xf32>
      %120 = vector.shape_cast %117 : vector<8x32xf32> to vector<1x8x32xf32>
      tpu.vector_store %arg19[%c0_79, %c0_80, %c0_81], %120 {strides = array<i32>} : memref<1x8x32xf32, #tpu.memory_space<vmem>>, vector<1x8x32xf32>,
    } else {
    }
    return
  }
  func.func @transform_0(%arg0: i32, %arg1: i32, %arg2: i32) -> (i32, i32, i32) {
    %c0_i32 = arith.constant 0 : i32
    %c0_i32_0 = arith.constant 0 : i32
    return %arg0, %arg1, %c0_i32 : i32, i32, i32
  }
  func.func @transform_1(%arg0: i32, %arg1: i32, %arg2: i32) -> (i32, i32, i32) {
    %c0_i32 = arith.constant 0 : i32
    %c0_i32_0 = arith.constant 0 : i32
    return %arg0, %arg2, %c0_i32 : i32, i32, i32
  }
  func.func @transform_2(%arg0: i32, %arg1: i32, %arg2: i32) -> (i32, i32) {
    %c0_i32 = arith.constant 0 : i32
    %c0_i32_0 = arith.constant 0 : i32
    %c0_i32_1 = arith.constant 0 : i32
    return %c0_i32, %c0_i32_0 : i32, i32
  }
  func.func @transform_3(%arg0: i32, %arg1: i32, %arg2: i32) -> (i32, i32) {
    %c0_i32 = arith.constant 0 : i32
    %c0_i32_0 = arith.constant 0 : i32
    %c0_i32_1 = arith.constant 0 : i32
    return %c0_i32, %c0_i32_0 : i32, i32
  }
  func.func @transform_4(%arg0: i32, %arg1: i32, %arg2: i32) -> (i32, i32) {
    %c0_i32 = arith.constant 0 : i32
    %c0_i32_0 = arith.constant 0 : i32
    %c0_i32_1 = arith.constant 0 : i32
    return %c0_i32, %c0_i32_0 : i32, i32
  }
  func.func @transform_5(%arg0: i32, %arg1: i32, %arg2: i32) -> (i32, i32) {
    %c0_i32 = arith.constant 0 : i32
    %c0_i32_0 = arith.constant 0 : i32
    %c0_i32_1 = arith.constant 0 : i32
    return %c0_i32, %c0_i32_0 : i32, i32
  }
  func.func @transform_6(%arg0: i32, %arg1: i32, %arg2: i32) -> (i32, i32, i32) {
    %c0_i32 = arith.constant 0 : i32
    %c0_i32_0 = arith.constant 0 : i32
    %c0_i32_1 = arith.constant 0 : i32
    %c0_i32_2 = arith.constant 0 : i32
    return %c0_i32, %c0_i32_0, %c0_i32_1 : i32, i32, i32
  }
  func.func @transform_7(%arg0: i32, %arg1: i32, %arg2: i32) -> (i32, i32) {
    %c0_i32 = arith.constant 0 : i32
    %c0_i32_0 = arith.constant 0 : i32
    %c0_i32_1 = arith.constant 0 : i32
    return %c0_i32, %c0_i32_0 : i32, i32
  }
  func.func @transform_8(%arg0: i32, %arg1: i32, %arg2: i32) -> (i32, i32) {
    %c0_i32 = arith.constant 0 : i32
    %c0_i32_0 = arith.constant 0 : i32
    %c0_i32_1 = arith.constant 0 : i32
    return %c0_i32, %c0_i32_0 : i32, i32
  }
  func.func @transform_9(%arg0: i32, %arg1: i32, %arg2: i32) -> (i32, i32) {
    %c0_i32 = arith.constant 0 : i32
    %c0_i32_0 = arith.constant 0 : i32
    %c0_i32_1 = arith.constant 0 : i32
    return %c0_i32, %c0_i32_0 : i32, i32
  }
  func.func @transform_10(%arg0: i32, %arg1: i32, %arg2: i32) -> (i32, i32) {
    %c0_i32 = arith.constant 0 : i32
    %c0_i32_0 = arith.constant 0 : i32
    %c0_i32_1 = arith.constant 0 : i32
    return %c0_i32, %c0_i32_0 : i32, i32
  }
  func.func @transform_11(%arg0: i32, %arg1: i32, %arg2: i32) -> (i32, i32) {
    %c0_i32 = arith.constant 0 : i32
    %c0_i32_0 = arith.constant 0 : i32
    %c0_i32_1 = arith.constant 0 : i32
    return %c0_i32, %c0_i32_0 : i32, i32
  }
  func.func @transform_12(%arg0: i32, %arg1: i32, %arg2: i32) -> (i32, i32) {
    %c0_i32 = arith.constant 0 : i32
    %c0_i32_0 = arith.constant 0 : i32
    %c0_i32_1 = arith.constant 0 : i32
    return %c0_i32, %c0_i32_0 : i32, i32
  }
  func.func @transform_13(%arg0: i32, %arg1: i32, %arg2: i32) -> (i32, i32) {
    %c0_i32 = arith.constant 0 : i32
    %c0_i32_0 = arith.constant 0 : i32
    %c0_i32_1 = arith.constant 0 : i32
    return %c0_i32, %c0_i32_0 : i32, i32
  }
  func.func @transform_14(%arg0: i32, %arg1: i32, %arg2: i32) -> (i32, i32) {
    %c0_i32 = arith.constant 0 : i32
    %c0_i32_0 = arith.constant 0 : i32
    %c0_i32_1 = arith.constant 0 : i32
    return %c0_i32, %c0_i32_0 : i32, i32
  }
  func.func @transform_15(%arg0: i32, %arg1: i32, %arg2: i32) -> (i32, i32) {
    %c0_i32 = arith.constant 0 : i32
    %c0_i32_0 = arith.constant 0 : i32
    %c0_i32_1 = arith.constant 0 : i32
    return %c0_i32, %c0_i32_0 : i32, i32
  }
  func.func @transform_16(%arg0: i32, %arg1: i32, %arg2: i32) -> (i32, i32, i32) {
    %c0_i32 = arith.constant 0 : i32
    %c0_i32_0 = arith.constant 0 : i32
    return %arg0, %arg1, %c0_i32 : i32, i32, i32
  }
}

</mosaic_0001>

<bundles_post_ra>
// kernel: _forward.2
= control target key start
LH: loop header
LB: loop body
LE: loop exit
PB: predicated region body
PF: predicated region fallthrough
CT: control target
= control target key end

     0   :  { %s3088_s21 = smov 0   ;;  %s3090_s22 = smov 0   ;;  %s3517_s0 = inlined_call_operand.vmem [shape: f32[2,8,32], index: 0, kind: input, shape index: {}, may-alias: {0,1}]   ;;  %s3518_s1 = inlined_call_operand.vmem [shape: f32[2,8,32], index: 1, kind: input, shape index: {}, may-alias: {0,1}]   ;;  %s3519_s2 = inlined_call_operand.vmem [shape: f32[32,32], index: 2, kind: input, shape index: {}]   ;;  %s3520_s3 = inlined_call_operand.vmem [shape: f32[32,64], index: 3, kind: input, shape index: {}]   ;;  %s3521_s4 = inlined_call_operand.vmem [shape: f32[1,32], index: 4, kind: input, shape index: {}]   ;;  %s3522_s5 = inlined_call_operand.vmem [shape: f32[1,64], index: 5, kind: input, shape index: {}]   ;;  %s3523_s6 = inlined_call_operand.vmem [shape: f32[4,8,32], index: 6, kind: input, shape index: {}]   ;;  %s3524_s7 = inlined_call_operand.vmem [shape: f32[1,32], index: 7, kind: input, shape index: {}]   ;;  %s3525_s8 = inlined_call_operand.vmem [shape: f32[32,128], index: 8, kind: input, shape index: {}]   ;;  %s3526_s9 = inlined_call_operand.vmem [shape: f32[1,128], index: 9, kind: input, shape index: {}]   ;;  %s3527_s10 = inlined_call_operand.vmem [shape: f32[128,32], index: 10, kind: input, shape index: {}]   ;;  %s3528_s11 = inlined_call_operand.vmem [shape: f32[1,32], index: 11, kind: input, shape index: {}]   ;;  %s3529_s12 = inlined_call_operand.vmem [shape: f32[1,32], index: 12, kind: input, shape index: {}]   ;;  %s3530_s13 = inlined_call_operand.vmem [shape: f32[1,32], index: 13, kind: input, shape index: {}]   ;;  %s3531_s14 = inlined_call_operand.vmem [shape: f32[1,32], index: 14, kind: input, shape index: {}]   ;;  %s3532_s15 = inlined_call_operand.vmem [shape: f32[1,32], index: 15, kind: input, shape index: {}]   ;;  %s3533_s16 = inlined_call_operand.vmem [shape: f32[2,8,32], index: 16, kind: output, shape index: {}]  }
   0x1   :  { %3534 = sst [smem:[#allocation6_spill]] %s3517_s0  ;;  %s3092_s23 = smov 0  }
   0x2 LB: > { %s45_s24 = sadd.s32 1, %s2986_s22  ;;  %p2637_p0 = scmp.ge.s32.totalorder %s2990_s23, 1  ;;  %s2990_s23 = sphi %s3092_s23, %s26_s23   ;;  %s2986_s22 = sphi %s3090_s22, %s3537_s22   ;;  %s2982_s21 = sphi %s3088_s21, %s3536_s21  }
   0x3   : > { %p47_p1 = scmp.ge.s32.totalorder %s45_s24, 2  ;;  %p501_p2 = scmp.lt.s32.totalorder %s2990_s23, 3 }
   0x5   : > { %s3539_s24 = smov (%p47_p1, %s45_s24), 0  ;;  %p502_p3 = pnand %p2637_p0, %p501_p2 }
   0x6   : > { %v588_v0 = vld [vmem:[%s3519_s2] sm:$0xff] (!%p502_p3)  ;;  %v589_v1 = vld [vmem:[%s3519_s2 + $0x8] sm:$0xff] (!%p502_p3)  ;;  %v590_v2 = vld [vmem:[%s3519_s2 + $0x10] sm:$0xff] (!%p502_p3)  ;;  %v2992_v3 = vmov (!%p502_p3), 0.0|0.0   ;;  %vm2993_vm0 = vmmov (!%p502_p3), 0   ;;  %v2994_v6 = vmov (!%p502_p3), 0.0   ;;  %v688_v26 = vlaneseq (!%p502_p3) }
   0x7   : > { %505 = sbr.rel (%p502_p3) target bundleno = 2479 (0x9af), region = 84  ;;  %2861 = vmatprep.subr.bf16.mxu0 (!%p502_p3), %v2992_v3  ;;  %v2862_v4 = vpack.c.bf16 (!%p502_p3), %v589_v1, %v588_v0  ;;  %v591_v5 = vld [vmem:[%s3519_s2 + $0x18] sm:$0xff] (!%p502_p3)  ;;  %2741 = vmatprep.mubr.msk.f32.mxu0 (!%p502_p3), %vm2993_vm0, %v2994_v6  ;;  %p562_p4 = scmp.lt.s32.totalorder (!%p502_p3), %s2982_s21, 1  ;;  %v838_v8 = vld [vmem:[%s3520_s3] sm:$0xff] (!%p502_p3)  ;;  %v839_v9 = vld [vmem:[%s3520_s3 + $0x8] sm:$0xff] (!%p502_p3)  ;;  %vm599_vm1 = vcmask (!%p502_p3), 261120  }
   0x8   : > { %2770 = vmatprep.subr.mxu1 (!%p502_p3), %v2994_v6  ;;  %2772 = vmatprep.mubr.msk.f32.mxu1 (!%p502_p3), %vm2993_vm0, %v2994_v6  ;;  %v2865_v7 = vpack.c.bf16 (!%p502_p3), %v591_v5, %v590_v2  ;;  %s3535_s29 = sld [smem:[#allocation6_spill]] (!%p502_p3)  ;;  %v2868_v11 = vpack.c.bf16 (!%p502_p3), %v839_v9, %v838_v8  ;;  %v840_v12 = vld [vmem:[%s3520_s3 + $0x10] sm:$0xff] (!%p502_p3)  ;;  %v841_v13 = vld [vmem:[%s3520_s3 + $0x18] sm:$0xff] (!%p502_p3)  ;;  %vm819_vm2 = vcmask (!%p502_p3), 64512   ;;  %v2641_v16 = vld [vmem:[%s3521_s4] ss:$0 sm:$0xff] (!%p502_p3) }
   0x9   : > { %2863 = vmatpush3.bf16.msra.mxu0 (!%p502_p3), %v2862_v4  ;;  %v2871_v14 = vpack.c.bf16 (!%p502_p3), %v841_v13, %v840_v12  ;;  %833 = vst.msk [vmem:[#allocation5] sm:$0xff] (!%p502_p3), %vm819_vm2, %v2994_v6  ;;  %834 = vst.msk [vmem:[#allocation5 + $0x8] sm:$0xff] (!%p502_p3), %vm819_vm2, %v2994_v6  ;;  %v2645_v20 = vld [vmem:[%s3522_s5] ss:$0 sm:$0xff] (!%p502_p3)  ;;  %s2997_s18 = smov (!%p502_p3), 112   ;;  %v689_v30 = vshrl.u32 (!%p502_p3), %v688_v26, 7 }
   0xa   : > { %2864 = vmatprep.subr.bf16.mxu0 (!%p502_p3), %v2992_v3  ;;  %835 = vst.msk [vmem:[#allocation5 + $0x10] sm:$0xff] (!%p502_p3), %vm819_vm2, %v2994_v6  ;;  %836 = vst.msk [vmem:[#allocation5 + $0x18] sm:$0xff] (!%p502_p3), %vm819_vm2, %v2994_v6  ;;  %v2998_v24 = vmov (!%p502_p3), 1983009808   ;;  %v2999_v27 = vmov (!%p502_p3), 1934713408  }
   0xb   : > { %v686_v25 = vunpack.c.l.s4 (!%p502_p3), %v2998_v24  ;;  %v718_v28 = vunpack.c.l.s4 (!%p502_p3), %v2999_v27  ;;  %vm824_vm3 = vcmask (!%p502_p3), 7168  }
   0xc   : > { %829 = vst.msk [vmem:[#allocation4] sm:$0xff] (!%p502_p3), %vm824_vm3, %v2994_v6  ;;  %830 = vst.msk [vmem:[#allocation4 + $0x8] sm:$0xff] (!%p502_p3), %vm824_vm3, %v2994_v6 }
   0xd   : > { %2866 = vmatpush3.bf16.msra.mxu0 (!%p502_p3), %v2865_v7  ;;  %v687_v29 = vunpack.c.0.s8 (!%p502_p3), %v686_v25  ;;  %v719_v33 = vunpack.c.0.s8 (!%p502_p3), %v718_v28  ;;  %831 = vst.msk [vmem:[#allocation4 + $0x10] sm:$0xff] (!%p502_p3), %vm824_vm3, %v2994_v6  ;;  %832 = vst.msk [vmem:[#allocation4 + $0x18] sm:$0xff] (!%p502_p3), %vm824_vm3, %v2994_v6 }
   0xe   : > { %s3541_s21 = smov (!%p562_p4, %s2982_s21), 1  ;;  %2867 = vmatprep.subr.bf16.mxu0 %v2992_v3 }
   0xf   : > { %s3131_s26 = sshll.u32 %s3541_s21, 3  ;;  %v3178_v34 = vsub.s32 %v687_v29, %v689_v30  ;;  %v3180_v40 = vsub.s32 %v719_v33, %v689_v30  ;;  %s3002_s21 = smov 96  }
  0x10   : > { %s568_s30 = scalar_lea.vmem %s3535_s29, %s3131_s26  ;;  %s575_s25 = scalar_lea.vmem %s3518_s1, %s3131_s26 }
  0x11   : > { %v3137_v10 = vld [vmem:[%s568_s30] sm:$0xff]  ;;  %s2995_s29 = smov 120   ;;  %s2996_s30 = smov 104  }
  0x12   : > { %2742 = vmatmul.mubr.msk.f32.vlgmr.msra.gmra.mrb[0].mxu0 %vm599_vm1, %v3137_v10  ;;  %v837_v15 = vld [vmem:[%s575_s25] sm:$0xff] }
  0x13   : > { %2869 = vmatpush3.bf16.msra.mxu0 %v2868_v11  ;;  %2752 = vmatprep.mubr.msk.f32.mxu0 %vm2993_vm0, %v2994_v6 }
  0x14   : > { %2870 = vmatprep.subr.bf16.mxu0 %v2992_v3 }
  0x17   : > { %2872 = vmatpush3.bf16.msra.mxu0 %v2871_v14 }
  0x18   : > { %2755 = vmatprep.subr.mxu0 %v2994_v6 }
  0x1a   : > { %2753 = vmatmul.mubr.msk.f32.vlgmr.msra.gmra.mrb[2].mxu0 %vm599_vm1, %v837_v15 }
  0x1b   : > { %2757 = vmatprep.mubr.msk.f32.mxu0 %vm2993_vm0, %v2994_v6 }
  0xe5   : > { %v669_v17 = vpop.f32.mrb[0].mxu0 }
  0xe6   : > { %v670_v18 = vadd.f32 %v2641_v16, %v669_v17  ;;  %v2743_v19 = vpop.f32.mrb[1].mxu0 }
  0xe8   : > { %674 = vrot.lane.b32.xlu0 %v670_v18, %s2995_s29  ;;  %680 = vrot.lane.b32.xlu1 %v670_v18, %s2996_s30 }
  0xec   : > { %677 = vrot.lane.b32.xlu0 %v670_v18, %s2997_s18 }
  0xed   : > { %v919_v21 = vpop.f32.mrb[2].mxu0 }
  0xee   : > { %v3173_v22 = vadd.f32 %v2645_v20, %v919_v21  ;;  %v2754_v23 = vpop.f32.mrb[3].mxu0 }
  0xf0   : > { %927 = vrot.lane.b32.xlu0 %v3173_v22, %s2997_s18  ;;  %924 = vrot.lane.b32.xlu1 %v3173_v22, %s2995_s29  ;;  %s582_s18 = scalar_lea.vmem %s3533_s16, %s3131_s26 }
  0xf4   : > { %930 = vrot.lane.b32.xlu1 %v3173_v22, %s2996_s30 }
 0x15a   : > { %v675_v31 = vpop.permute.xlu0 %674  ;;  %v681_v32 = vpop.permute.xlu1 %680 }
 0x15b   : > { %v699_v35 = vcombine.low %v675_v31, %v681_v32  ;;  %v700_v36 = vcombine.high %v675_v31, %v681_v32 }
 0x15d   : > { %v707_v41 = vrot.slane %v699_v35, %v3178_v34  ;;  %v714_v42 = vrot.slane %v700_v36, %v3178_v34 }
 0x15e   : > { %v678_v37 = vpop.permute.xlu0 %677 }
 0x15f   : > { %v683_v38 = vcombine.low %v670_v18, %v678_v37  ;;  %v684_v39 = vcombine.high %v670_v18, %v678_v37 }
 0x161   : > { %v691_v43 = vrot.slane %v683_v38, %v3178_v34  ;;  %v698_v44 = vrot.slane %v684_v39, %v3178_v34 }
 0x162   : > { %v3186_v45 = vpop.permute.xlu1 %924  ;;  %v3188_v50 = vpop.permute.xlu0 %927 }
 0x163   : > { %v715_v46 = vcombine.low %v691_v43, %v707_v41  ;;  %v716_v47 = vcombine.high %v691_v43, %v707_v41  ;;  %v731_v48 = vcombine.low %v698_v44, %v714_v42  ;;  %v732_v49 = vcombine.high %v698_v44, %v714_v42 }
 0x164   : > { %v933_v55 = vcombine.low %v3173_v22, %v3188_v50  ;;  %v934_v56 = vcombine.high %v3173_v22, %v3188_v50 }
 0x165   : > { %v723_v51 = vrot.slane %v715_v46, %v3180_v40  ;;  %v730_v52 = vrot.slane %v716_v47, %v3180_v40  ;;  %v739_v53 = vrot.slane %v731_v48, %v3180_v40  ;;  %v746_v54 = vrot.slane %v732_v49, %v3180_v40 }
 0x166   : > { %v3198_v57 = vpop.permute.xlu1 %930  ;;  %v941_v5 = vrot.slane %v933_v55, %v3178_v34  ;;  %v948_v7 = vrot.slane %v934_v56, %v3178_v34 }
 0x167   : > { %v751_v58 = vcombine.low %v723_v51, %v730_v52  ;;  %v2643_v59 = vcombine.high %v723_v51, %v730_v52  ;;  %v767_v60 = vcombine.low %v739_v53, %v746_v54  ;;  %v2644_v61 = vcombine.high %v739_v53, %v746_v54 }
 0x168   : > { %v949_v62 = vcombine.low %v3186_v45, %v3198_v57  ;;  %v950_v63 = vcombine.high %v3186_v45, %v3198_v57 }
 0x169   : > { %v758_v0 = vrot.slane %v751_v58, %v3178_v34  ;;  %v766_v1 = vrot.slane %v2643_v59, %v3178_v34  ;;  %v774_v2 = vrot.slane %v767_v60, %v3178_v34  ;;  %v782_v4 = vrot.slane %v2644_v61, %v3178_v34 }
 0x16a   : > { %v957_v8 = vrot.slane %v949_v62, %v3178_v34  ;;  %v964_v9 = vrot.slane %v950_v63, %v3178_v34  ;;  %v3000_v61 = vmov -inf  }
 0x16b   : > { %v783_v11 = vcombine.low %v758_v0, %v766_v1  ;;  %v784_v12 = vcombine.high %v758_v0, %v766_v1  ;;  %v799_v13 = vcombine.low %v774_v2, %v782_v4  ;;  %v800_v14 = vcombine.high %v774_v2, %v782_v4  ;;  %825 = vst.msk [vmem:[#allocation3] sm:$0xff] %vm824_vm3, %v3000_v61 }
 0x16c   : > { %v965_v15 = vcombine.low %v941_v5, %v957_v8  ;;  %v966_v16 = vcombine.high %v941_v5, %v957_v8  ;;  %v981_v17 = vcombine.low %v948_v7, %v964_v9  ;;  %v982_v18 = vcombine.high %v948_v7, %v964_v9  ;;  %826 = vst.msk [vmem:[#allocation3 + $0x8] sm:$0xff] %vm824_vm3, %v3000_v61 }
 0x16d   : > { %v791_v19 = vrot.slane %v783_v11, %v3180_v40  ;;  %v798_v20 = vrot.slane %v784_v12, %v3180_v40  ;;  %v807_v21 = vrot.slane %v799_v13, %v3180_v40  ;;  %v814_v23 = vrot.slane %v800_v14, %v3180_v40  ;;  %827 = vst.msk [vmem:[#allocation3 + $0x10] sm:$0xff] %vm824_vm3, %v3000_v61 }
 0x16e   : > { %v973_v24 = vrot.slane %v965_v15, %v3180_v40  ;;  %v980_v25 = vrot.slane %v966_v16, %v3180_v40  ;;  %v989_v26 = vrot.slane %v981_v17, %v3180_v40  ;;  %v996_v27 = vrot.slane %v982_v18, %v3180_v40  ;;  %828 = vst.msk [vmem:[#allocation3 + $0x18] sm:$0xff] %vm824_vm3, %v3000_v61 }
 0x16f   : > { %v815_v28 = vcombine.low %v791_v19, %v807_v21  ;;  %v816_v29 = vcombine.high %v791_v19, %v807_v21  ;;  %v817_v30 = vcombine.low %v798_v20, %v814_v23  ;;  %v818_v31 = vcombine.high %v798_v20, %v814_v23 }
 0x170   : > { %v1001_v32 = vcombine.low %v973_v24, %v980_v25  ;;  %v2647_v33 = vcombine.high %v973_v24, %v980_v25  ;;  %v1017_v35 = vcombine.low %v989_v26, %v996_v27  ;;  %v2648_v36 = vcombine.high %v989_v26, %v996_v27 }
 0x171   : > { %820 = vst.msk [vmem:[#allocation2] sm:$0xff] %vm819_vm2, %v815_v28  ;;  %821 = vst.msk [vmem:[#allocation2 + $0x8] sm:$0xff] %vm819_vm2, %v816_v29  ;;  %v3001_v13 = vmov 0  }
 0x172   : > { %822 = vst.msk [vmem:[#allocation2 + $0x10] sm:$0xff] %vm819_vm2, %v817_v30  ;;  %823 = vst.msk [vmem:[#allocation2 + $0x18] sm:$0xff] %vm819_vm2, %v818_v31  ;;  %v1008_v37 = vrot.slane %v1001_v32, %v3178_v34  ;;  %v1016_v38 = vrot.slane %v2647_v33, %v3178_v34  ;;  %v1024_v39 = vrot.slane %v1017_v35, %v3178_v34  ;;  %2938 = vset.pattern.permute.xlu1 %v3001_v13  ;;  %v3274_v14 = vld [vmem:[#allocation3] sm:$0xff] }
 0x173   : > { %v1032_v41 = vrot.slane %v2648_v36, %v3178_v34  ;;  %2939 = vset.pattern.permute.xlu0 %v3001_v13  ;;  %v3279_v17 = vld [vmem:[#allocation3 + $0x8] sm:$0xff] }
 0x174   : > { %v1033_v42 = vcombine.low %v1008_v37, %v1016_v38  ;;  %v1034_v44 = vcombine.high %v1008_v37, %v1016_v38  ;;  %v3289_v21 = vld [vmem:[#allocation3 + $0x10] sm:$0xff] }
 0x175   : > { %v1049_v43 = vcombine.low %v1024_v39, %v1032_v41  ;;  %v1050_v46 = vcombine.high %v1024_v39, %v1032_v41  ;;  %v3300_v26 = vld [vmem:[#allocation3 + $0x18] sm:$0xff] }
 0x176   : > { %v1041_v47 = vrot.slane %v1033_v42, %v3180_v40  ;;  %v1048_v49 = vrot.slane %v1034_v44, %v3180_v40 }
 0x177   : > { %v1057_v48 = vrot.slane %v1049_v43, %v3180_v40  ;;  %v1064_v51 = vrot.slane %v1050_v46, %v3180_v40 }
 0x178   : > { %v1217_v54 = vld [vmem:[#allocation2] sm:$0xff]  ;;  %v1218_v59 = vld [vmem:[#allocation2 + $0x8] sm:$0xff] }
 0x179   : > { %v1065_v52 = vcombine.low %v1041_v47, %v1057_v48  ;;  %v1068_v53 = vcombine.high %v1048_v49, %v1064_v51  ;;  %v1220_v55 = vld [vmem:[#allocation2 + $0x18] sm:$0xff]  ;;  %v1066_v56 = vcombine.high %v1041_v47, %v1057_v48  ;;  %v1067_v58 = vcombine.low %v1048_v49, %v1064_v51  ;;  %v1219_v60 = vld [vmem:[#allocation2 + $0x10] sm:$0xff] }
 0x17b   : > { %2756 = vmatpush3.xpose.msk.msra.mxu0 %vm819_vm2, %v1065_v52  ;;  %2771 = vmatpush3.xpose.msk.msra.mxu1 %vm819_vm2, %v1068_v53 }
 0x17c   : > { %2760 = vmatprep.subr.mxu0 %v2994_v6  ;;  %2780 = vmatprep.subr.mxu1 %v2994_v6 }
 0x17e   : > { %2758 = vmatmul.mubr.msk.f32.vlgmr.msra.gmra.mrb[4].mxu0 %vm819_vm2, %v1217_v54  ;;  %2773 = vmatmul.mubr.msk.f32.vlgmr.msra.gmra.mrb[0].mxu1 %vm819_vm2, %v1220_v55 }
 0x17f   : > { %2761 = vmatpush3.xpose.msk.msra.mxu0 %vm819_vm2, %v1066_v56  ;;  %2762 = vmatprep.mubr.msk.f32.mxu0 %vm2993_vm0, %v2994_v6 }
 0x180   : > { %2765 = vmatprep.subr.mxu0 %v2994_v6  ;;  %2782 = vmatprep.mubr.msk.f32.mxu1 %vm2993_vm0, %v2994_v6 }
 0x182   : > { %2763 = vmatmul.mubr.msk.f32.vlgmr.msra.gmra.mrb[6].mxu0 %vm819_vm2, %v1218_v59 }
 0x183   : > { %2766 = vmatpush3.xpose.msk.msra.mxu0 %vm819_vm2, %v1067_v58  ;;  %2767 = vmatprep.mubr.msk.f32.mxu0 %vm2993_vm0, %v2994_v6 }
 0x184   : > { %2775 = vmatprep.subr.mxu0 %v2994_v6 }
 0x186   : > { %2768 = vmatmul.mubr.msk.f32.vlgmr.msra.gmra.mrb[8].mxu0 %vm819_vm2, %v1219_v60 }
 0x187   : > { %2777 = vmatprep.mubr.msk.f32.mxu0 %vm2993_vm0, %v2994_v6 }
 0x251   : > { %v1294_v62 = vpop.f32.mrb[4].mxu0  ;;  %v3264_v63 = vpop.f32.mrb[0].mxu1 }
 0x252   : > { %v2759_v0 = vpop.f32.mrb[5].mxu0  ;;  %v2774_v1 = vpop.f32.mrb[1].mxu1  ;;  %v1530_v2 = vsel %vm819_vm2, %v1294_v62, -inf  ;;  %v1539_v12 = vsel %vm819_vm2, %v3264_v63, -inf }
 0x253   : > { %1531 = vmax.xlane.f32.xlu0 %v1530_v2 }
 0x255   : > { %v1370_v4 = vpop.f32.mrb[6].mxu0 }
 0x256   : > { %v2764_v5 = vpop.f32.mrb[7].mxu0  ;;  %v1533_v7 = vsel %vm819_vm2, %v1370_v4, -inf }
 0x257   : > { %1534 = vmax.xlane.f32.xlu1 %v1533_v7 }
 0x259   : > { %v3268_v8 = vpop.f32.mrb[8].mxu0 }
 0x25a   : > { %v2769_v9 = vpop.f32.mrb[9].mxu0  ;;  %v1536_v11 = vsel %vm819_vm2, %v3268_v8, -inf }
 0x25b   : > { %1537 = vmax.xlane.f32.xlu0 %v1536_v11 }
 0x25f   : > { %1540 = vmax.xlane.f32.xlu0 %v1539_v12 }
 0x2e0   : > { %v1532_v15 = vpop.xlane.xlu0 %1531 }
 0x2e1   : > { %v3277_v16 = vmax.f32 %v3274_v14, %v1532_v15 }
 0x2e3   : > { %v1546_v18 = vsub.f32 %v3274_v14, %v3277_v16  ;;  %1947 = vst.msk [vmem:[#allocation3] sm:$0xff] %vm824_vm3, %v3277_v16  ;;  %1560 = vperm.xlu1 %2938, %v3277_v16  }
 0x2e4   : > { %v1535_v19 = vpop.xlane.xlu1 %1534 }
 0x2e5   : > { %v3287_v20 = vmax.f32 %v3279_v17, %v1535_v19 }
 0x2e7   : > { %v1547_v23 = vsub.f32 %v3279_v17, %v3287_v20  ;;  %1948 = vst.msk [vmem:[#allocation3 + $0x8] sm:$0xff] %vm824_vm3, %v3287_v20  ;;  %1069 = vrot.lane.b32.xlu1 %v3173_v22, %s3002_s21  ;;  %1565 = vperm.xlu0 %2939, %v3287_v20  }
 0x2e8   : > { %v1538_v24 = vpop.xlane.xlu0 %1537 }
 0x2e9   : > { %v3298_v25 = vmax.f32 %v3289_v21, %v1538_v24 }
 0x2eb   : > { %v1548_v27 = vsub.f32 %v3289_v21, %v3298_v25  ;;  %1949 = vst.msk [vmem:[#allocation3 + $0x10] sm:$0xff] %vm824_vm3, %v3298_v25  ;;  %1071 = vrot.lane.b32.xlu1 %v3186_v45, %s3002_s21  ;;  %v1590_v21 = vld [vmem:[#allocation4] sm:$0xff] }
 0x2ec   : > { %v1541_v28 = vpop.xlane.xlu0 %1540 }
 0x2ed   : > { %v3308_v29 = vmax.f32 %v3300_v26, %v1541_v28  ;;  %v1554_v14 = vmul.f32 1.442695, %v1548_v27 }
 0x2ef   : > { %v1549_v22 = vsub.f32 %v3300_v26, %v3308_v29  ;;  %1950 = vst.msk [vmem:[#allocation3 + $0x18] sm:$0xff] %vm824_vm3, %v3308_v29  ;;  %1073 = vrot.lane.b32.xlu1 %v3188_v50, %s3002_s21 }
 0x2f1   : > { %v1556_v16 = vmul.f32 1.442695, %v1549_v22 }
 0x2f3   : > { %1075 = vrot.lane.b32.xlu1 %v3198_v57, %s3002_s21 }
 0x2f7   : > { %1570 = vperm.xlu1 %2938, %v3298_v25  }
 0x2fb   : > { %1575 = vperm.xlu1 %2938, %v3308_v29  }
 0x362   : > { %v1561_v30 = vpop.permute.xlu1 %1560 }
 0x363   : > { %v1578_v45 = vsub.f32 %v1294_v62, %v1561_v30 }
 0x365   : > { %v1582_v31 = vmul.f32 1.442695, %v1578_v45 }
 0x366   : > { %v1070_v32 = vpop.permute.xlu1 %1069  ;;  %v1566_v33 = vpop.permute.xlu0 %1565 }
 0x367   : > { %2940 = vpow2.f32 %v1582_v31  ;;  %v1579_v35 = vsub.f32 %v1370_v4, %v1566_v33 }
 0x369   : > { %v1584_v36 = vmul.f32 1.442695, %v1579_v35 }
 0x36a   : > { %v1072_v37 = vpop.permute.xlu1 %1071 }
 0x36b   : > { %2942 = vpow2.f32 %v1584_v36 }
 0x36e   : > { %v1074_v38 = vpop.permute.xlu1 %1073 }
 0x36f   : > { %v1081_v41 = vcombine.low %v1070_v32, %v1074_v38  ;;  %v1082_v50 = vcombine.high %v1070_v32, %v1074_v38 }
 0x371   : > { %v2941_v39 = vpop.eup %2940  ;;  %v1089_v47 = vrot.slane %v1081_v41, %v3178_v34  ;;  %v1096_v48 = vrot.slane %v1082_v50, %v3178_v34 }
 0x372   : > { %v1076_v42 = vpop.permute.xlu1 %1075  ;;  %v1598_v57 = vsel %vm819_vm2, %v2941_v39, 0.0 }
 0x373   : > { %v1097_v43 = vcombine.low %v1072_v37, %v1076_v42  ;;  %v1098_v44 = vcombine.high %v1072_v37, %v1076_v42  ;;  %1599 = vadd.xlane.f32.xlu1 %v1598_v57 }
 0x375   : > { %v2943_v46 = vpop.eup %2942  ;;  %v1105_v49 = vrot.slane %v1097_v43, %v3178_v34  ;;  %v1112_v51 = vrot.slane %v1098_v44, %v3178_v34 }
 0x376   : > { %v1571_v52 = vpop.permute.xlu1 %1570  ;;  %v1601_v53 = vsel %vm819_vm2, %v2943_v46, 0.0 }
 0x377   : > { %v1113_v54 = vcombine.low %v1089_v47, %v1105_v49  ;;  %v1114_v55 = vcombine.high %v1089_v47, %v1105_v49  ;;  %v1129_v56 = vcombine.low %v1096_v48, %v1112_v51  ;;  %v1130_v58 = vcombine.high %v1096_v48, %v1112_v51  ;;  %1602 = vadd.xlane.f32.xlu0 %v1601_v53  ;;  %v1592_v47 = vld [vmem:[#allocation4 + $0x10] sm:$0xff] }
 0x378   : > { %v1580_v59 = vsub.f32 %v3268_v8, %v1571_v52  ;;  %v1593_v52 = vld [vmem:[#allocation4 + $0x18] sm:$0xff] }
 0x379   : > { %v1121_v60 = vrot.slane %v1113_v54, %v3180_v40  ;;  %v1128_v61 = vrot.slane %v1114_v55, %v3180_v40  ;;  %v1137_v62 = vrot.slane %v1129_v56, %v3180_v40  ;;  %v1144_v0 = vrot.slane %v1130_v58, %v3180_v40  ;;  %v1990_v54 = vld [vmem:[%s3523_s6] sm:$0xff] }
 0x37a   : > { %v1586_v1 = vmul.f32 1.442695, %v1580_v59  ;;  %v1576_v2 = vpop.permute.xlu1 %1575 }
 0x37b   : > { %v1149_v4 = vcombine.low %v1121_v60, %v1128_v61  ;;  %v2649_v5 = vcombine.high %v1121_v60, %v1128_v61  ;;  %v1165_v7 = vcombine.low %v1137_v62, %v1144_v0  ;;  %v2650_v9 = vcombine.high %v1137_v62, %v1144_v0  ;;  %v1991_v60 = vld [vmem:[%s3523_s6 + $0x8] sm:$0xff] }
 0x37c   : > { %2944 = vpow2.f32 %v1586_v1  ;;  %v1581_v11 = vsub.f32 %v3264_v63, %v1576_v2 }
 0x37d   : > { %v1156_v12 = vrot.slane %v1149_v4, %v3178_v34  ;;  %v1164_v8 = vrot.slane %v2649_v5, %v3178_v34  ;;  %v1172_v13 = vrot.slane %v1165_v7, %v3178_v34  ;;  %v1180_v15 = vrot.slane %v2650_v9, %v3178_v34  ;;  %v1619_v5 = vld [vmem:[#allocation5] sm:$0xff]  ;;  %v1620_v7 = vld [vmem:[#allocation5 + $0x8] sm:$0xff] }
 0x37e   : > { %v1588_v19 = vmul.f32 1.442695, %v1581_v11 }
 0x37f   : > { %v1181_v24 = vcombine.low %v1156_v12, %v1164_v8  ;;  %v1197_v28 = vcombine.low %v1172_v13, %v1180_v15  ;;  %v1182_v30 = vcombine.high %v1156_v12, %v1164_v8  ;;  %v1198_v45 = vcombine.high %v1172_v13, %v1180_v15  ;;  %v1621_v13 = vld [vmem:[#allocation5 + $0x10] sm:$0xff] }
 0x380   : > { %2946 = vpow2.f32 %v1588_v19 }
 0x381   : > { %v1189_v31 = vrot.slane %v1181_v24, %v3180_v40  ;;  %v1205_v32 = vrot.slane %v1197_v28, %v3180_v40  ;;  %v1196_v63 = vrot.slane %v1182_v30, %v3180_v40  ;;  %v1212_v33 = vrot.slane %v1198_v45, %v3180_v40  ;;  %v1622_v24 = vld [vmem:[#allocation5 + $0x18] sm:$0xff] }
 0x383   : > { %v1213_v35 = vcombine.low %v1189_v31, %v1205_v32  ;;  %v1214_v36 = vcombine.high %v1189_v31, %v1205_v32  ;;  %v1215_v34 = vcombine.low %v1196_v63, %v1212_v33  ;;  %v1216_v41 = vcombine.high %v1196_v63, %v1212_v33 }
 0x385   : > { %2776 = vmatpush3.msra.mxu0 %v1213_v35  ;;  %2781 = vmatpush3.msra.mxu1 %v1214_v36 }
 0x386   : > { %v2945_v37 = vpop.eup %2944  ;;  %2778 = vmatmul.mubr.msk.f32.vlgmr.msra.gmra.mrb[10].mxu0 %vm819_vm2, %v2941_v39  ;;  %2783 = vmatmul.mubr.msk.f32.vlgmr.msra.gmra.mrb[2].mxu1 %vm819_vm2, %v2943_v46  ;;  %v1550_v39 = vmul.f32 1.442695, %v1546_v18  ;;  %v1552_v18 = vmul.f32 1.442695, %v1547_v23  ;;  %v1591_v46 = vld [vmem:[#allocation4 + $0x8] sm:$0xff] }
 0x387   : > { %2785 = vmatprep.subr.mxu0 %v2994_v6  ;;  %2790 = vmatprep.subr.mxu1 %v2994_v6  ;;  %v1604_v38 = vsel %vm819_vm2, %v2945_v37, 0.0 }
 0x388   : > { %2786 = vmatpush3.msra.mxu0 %v1215_v34  ;;  %1605 = vadd.xlane.f32.xlu1 %v1604_v38  ;;  %2948 = vpow2.f32 %v1550_v39 }
 0x389   : > { %2791 = vmatpush3.msra.mxu1 %v1216_v41  ;;  %2787 = vmatprep.mubr.msk.f32.mxu0 %vm2993_vm0, %v2994_v6  ;;  %2950 = vpow2.f32 %v1554_v14 }
 0x38a   : > { %v2947_v40 = vpop.eup %2946  ;;  %2792 = vmatprep.mubr.msk.f32.mxu1 %vm2993_vm0, %v2994_v6  ;;  %2788 = vmatmul.mubr.msk.f32.vlgmr.msra.gmra.mrb[12].mxu0 %vm819_vm2, %v2945_v37  ;;  %2952 = vpow2.f32 %v1556_v16 }
 0x38b   : > { %2793 = vmatmul.mubr.msk.f32.vlgmr.msra.gmra.mrb[4].mxu1 %vm819_vm2, %v2947_v40  ;;  %v1607_v50 = vsel %vm819_vm2, %v2947_v40, 0.0  ;;  %2795 = vmatprep.subr.mxu0 %v2994_v6  ;;  %2954 = vpow2.f32 %v1552_v18 }
 0x38c   : > { %1608 = vadd.xlane.f32.xlu0 %v1607_v50  ;;  %2797 = vmatprep.mubr.msk.f32.mxu0 %vm2993_vm0, %v2994_v6  ;;  %v1992_v50 = vld [vmem:[%s3523_s6 + $0x10] sm:$0xff] }
 0x38d   : > { %2800 = vmatprep.subr.mxu1 %v2994_v6  ;;  %2802 = vmatprep.mubr.msk.f32.mxu1 %vm2993_vm0, %v2994_v6 }
 0x38e   : > { %2796 = vmatpush3.msra.mxu0 %v1990_v54  ;;  %2801 = vmatpush3.msra.mxu1 %v1991_v60 }
 0x38f   : > { %2805 = vmatprep.subr.mxu0 %v2994_v6  ;;  %2810 = vmatprep.subr.mxu1 %v2994_v6 }
 0x392   : > { %v2949_v42 = vpop.eup %2948 }
 0x393   : > { %v2951_v57 = vpop.eup %2950  ;;  %v1594_v25 = vmul.f32 %v2949_v42, %v1590_v21 }
 0x394   : > { %v2953_v43 = vpop.eup %2952  ;;  %v1596_v48 = vmul.f32 %v2951_v57, %v1592_v47 }
 0x395   : > { %v2955_v44 = vpop.eup %2954  ;;  %v1597_v55 = vmul.f32 %v2953_v43, %v1593_v52 }
 0x396   : > { %v1595_v29 = vmul.f32 %v2955_v44, %v1591_v46 }
 0x399   : > { %1625 = vperm.xlu1 %2938, %v2949_v42   ;;  %v1993_v42 = vld [vmem:[%s3523_s6 + $0x18] sm:$0xff] }
 0x39d   : > { %1635 = vperm.xlu1 %2938, %v2951_v57  }
 0x3a1   : > { %1640 = vperm.xlu1 %2938, %v2953_v43  }
 0x3a2   : > { %1630 = vperm.xlu0 %2939, %v2955_v44  }
 0x400   : > { %v1600_v27 = vpop.xlane.xlu1 %1599 }
 0x401   : > { %v1610_v26 = vadd.f32 %v1600_v27, %v1594_v25 }
 0x403   : > { %1615 = vst.msk [vmem:[#allocation4] sm:$0xff] %vm824_vm3, %v1610_v26 }
 0x404   : > { %v1603_v17 = vpop.xlane.xlu0 %1602 }
 0x405   : > { %v1611_v20 = vadd.f32 %v1603_v17, %v1595_v29 }
 0x407   : > { %1616 = vst.msk [vmem:[#allocation4 + $0x8] sm:$0xff] %vm824_vm3, %v1611_v20 }
 0x40a   : > { %v1958_v23 = vld [vmem:[#allocation4] sm:$0xff] }
 0x40b   : > { %2956 = vrcp.f32 %v1958_v23 }
 0x40e   : > { %v1959_v22 = vld [vmem:[#allocation4 + $0x8] sm:$0xff] }
 0x40f   : > { %2958 = vrcp.f32 %v1959_v22 }
 0x415   : > { %v2957_v49 = vpop.eup %2956  ;;  %v1606_v51 = vpop.xlane.xlu1 %1605 }
 0x416   : > { %v1612_v53 = vadd.f32 %v1606_v51, %v1596_v48  ;;  %1968 = vperm.xlu0 %2939, %v2957_v49  }
 0x418   : > { %1617 = vst.msk [vmem:[#allocation4 + $0x10] sm:$0xff] %vm824_vm3, %v1612_v53 }
 0x419   : > { %v2959_v56 = vpop.eup %2958  ;;  %v1609_v58 = vpop.xlane.xlu0 %1608 }
 0x41a   : > { %v1613_v59 = vadd.f32 %v1609_v58, %v1597_v55  ;;  %1973 = vperm.xlu1 %2938, %v2959_v56   ;;  %v1626_v2 = vpop.permute.xlu1 %1625 }
 0x41b   : > { %v1643_v11 = vmul.f32 %v1626_v2, %v1619_v5  ;;  %v2332_v2 = vld [vmem:[%s3525_s8] sm:$0xff] }
 0x41c   : > { %1618 = vst.msk [vmem:[#allocation4 + $0x18] sm:$0xff] %vm824_vm3, %v1613_v59 }
 0x41e   : > { %v1636_v4 = vpop.permute.xlu1 %1635 }
 0x41f   : > { %v1960_v61 = vld [vmem:[#allocation4 + $0x10] sm:$0xff]  ;;  %v1645_v32 = vmul.f32 %v1636_v4, %v1621_v13  ;;  %v2333_v4 = vld [vmem:[%s3525_s8 + $0x8] sm:$0xff] }
 0x420   : > { %2960 = vrcp.f32 %v1960_v61  ;;  %v2874_v5 = vpack.c.bf16 %v2333_v4, %v2332_v2 }
 0x421   : > { %v1631_v9 = vpop.permute.xlu0 %1630 }
 0x422   : > { %v1641_v12 = vpop.permute.xlu1 %1640  ;;  %v1644_v8 = vmul.f32 %v1631_v9, %v1620_v7  ;;  %v2335_v7 = vld [vmem:[%s3525_s8 + $0x18] sm:$0xff] }
 0x423   : > { %v1961_v62 = vld [vmem:[#allocation4 + $0x18] sm:$0xff]  ;;  %v1646_v63 = vmul.f32 %v1641_v12, %v1622_v24  ;;  %v2418_v12 = vld [vmem:[%s3527_s10 + $0x8] sm:$0xff]  ;;  %v2421_v24 = vld [vmem:[%s3527_s10 + $0x20] sm:$0xff] }
 0x424   : > { %2962 = vrcp.f32 %v1961_v62 }
 0x42a   : > { %v2961_v0 = vpop.eup %2960 }
 0x42b   : > { %1978 = vperm.xlu0 %2939, %v2961_v0  }
 0x42e   : > { %v2963_v1 = vpop.eup %2962 }
 0x42f   : > { %1983 = vperm.xlu1 %2938, %v2963_v1  }
 0x459   : > { %v1716_v15 = vpop.f32.mrb[10].mxu0  ;;  %v1789_v19 = vpop.f32.mrb[2].mxu1 }
 0x45a   : > { %v1939_v28 = vadd.f32 %v1716_v15, %v1643_v11  ;;  %v1940_v30 = vadd.f32 %v1789_v19, %v1644_v8  ;;  %v2779_v45 = vpop.f32.mrb[11].mxu0  ;;  %v2784_v31 = vpop.f32.mrb[3].mxu1  ;;  %v2417_v11 = vld [vmem:[%s3527_s10] sm:$0xff]  ;;  %v2419_v8 = vld [vmem:[%s3527_s10 + $0x10] sm:$0xff]  ;;  %v2420_v15 = vld [vmem:[%s3527_s10 + $0x18] sm:$0xff] }
 0x45b   : > { %v2880_v13 = vpack.c.bf16 %v2418_v12, %v2417_v11  ;;  %v2883_v19 = vpack.c.bf16 %v2420_v15, %v2419_v8  ;;  %v2423_v45 = vld [vmem:[%s3527_s10 + $0x30] sm:$0xff]  ;;  %v2424_v31 = vld [vmem:[%s3527_s10 + $0x38] sm:$0xff] }
 0x45c   : > { %1943 = vst.msk [vmem:[#allocation5] sm:$0xff] %vm819_vm2, %v1939_v28  ;;  %1944 = vst.msk [vmem:[#allocation5 + $0x8] sm:$0xff] %vm819_vm2, %v1940_v30  ;;  %v2422_v28 = vld [vmem:[%s3527_s10 + $0x28] sm:$0xff] }
 0x45d   : > { %v1862_v33 = vpop.f32.mrb[12].mxu0  ;;  %v2886_v30 = vpack.c.bf16 %v2422_v28, %v2421_v24 }
 0x45e   : > { %v1941_v35 = vadd.f32 %v1862_v33, %v1645_v32  ;;  %v1935_v36 = vpop.f32.mrb[4].mxu1  ;;  %v2789_v37 = vpop.f32.mrb[13].mxu0  ;;  %v2889_v32 = vpack.c.bf16 %v2424_v31, %v2423_v45  ;;  %v2426_v33 = vld [vmem:[%s3527_s10 + $0x48] sm:$0xff] }
 0x45f   : > { %v1942_v34 = vadd.f32 %v1935_v36, %v1646_v63  ;;  %v2794_v38 = vpop.f32.mrb[5].mxu1  ;;  %v2425_v63 = vld [vmem:[%s3527_s10 + $0x40] sm:$0xff]  ;;  %v2427_v36 = vld [vmem:[%s3527_s10 + $0x50] sm:$0xff]  ;;  %v2428_v37 = vld [vmem:[%s3527_s10 + $0x58] sm:$0xff] }
 0x460   : > { %1945 = vst.msk [vmem:[#allocation5 + $0x10] sm:$0xff] %vm819_vm2, %v1941_v35  ;;  %v2892_v35 = vpack.c.bf16 %v2426_v33, %v2425_v63  ;;  %v2429_v38 = vld [vmem:[%s3527_s10 + $0x60] sm:$0xff] }
 0x461   : > { %1946 = vst.msk [vmem:[#allocation5 + $0x18] sm:$0xff] %vm819_vm2, %v1942_v34  ;;  %v2895_v34 = vpack.c.bf16 %v2428_v37, %v2427_v36 }
 0x463   : > { %v1954_v40 = vld [vmem:[#allocation5] sm:$0xff]  ;;  %v1955_v16 = vld [vmem:[#allocation5 + $0x8] sm:$0xff] }
 0x467   : > { %v1956_v43 = vld [vmem:[#allocation5 + $0x10] sm:$0xff] }
 0x468   : > { %v1957_v21 = vld [vmem:[#allocation5 + $0x18] sm:$0xff] }
 0x495   : > { %v1969_v41 = vpop.permute.xlu0 %1968 }
 0x496   : > { %v1986_v39 = vmul.f32 %v1969_v41, %v1954_v40  ;;  %v2430_v41 = vld [vmem:[%s3527_s10 + $0x68] sm:$0xff] }
 0x497   : > { %v2898_v40 = vpack.c.bf16 %v2430_v41, %v2429_v38 }
 0x498   : > { %2798 = vmatmul.mubr.msk.f32.vlgmr.msra.gmra.mrb[14].mxu0 %vm819_vm2, %v1986_v39 }
 0x499   : > { %v1974_v14 = vpop.permute.xlu1 %1973  ;;  %2806 = vmatpush3.msra.mxu0 %v1992_v50  ;;  %2807 = vmatprep.mubr.msk.f32.mxu0 %vm2993_vm0, %v2994_v6 }
 0x49a   : > { %v1987_v18 = vmul.f32 %v1974_v14, %v1955_v16  ;;  %2873 = vmatprep.subr.bf16.mxu0 %v2992_v3 }
 0x49c   : > { %2803 = vmatmul.mubr.msk.f32.vlgmr.msra.gmra.mrb[6].mxu1 %vm819_vm2, %v1987_v18  ;;  %v2668_v18 = vld [vmem:[%s3529_s12] ss:$0 sm:$0xff] }
 0x49d   : > { %2811 = vmatpush3.msra.mxu1 %v1993_v42  ;;  %2812 = vmatprep.mubr.msk.f32.mxu1 %vm2993_vm0, %v2994_v6 }
 0x49e   : > { %2879 = vmatprep.subr.bf16.mxu1 %v2992_v3 }
 0x4aa   : > { %v1979_v57 = vpop.permute.xlu0 %1978 }
 0x4ab   : > { %v1988_v44 = vmul.f32 %v1979_v57, %v1956_v43  ;;  %v2669_v57 = vld [vmem:[%s3530_s13] ss:$0 sm:$0xff] }
 0x4ad   : > { %2808 = vmatmul.mubr.msk.f32.vlgmr.msra.gmra.mrb[16].mxu0 %vm819_vm2, %v1988_v44 }
 0x4ae   : > { %v1984_v25 = vpop.permute.xlu1 %1983  ;;  %2823 = vmatprep.mubr.msk.f32.mxu0 %vm2993_vm0, %v2994_v6  ;;  %2875 = vmatpush3.bf16.msra.mxu0 %v2874_v5 }
 0x4af   : > { %v1989_v27 = vmul.f32 %v1984_v25, %v1957_v21  ;;  %2876 = vmatprep.subr.bf16.mxu0 %v2992_v3  ;;  %v2432_v21 = vld [vmem:[%s3527_s10 + $0x78] sm:$0xff] }
 0x4b1   : > { %2813 = vmatmul.mubr.msk.f32.vlgmr.msra.gmra.mrb[8].mxu1 %vm819_vm2, %v1989_v27  ;;  %v2670_v27 = vld [vmem:[%s3526_s9] ss:$0 sm:$0xff] }
 0x4b2   : > { %2858 = vmatprep.mubr.msk.f32.mxu1 %vm2993_vm0, %v2994_v6  ;;  %v2667_v6 = vld [vmem:[%s3524_s7] ss:$0 sm:$0xff]  ;;  %2881 = vmatpush3.bf16.msra.mxu1 %v2880_v13 }
 0x4b3   : > { %2882 = vmatprep.subr.bf16.mxu1 %v2992_v3 }
 0x4b6   : > { %2884 = vmatpush3.bf16.msra.mxu1 %v2883_v19 }
 0x4b7   : > { %2885 = vmatprep.subr.bf16.mxu1 %v2992_v3 }
 0x4ba   : > { %2887 = vmatpush3.bf16.msra.mxu1 %v2886_v30 }
 0x4bb   : > { %2888 = vmatprep.subr.bf16.mxu1 %v2992_v3 }
 0x4be   : > { %2890 = vmatpush3.bf16.msra.mxu1 %v2889_v32 }
 0x4bf   : > { %2891 = vmatprep.subr.bf16.mxu1 %v2992_v3 }
 0x4c2   : > { %2893 = vmatpush3.bf16.msra.mxu1 %v2892_v35 }
 0x4c3   : > { %2894 = vmatprep.subr.bf16.mxu1 %v2992_v3 }
 0x4c6   : > { %2896 = vmatpush3.bf16.msra.mxu1 %v2895_v34 }
 0x4c7   : > { %2897 = vmatprep.subr.bf16.mxu1 %v2992_v3 }
 0x4ca   : > { %2899 = vmatpush3.bf16.msra.mxu1 %v2898_v40 }
 0x4cb   : > { %2900 = vmatprep.subr.bf16.mxu1 %v2992_v3  ;;  %v2431_v3 = vld [vmem:[%s3527_s10 + $0x70] sm:$0xff] }
 0x4cc   : > { %v2901_v25 = vpack.c.bf16 %v2432_v21, %v2431_v3 }
 0x4ce   : > { %2902 = vmatpush3.bf16.msra.mxu1 %v2901_v25 }
 0x56b   : > { %v2063_v46 = vpop.f32.mrb[14].mxu0 }
 0x56c   : > { %v2799_v26 = vpop.f32.mrb[15].mxu0  ;;  %v2286_v17 = vsel %vm599_vm1, %v2063_v46, 0.0 }
 0x56f   : > { %v2136_v29 = vpop.f32.mrb[6].mxu1 }
 0x570   : > { %v2287_v20 = vsel %vm599_vm1, %v2136_v29, 0.0  ;;  %v2804_v23 = vpop.f32.mrb[7].mxu1 }
 0x571   : > { %v2288_v22 = vadd.f32 %v2287_v20, %v2286_v17  ;;  %v2672_v20 = vld [vmem:[%s3528_s11] ss:$0 sm:$0xff] }
 0x580   : > { %v2209_v47 = vpop.f32.mrb[16].mxu0 }
 0x581   : > { %v2289_v48 = vsel %vm599_vm1, %v2209_v47, 0.0  ;;  %v2809_v49 = vpop.f32.mrb[17].mxu0 }
 0x582   : > { %v2290_v51 = vadd.f32 %v2289_v48, %v2288_v22 }
 0x584   : > { %v2282_v52 = vpop.f32.mrb[8].mxu1 }
 0x585   : > { %v2291_v53 = vsel %vm599_vm1, %v2282_v52, 0.0  ;;  %v2814_v54 = vpop.f32.mrb[9].mxu1 }
 0x586   : > { %v2292_v55 = vadd.f32 %v2291_v53, %v2290_v51 }
 0x588   : > { %v2300_v56 = vadd.f32 %v2667_v6, %v2292_v55 }
 0x58a   : > { %v2301_v58 = vadd.f32 %v2300_v56, %v3137_v10  ;;  %v2334_v10 = vld [vmem:[%s3525_s8 + $0x10] sm:$0xff] }
 0x58b   : > { %v2877_v9 = vpack.c.bf16 %v2335_v7, %v2334_v10 }
 0x58c   : > { %v2304_v59 = vsel %vm599_vm1, %v2301_v58, 0.0 }
 0x58d   : > { %2305 = vadd.xlane.f32.xlu0 %v2304_v59  ;;  %2878 = vmatpush3.bf16.msra.mxu0 %v2877_v9 }
 0x61a   : > { %v2306_v60 = vpop.xlane.xlu0 %2305 }
 0x61b   : > { %v2308_v61 = vmul.f32 0.03125, %v2306_v60  ;;  %v2673_v60 = vld [vmem:[%s3531_s14] ss:$0 sm:$0xff] }
 0x61d   : > { %v2309_v62 = vsub.f32 %v2301_v58, %v2308_v61 }
 0x61f   : > { %v2310_v0 = vmul.f32 %v2309_v62, %v2309_v62 }
 0x621   : > { %v2311_v1 = vsel %vm599_vm1, %v2310_v0, 0.0 }
 0x622   : > { %2312 = vadd.xlane.f32.xlu1 %v2311_v1 }
 0x6af   : > { %v2313_v39 = vpop.xlane.xlu1 %2312 }
 0x6b0   : > { %v2314_v50 = vmul.f32 0.03125, %v2313_v39 }
 0x6b2   : > { %v2315_v14 = vadd.f32 1e-05, %v2314_v50 }
 0x6b4   : > { %2964 = vrsqrt.f32 %v2315_v14 }
 0x6be   : > { %v2965_v16 = vpop.eup %2964 }
 0x6bf   : > { %v2317_v42 = vmul.f32 %v2965_v16, %v2309_v62  ;;  %v2674_v62 = vld [vmem:[%s3532_s15] ss:$0 sm:$0xff] }
 0x6c1   : > { %v2324_v43 = vmul.f32 %v2668_v18, %v2317_v42 }
 0x6c3   : > { %v2331_v44 = vadd.f32 %v2669_v57, %v2324_v43 }
 0x6c5   : > { %2824 = vmatmul.mubr.msk.f32.vlgmr.msra.gmra.mrb[18].mxu0 %vm599_vm1, %v2331_v44 }
 0x798   : > { %v2412_v46 = vpop.f32.mrb[18].mxu0 }
 0x799   : > { %v2413_v26 = vadd.f32 %v2670_v27, %v2412_v46  ;;  %v2825_v29 = vpop.f32.mrb[19].mxu0 }
 0x79b   : > { %v2416_v17 = vmax.f32 %v2413_v26, 0.0 }
 0x79d   : > { %2859 = vmatmul.mubr.f32.vlgmr.msra.gmra.mrb[10].mxu1 %v2416_v17 }
 0x870   : > { %v2506_v23 = vpop.f32.mrb[10].mxu1 }
 0x871   : > { %v2507_v22 = vadd.f32 %v2672_v20, %v2506_v23  ;;  %v2860_v47 = vpop.f32.mrb[11].mxu1 }
 0x873   : > { %v2510_v48 = vadd.f32 %v2507_v22, %v2331_v44 }
 0x875   : > { %v2513_v49 = vsel %vm599_vm1, %v2510_v48, 0.0 }
 0x876   : > { %2514 = vadd.xlane.f32.xlu0 %v2513_v49 }
 0x903   : > { %v2515_v51 = vpop.xlane.xlu0 %2514 }
 0x904   : > { %v2516_v52 = vmul.f32 0.03125, %v2515_v51 }
 0x906   : > { %v2517_v53 = vsub.f32 %v2510_v48, %v2516_v52 }
 0x908   : > { %v2518_v6 = vmul.f32 %v2517_v53, %v2517_v53 }
 0x90a   : > { %v2519_v54 = vsel %vm599_vm1, %v2518_v6, 0.0 }
 0x90b   : > { %2520 = vadd.xlane.f32.xlu0 %v2519_v54 }
 0x998   : > { %v2521_v55 = vpop.xlane.xlu0 %2520 }
 0x999   : > { %v2522_v56 = vmul.f32 0.03125, %v2521_v55 }
 0x99b   : > { %v2523_v58 = vadd.f32 1e-05, %v2522_v56 }
 0x99d   : > { %2966 = vrsqrt.f32 %v2523_v58 }
 0x9a7   : > { %v2967_v59 = vpop.eup %2966 }
 0x9a8   : > { %v2525_v61 = vmul.f32 %v2967_v59, %v2517_v53 }
 0x9aa   : > { %v2532_v0 = vmul.f32 %v2673_v60, %v2525_v61 }
 0x9ac   : > { %v2539_v1 = vadd.f32 %v2674_v62, %v2532_v0 }
 0x9ae   : > { %2540 = vst.msk [vmem:[%s582_s18] sm:$0xff] %vm599_vm1, %v2539_v1 }
 0x9af PF: > { %s26_s23 = sadd.s32 1, %s2990_s23   ;;  %s3536_s21 = smov %s2986_s22 }
 0x9b0   : > { %p23_p5 = scmp.ge.s32.totalorder %s26_s23, 4   ;;  %s3537_s22 = smov %s3539_s24 }
 0x9b2   :  { %25 = sbr.rel (!%p23_p5) target bundleno = 2 (0x2), region = 125 }

// kernel: _forward.3
= control target key start
LH: loop header
LB: loop body
LE: loop exit
PB: predicated region body
PF: predicated region fallthrough
CT: control target
= control target key end

     0   :  { %s3687_s0 = inlined_call_operand.vmem [shape: f32[2,8,32], index: 0, kind: input, shape index: {}, may-alias: {0,1}]   ;;  %s3688_s1 = inlined_call_operand.vmem [shape: f32[2,8,32], index: 1, kind: input, shape index: {}, may-alias: {0,1}]   ;;  %s3689_s2 = inlined_call_operand.vmem [shape: f32[32,32], index: 2, kind: input, shape index: {}]   ;;  %s3690_s3 = inlined_call_operand.vmem [shape: f32[32,64], index: 3, kind: input, shape index: {}]   ;;  %s3691_s4 = inlined_call_operand.vmem [shape: f32[1,32], index: 4, kind: input, shape index: {}]   ;;  %s3692_s5 = inlined_call_operand.vmem [shape: f32[1,64], index: 5, kind: input, shape index: {}]   ;;  %s3693_s6 = inlined_call_operand.vmem [shape: f32[4,8,32], index: 6, kind: input, shape index: {}]   ;;  %s3694_s7 = inlined_call_operand.vmem [shape: f32[1,32], index: 7, kind: input, shape index: {}]   ;;  %s3695_s8 = inlined_call_operand.vmem [shape: f32[32,128], index: 8, kind: input, shape index: {}]   ;;  %s3696_s9 = inlined_call_operand.vmem [shape: f32[1,128], index: 9, kind: input, shape index: {}]   ;;  %s3697_s10 = inlined_call_operand.vmem [shape: f32[128,32], index: 10, kind: input, shape index: {}]   ;;  %s3698_s11 = inlined_call_operand.vmem [shape: f32[1,32], index: 11, kind: input, shape index: {}]   ;;  %s3699_s12 = inlined_call_operand.vmem [shape: f32[1,32], index: 12, kind: input, shape index: {}]   ;;  %s3700_s13 = inlined_call_operand.vmem [shape: f32[1,32], index: 13, kind: input, shape index: {}]   ;;  %s3701_s14 = inlined_call_operand.vmem [shape: f32[1,32], index: 14, kind: input, shape index: {}]   ;;  %s3702_s15 = inlined_call_operand.vmem [shape: f32[1,32], index: 15, kind: input, shape index: {}]   ;;  %s3703_s16 = inlined_call_operand.hbm [shape: f32[2,8,32], index: 16, kind: output, shape index: {}]  }
   0x1   :  { %3709 = sst [smem:[#allocation15_spill]] %s3687_s0 }
   0x2   :  { %3710 = sst [smem:[#allocation16_spill]] %s3689_s2 }
   0x3   :  { %21 = vsyncpa [#allocation7], 0 }
   0x4   :  { %23 = vsyncpa [#allocation7 + $0x1], 0  ;;  %s3184_s21 = smov 0   ;;  %s3186_s22 = smov 0  }
   0x5   :  { %s3188_s23 = smov 0   ;;  %s3190_s24 = smov 0  }
   0x6   :  { %s3192_s25 = smov 0   ;;  %s3194_s26 = smov 0  }
   0x7 LB: > { %3711 = sst [smem:[#allocation9_spill]] %s3065_s21  ;;  %s2639_s27 = sadd.s32 4294967295, %s3085_s26   ;;  %s3085_s26 = sphi %s3194_s26, %s29_s26   ;;  %s3081_s25 = sphi %s3192_s25, %s3726_s25   ;;  %s3077_s24 = sphi %s3190_s24, %s3725_s24   ;;  %s3073_s23 = sphi %s3188_s23, %s3724_s23   ;;  %s3069_s22 = sphi %s3186_s22, %s3728_s22   ;;  %s3065_s21 = sphi %s3184_s21, %s3727_s21  }
   0x8   : > { %3712 = sst [smem:[#allocation10_spill]] %s3073_s23  ;;  %s2640_s28 = sadd.s32 4294967294, %s3085_s26  }
   0x9   : > { %3713 = sst [smem:[#allocation11_spill]] %s3081_s25  ;;  %s48_s29 = sadd.s32 1, %s3081_s25 }
   0xa   : > { %s407_s30 = sadd.s32 1, %s3073_s23  ;;  %p50_p0 = scmp.ge.s32.totalorder %s48_s29, 2 }
   0xb   : > { %p417_p1 = scmp.ne.s32.totalorder %s3073_s23, %s3069_s22  ;;  %p418_p2 = scmp.eq.s32.totalorder %s2639_s27, 1 }
   0xc   : > { %p423_p3 = scmp.ne.s32.totalorder %s3069_s22, %s3065_s21  ;;  %s3730_s29 = smov (%p50_p0, %s48_s29), 0 }
   0xd   : > { %3714 = sst [smem:[#allocation12_spill]] %s3730_s29  ;;  %p3224_p4 = por %p418_p2, %p417_p1 }
   0xe   : > { %p424_p5 = scmp.eq.s32.totalorder %s2640_s28, 1  ;;  %s402_s17 = ssub.s32 %s3081_s25, %s3730_s29 }
   0xf   : > { %p2643_p6 = scmp.ge.s32.totalorder %s3085_s26, 1  ;;  %p405_p7 = scmp.eq.s32.totalorder %s402_s17, 0 }
  0x10   : > { %p3231_p8 = por %p424_p5, %p423_p3  ;;  %p504_p9 = scmp.lt.s32.totalorder %s3085_s26, 3 }
  0x11   : > { %s3237_s19 = scalar_select %p405_p7, %s3073_s23, %s407_s30  }
  0x12   : > { %s3716_s18 = scalar_select %p3231_p8, 1, 0 }
  0x13   : > { %3718 = sst [smem:[#allocation14_spill]] %s3237_s19  ;;  %p505_p10 = pnand %p2643_p6, %p504_p9 }
  0x14   : > { %3717 = sst [smem:[#allocation13_spill]] %s3716_s18  ;;  %s3719_s2 = sld [smem:[#allocation16_spill]] (!%p505_p10)  ;;  %v3087_v3 = vmov (!%p505_p10), 0.0|0.0   ;;  %vm3088_vm0 = vmmov (!%p505_p10), 0   ;;  %v3089_v6 = vmov (!%p505_p10), 0.0   ;;  %v832_v8 = vld [vmem:[%s3690_s3] sm:$0xff] (!%p505_p10)  ;;  %v682_v26 = vlaneseq (!%p505_p10) }
  0x15   : > { %508 = sbr.rel (%p505_p10) target bundleno = 2510 (0x9ce), region = 84  ;;  %2869 = vmatprep.subr.bf16.mxu0 (!%p505_p10), %v3087_v3  ;;  %2749 = vmatprep.mubr.msk.f32.mxu0 (!%p505_p10), %vm3088_vm0, %v3089_v6  ;;  %p563_p11 = scmp.lt.s32.totalorder (!%p505_p10), %s3077_s24, 1  ;;  %v833_v9 = vld [vmem:[%s3690_s3 + $0x8] sm:$0xff] (!%p505_p10)  ;;  %vm593_vm1 = vcmask (!%p505_p10), 261120   ;;  %v834_v12 = vld [vmem:[%s3690_s3 + $0x10] sm:$0xff] (!%p505_p10)  ;;  %v835_v13 = vld [vmem:[%s3690_s3 + $0x18] sm:$0xff] (!%p505_p10) }
  0x16   : > { %2778 = vmatprep.subr.mxu1 (!%p505_p10), %v3089_v6  ;;  %2780 = vmatprep.mubr.msk.f32.mxu1 (!%p505_p10), %vm3088_vm0, %v3089_v6  ;;  %v2876_v11 = vpack.c.bf16 (!%p505_p10), %v833_v9, %v832_v8  ;;  %v2879_v14 = vpack.c.bf16 (!%p505_p10), %v835_v13, %v834_v12  ;;  %vm813_vm2 = vcmask (!%p505_p10), 64512   ;;  %v2647_v16 = vld [vmem:[%s3691_s4] ss:$0 sm:$0xff] (!%p505_p10)  ;;  %s3090_s25 = smov (!%p505_p10), 120   ;;  %s3091_s27 = smov (!%p505_p10), 104   ;;  %v683_v30 = vshrl.u32 (!%p505_p10), %v682_v26, 7 }
  0x17   : > { %827 = vst.msk [vmem:[#allocation5] sm:$0xff] (!%p505_p10), %vm813_vm2, %v3089_v6  ;;  %828 = vst.msk [vmem:[#allocation5 + $0x8] sm:$0xff] (!%p505_p10), %vm813_vm2, %v3089_v6  ;;  %v2651_v20 = vld [vmem:[%s3692_s5] ss:$0 sm:$0xff] (!%p505_p10)  ;;  %s3092_s30 = smov (!%p505_p10), 112   ;;  %vm818_vm3 = vcmask (!%p505_p10), 7168  }
  0x18   : > { %829 = vst.msk [vmem:[#allocation5 + $0x10] sm:$0xff] (!%p505_p10), %vm813_vm2, %v3089_v6  ;;  %830 = vst.msk [vmem:[#allocation5 + $0x18] sm:$0xff] (!%p505_p10), %vm813_vm2, %v3089_v6  ;;  %v3093_v24 = vmov (!%p505_p10), 1983009808   ;;  %v3094_v27 = vmov (!%p505_p10), 1934713408  }
  0x19   : > { %v680_v25 = vunpack.c.l.s4 (!%p505_p10), %v3093_v24  ;;  %v712_v28 = vunpack.c.l.s4 (!%p505_p10), %v3094_v27  ;;  %823 = vst.msk [vmem:[#allocation4] sm:$0xff] (!%p505_p10), %vm818_vm3, %v3089_v6  ;;  %824 = vst.msk [vmem:[#allocation4 + $0x8] sm:$0xff] (!%p505_p10), %vm818_vm3, %v3089_v6  ;;  %s3097_s29 = smov (!%p505_p10), 96   ;;  %s2682_s23 = sshll.u32 (!%p505_p10), %s3077_s24, 7 }
  0x1a   : > { %v582_v0 = vld [vmem:[%s3719_s2] sm:$0xff] (!%p505_p10)  ;;  %v583_v1 = vld [vmem:[%s3719_s2 + $0x8] sm:$0xff] (!%p505_p10)  ;;  %v584_v2 = vld [vmem:[%s3719_s2 + $0x10] sm:$0xff] (!%p505_p10)  ;;  %825 = vst.msk [vmem:[#allocation4 + $0x10] sm:$0xff] (!%p505_p10), %vm818_vm3, %v3089_v6  ;;  %s3639_s17 = scalar_lea.hbm (!%p505_p10), %s3703_s16, %s2682_s23 }
  0x1b   : > { %v2870_v4 = vpack.c.bf16 (!%p505_p10), %v583_v1, %v582_v0  ;;  %v585_v5 = vld [vmem:[%s3719_s2 + $0x18] sm:$0xff] (!%p505_p10)  ;;  %s3720_s2 = sld [smem:[#allocation15_spill]] (!%p505_p10)  ;;  %v681_v29 = vunpack.c.0.s8 (!%p505_p10), %v680_v25  ;;  %v713_v33 = vunpack.c.0.s8 (!%p505_p10), %v712_v28  ;;  %826 = vst.msk [vmem:[#allocation4 + $0x18] sm:$0xff] (!%p505_p10), %vm818_vm3, %v3089_v6 }
  0x1c   : > { %v2873_v7 = vpack.c.bf16 %v585_v5, %v584_v2  ;;  %s564_s21 = scalar_select %p563_p11, %s3077_s24, 1 }
  0x1d   : > { %2871 = vmatpush3.bf16.msra.mxu0 %v2870_v4  ;;  %v3309_v34 = vsub.s32 %v681_v29, %v683_v30  ;;  %v3311_v40 = vsub.s32 %v713_v33, %v683_v30  ;;  %s3098_s24 = smov [#allocation6]  }
  0x1e   : > { %2872 = vmatprep.subr.bf16.mxu0 %v3087_v3  ;;  %s2645_s28 = sshll.u32 %s564_s21, 3 }
  0x1f   : > { %s576_s21 = scalar_lea.vmem %s3688_s1, %s2645_s28 }
  0x20   : > { %v831_v15 = vld [vmem:[%s576_s21] sm:$0xff] }
  0x21   : > { %s569_s19 = scalar_lea.vmem %s3720_s2, %s2645_s28  ;;  %2874 = vmatpush3.bf16.msra.mxu0 %v2873_v7 }
  0x22   : > { %v3269_v10 = vld [vmem:[%s569_s19] sm:$0xff]  ;;  %2875 = vmatprep.subr.bf16.mxu0 %v3087_v3 }
  0x24   : > { %2750 = vmatmul.mubr.msk.f32.vlgmr.msra.gmra.mrb[0].mxu0 %vm593_vm1, %v3269_v10 }
  0x25   : > { %2877 = vmatpush3.bf16.msra.mxu0 %v2876_v11  ;;  %2760 = vmatprep.mubr.msk.f32.mxu0 %vm3088_vm0, %v3089_v6 }
  0x26   : > { %2878 = vmatprep.subr.bf16.mxu0 %v3087_v3 }
  0x29   : > { %2880 = vmatpush3.bf16.msra.mxu0 %v2879_v14 }
  0x2a   : > { %2763 = vmatprep.subr.mxu0 %v3089_v6 }
  0x2c   : > { %2761 = vmatmul.mubr.msk.f32.vlgmr.msra.gmra.mrb[2].mxu0 %vm593_vm1, %v831_v15 }
  0x2d   : > { %2765 = vmatprep.mubr.msk.f32.mxu0 %vm3088_vm0, %v3089_v6 }
  0xf7   : > { %v663_v17 = vpop.f32.mrb[0].mxu0 }
  0xf8   : > { %v664_v18 = vadd.f32 %v2647_v16, %v663_v17  ;;  %v2751_v19 = vpop.f32.mrb[1].mxu0 }
  0xfa   : > { %668 = vrot.lane.b32.xlu0 %v664_v18, %s3090_s25  ;;  %674 = vrot.lane.b32.xlu1 %v664_v18, %s3091_s27 }
  0xfe   : > { %671 = vrot.lane.b32.xlu0 %v664_v18, %s3092_s30 }
  0xff   : > { %v913_v21 = vpop.f32.mrb[2].mxu0 }
 0x100   : > { %v3304_v22 = vadd.f32 %v2651_v20, %v913_v21  ;;  %v2762_v23 = vpop.f32.mrb[3].mxu0 }
 0x102   : > { %921 = vrot.lane.b32.xlu0 %v3304_v22, %s3092_s30  ;;  %918 = vrot.lane.b32.xlu1 %v3304_v22, %s3090_s25  ;;  %s560_s30 = sand.u32 1, %s3069_s22  }
 0x103   : > { %s2536_s20 = scalar_lea.sflag [#allocation7], %s560_s30 }
 0x106   : > { %924 = vrot.lane.b32.xlu1 %v3304_v22, %s3091_s27 }
 0x16c   : > { %v669_v31 = vpop.permute.xlu0 %668  ;;  %v675_v32 = vpop.permute.xlu1 %674 }
 0x16d   : > { %v693_v35 = vcombine.low %v669_v31, %v675_v32  ;;  %v694_v36 = vcombine.high %v669_v31, %v675_v32 }
 0x16f   : > { %v701_v41 = vrot.slane %v693_v35, %v3309_v34  ;;  %v708_v42 = vrot.slane %v694_v36, %v3309_v34 }
 0x170   : > { %v672_v37 = vpop.permute.xlu0 %671 }
 0x171   : > { %v677_v38 = vcombine.low %v664_v18, %v672_v37  ;;  %v678_v39 = vcombine.high %v664_v18, %v672_v37 }
 0x173   : > { %v685_v43 = vrot.slane %v677_v38, %v3309_v34  ;;  %v692_v44 = vrot.slane %v678_v39, %v3309_v34 }
 0x174   : > { %v3317_v45 = vpop.permute.xlu1 %918  ;;  %v3319_v50 = vpop.permute.xlu0 %921 }
 0x175   : > { %v709_v46 = vcombine.low %v685_v43, %v701_v41  ;;  %v710_v47 = vcombine.high %v685_v43, %v701_v41  ;;  %v725_v48 = vcombine.low %v692_v44, %v708_v42  ;;  %v726_v49 = vcombine.high %v692_v44, %v708_v42 }
 0x176   : > { %v927_v55 = vcombine.low %v3304_v22, %v3319_v50  ;;  %v928_v56 = vcombine.high %v3304_v22, %v3319_v50 }
 0x177   : > { %v717_v51 = vrot.slane %v709_v46, %v3311_v40  ;;  %v724_v52 = vrot.slane %v710_v47, %v3311_v40  ;;  %v733_v53 = vrot.slane %v725_v48, %v3311_v40  ;;  %v740_v54 = vrot.slane %v726_v49, %v3311_v40 }
 0x178   : > { %v3329_v57 = vpop.permute.xlu1 %924  ;;  %v935_v5 = vrot.slane %v927_v55, %v3309_v34  ;;  %v942_v7 = vrot.slane %v928_v56, %v3309_v34 }
 0x179   : > { %v745_v58 = vcombine.low %v717_v51, %v724_v52  ;;  %v2649_v59 = vcombine.high %v717_v51, %v724_v52  ;;  %v761_v60 = vcombine.low %v733_v53, %v740_v54  ;;  %v2650_v61 = vcombine.high %v733_v53, %v740_v54 }
 0x17a   : > { %v943_v62 = vcombine.low %v3317_v45, %v3329_v57  ;;  %v944_v63 = vcombine.high %v3317_v45, %v3329_v57 }
 0x17b   : > { %v752_v0 = vrot.slane %v745_v58, %v3309_v34  ;;  %v760_v1 = vrot.slane %v2649_v59, %v3309_v34  ;;  %v768_v2 = vrot.slane %v761_v60, %v3309_v34  ;;  %v776_v4 = vrot.slane %v2650_v61, %v3309_v34 }
 0x17c   : > { %v951_v8 = vrot.slane %v943_v62, %v3309_v34  ;;  %v958_v9 = vrot.slane %v944_v63, %v3309_v34  ;;  %v3095_v61 = vmov -inf  }
 0x17d   : > { %v777_v11 = vcombine.low %v752_v0, %v760_v1  ;;  %v778_v12 = vcombine.high %v752_v0, %v760_v1  ;;  %v793_v13 = vcombine.low %v768_v2, %v776_v4  ;;  %v794_v14 = vcombine.high %v768_v2, %v776_v4  ;;  %819 = vst.msk [vmem:[#allocation3] sm:$0xff] %vm818_vm3, %v3095_v61 }
 0x17e   : > { %v959_v15 = vcombine.low %v935_v5, %v951_v8  ;;  %v960_v16 = vcombine.high %v935_v5, %v951_v8  ;;  %v975_v17 = vcombine.low %v942_v7, %v958_v9  ;;  %v976_v18 = vcombine.high %v942_v7, %v958_v9  ;;  %820 = vst.msk [vmem:[#allocation3 + $0x8] sm:$0xff] %vm818_vm3, %v3095_v61 }
 0x17f   : > { %v785_v19 = vrot.slane %v777_v11, %v3311_v40  ;;  %v792_v20 = vrot.slane %v778_v12, %v3311_v40  ;;  %v801_v21 = vrot.slane %v793_v13, %v3311_v40  ;;  %v808_v23 = vrot.slane %v794_v14, %v3311_v40  ;;  %821 = vst.msk [vmem:[#allocation3 + $0x10] sm:$0xff] %vm818_vm3, %v3095_v61 }
 0x180   : > { %v967_v24 = vrot.slane %v959_v15, %v3311_v40  ;;  %v974_v25 = vrot.slane %v960_v16, %v3311_v40  ;;  %v983_v26 = vrot.slane %v975_v17, %v3311_v40  ;;  %v990_v27 = vrot.slane %v976_v18, %v3311_v40  ;;  %822 = vst.msk [vmem:[#allocation3 + $0x18] sm:$0xff] %vm818_vm3, %v3095_v61 }
 0x181   : > { %v809_v28 = vcombine.low %v785_v19, %v801_v21  ;;  %v810_v29 = vcombine.high %v785_v19, %v801_v21  ;;  %v811_v30 = vcombine.low %v792_v20, %v808_v23  ;;  %v812_v31 = vcombine.high %v792_v20, %v808_v23 }
 0x182   : > { %v995_v32 = vcombine.low %v967_v24, %v974_v25  ;;  %v2653_v33 = vcombine.high %v967_v24, %v974_v25  ;;  %v1011_v35 = vcombine.low %v983_v26, %v990_v27  ;;  %v2654_v36 = vcombine.high %v983_v26, %v990_v27 }
 0x183   : > { %814 = vst.msk [vmem:[#allocation2] sm:$0xff] %vm813_vm2, %v809_v28  ;;  %815 = vst.msk [vmem:[#allocation2 + $0x8] sm:$0xff] %vm813_vm2, %v810_v29  ;;  %v3096_v13 = vmov 0  }
 0x184   : > { %816 = vst.msk [vmem:[#allocation2 + $0x10] sm:$0xff] %vm813_vm2, %v811_v30  ;;  %817 = vst.msk [vmem:[#allocation2 + $0x18] sm:$0xff] %vm813_vm2, %v812_v31  ;;  %v1002_v37 = vrot.slane %v995_v32, %v3309_v34  ;;  %v1010_v38 = vrot.slane %v2653_v33, %v3309_v34  ;;  %v1018_v39 = vrot.slane %v1011_v35, %v3309_v34  ;;  %2977 = vset.pattern.permute.xlu1 %v3096_v13  ;;  %v3405_v14 = vld [vmem:[#allocation3] sm:$0xff] }
 0x185   : > { %v1026_v41 = vrot.slane %v2654_v36, %v3309_v34  ;;  %2978 = vset.pattern.permute.xlu0 %v3096_v13  ;;  %v3410_v17 = vld [vmem:[#allocation3 + $0x8] sm:$0xff] }
 0x186   : > { %v1027_v42 = vcombine.low %v1002_v37, %v1010_v38  ;;  %v1028_v44 = vcombine.high %v1002_v37, %v1010_v38  ;;  %v3420_v21 = vld [vmem:[#allocation3 + $0x10] sm:$0xff] }
 0x187   : > { %v1043_v43 = vcombine.low %v1018_v39, %v1026_v41  ;;  %v1044_v46 = vcombine.high %v1018_v39, %v1026_v41  ;;  %v3431_v26 = vld [vmem:[#allocation3 + $0x18] sm:$0xff] }
 0x188   : > { %v1035_v47 = vrot.slane %v1027_v42, %v3311_v40  ;;  %v1042_v49 = vrot.slane %v1028_v44, %v3311_v40 }
 0x189   : > { %v1051_v48 = vrot.slane %v1043_v43, %v3311_v40  ;;  %v1058_v51 = vrot.slane %v1044_v46, %v3311_v40 }
 0x18a   : > { %v1211_v54 = vld [vmem:[#allocation2] sm:$0xff]  ;;  %v1212_v59 = vld [vmem:[#allocation2 + $0x8] sm:$0xff] }
 0x18b   : > { %v1059_v52 = vcombine.low %v1035_v47, %v1051_v48  ;;  %v1062_v53 = vcombine.high %v1042_v49, %v1058_v51  ;;  %v1214_v55 = vld [vmem:[#allocation2 + $0x18] sm:$0xff]  ;;  %v1060_v56 = vcombine.high %v1035_v47, %v1051_v48  ;;  %v1061_v58 = vcombine.low %v1042_v49, %v1058_v51  ;;  %v1213_v60 = vld [vmem:[#allocation2 + $0x10] sm:$0xff] }
 0x18d   : > { %2764 = vmatpush3.xpose.msk.msra.mxu0 %vm813_vm2, %v1059_v52  ;;  %2779 = vmatpush3.xpose.msk.msra.mxu1 %vm813_vm2, %v1062_v53 }
 0x18e   : > { %2768 = vmatprep.subr.mxu0 %v3089_v6  ;;  %2788 = vmatprep.subr.mxu1 %v3089_v6 }
 0x190   : > { %2766 = vmatmul.mubr.msk.f32.vlgmr.msra.gmra.mrb[4].mxu0 %vm813_vm2, %v1211_v54  ;;  %2781 = vmatmul.mubr.msk.f32.vlgmr.msra.gmra.mrb[0].mxu1 %vm813_vm2, %v1214_v55 }
 0x191   : > { %2769 = vmatpush3.xpose.msk.msra.mxu0 %vm813_vm2, %v1060_v56  ;;  %2770 = vmatprep.mubr.msk.f32.mxu0 %vm3088_vm0, %v3089_v6 }
 0x192   : > { %2773 = vmatprep.subr.mxu0 %v3089_v6  ;;  %2790 = vmatprep.mubr.msk.f32.mxu1 %vm3088_vm0, %v3089_v6 }
 0x194   : > { %2771 = vmatmul.mubr.msk.f32.vlgmr.msra.gmra.mrb[6].mxu0 %vm813_vm2, %v1212_v59 }
 0x195   : > { %2774 = vmatpush3.xpose.msk.msra.mxu0 %vm813_vm2, %v1061_v58  ;;  %2775 = vmatprep.mubr.msk.f32.mxu0 %vm3088_vm0, %v3089_v6 }
 0x196   : > { %2783 = vmatprep.subr.mxu0 %v3089_v6 }
 0x198   : > { %2776 = vmatmul.mubr.msk.f32.vlgmr.msra.gmra.mrb[8].mxu0 %vm813_vm2, %v1213_v60 }
 0x199   : > { %2785 = vmatprep.mubr.msk.f32.mxu0 %vm3088_vm0, %v3089_v6 }
 0x263   : > { %v1288_v62 = vpop.f32.mrb[4].mxu0  ;;  %v3395_v63 = vpop.f32.mrb[0].mxu1 }
 0x264   : > { %v2767_v0 = vpop.f32.mrb[5].mxu0  ;;  %v2782_v1 = vpop.f32.mrb[1].mxu1  ;;  %v1524_v2 = vsel %vm813_vm2, %v1288_v62, -inf  ;;  %v1533_v12 = vsel %vm813_vm2, %v3395_v63, -inf }
 0x265   : > { %1525 = vmax.xlane.f32.xlu0 %v1524_v2 }
 0x267   : > { %v1364_v4 = vpop.f32.mrb[6].mxu0 }
 0x268   : > { %v2772_v5 = vpop.f32.mrb[7].mxu0  ;;  %v1527_v7 = vsel %vm813_vm2, %v1364_v4, -inf }
 0x269   : > { %1528 = vmax.xlane.f32.xlu1 %v1527_v7 }
 0x26b   : > { %v3399_v8 = vpop.f32.mrb[8].mxu0 }
 0x26c   : > { %v2777_v9 = vpop.f32.mrb[9].mxu0  ;;  %v1530_v11 = vsel %vm813_vm2, %v3399_v8, -inf }
 0x26d   : > { %1531 = vmax.xlane.f32.xlu0 %v1530_v11 }
 0x271   : > { %1534 = vmax.xlane.f32.xlu0 %v1533_v12 }
 0x2f2   : > { %v1526_v15 = vpop.xlane.xlu0 %1525 }
 0x2f3   : > { %v3408_v16 = vmax.f32 %v3405_v14, %v1526_v15 }
 0x2f5   : > { %v1540_v18 = vsub.f32 %v3405_v14, %v3408_v16  ;;  %1941 = vst.msk [vmem:[#allocation3] sm:$0xff] %vm818_vm3, %v3408_v16  ;;  %1554 = vperm.xlu1 %2977, %v3408_v16  }
 0x2f6   : > { %v1529_v19 = vpop.xlane.xlu1 %1528 }
 0x2f7   : > { %v3418_v20 = vmax.f32 %v3410_v17, %v1529_v19 }
 0x2f9   : > { %v1541_v23 = vsub.f32 %v3410_v17, %v3418_v20  ;;  %1942 = vst.msk [vmem:[#allocation3 + $0x8] sm:$0xff] %vm818_vm3, %v3418_v20  ;;  %1063 = vrot.lane.b32.xlu1 %v3304_v22, %s3097_s29  ;;  %1559 = vperm.xlu0 %2978, %v3418_v20  }
 0x2fa   : > { %v1532_v24 = vpop.xlane.xlu0 %1531 }
 0x2fb   : > { %v3429_v25 = vmax.f32 %v3420_v21, %v1532_v24 }
 0x2fd   : > { %v1542_v27 = vsub.f32 %v3420_v21, %v3429_v25  ;;  %1943 = vst.msk [vmem:[#allocation3 + $0x10] sm:$0xff] %vm818_vm3, %v3429_v25  ;;  %1065 = vrot.lane.b32.xlu1 %v3317_v45, %s3097_s29  ;;  %v1584_v21 = vld [vmem:[#allocation4] sm:$0xff] }
 0x2fe   : > { %v1535_v28 = vpop.xlane.xlu0 %1534 }
 0x2ff   : > { %v3439_v29 = vmax.f32 %v3431_v26, %v1535_v28  ;;  %v1548_v14 = vmul.f32 1.442695, %v1542_v27 }
 0x301   : > { %v1543_v22 = vsub.f32 %v3431_v26, %v3439_v29  ;;  %1944 = vst.msk [vmem:[#allocation3 + $0x18] sm:$0xff] %vm818_vm3, %v3439_v29  ;;  %1067 = vrot.lane.b32.xlu1 %v3319_v50, %s3097_s29 }
 0x303   : > { %v1550_v16 = vmul.f32 1.442695, %v1543_v22 }
 0x305   : > { %1069 = vrot.lane.b32.xlu1 %v3329_v57, %s3097_s29  ;;  %s2644_s29 = sshll.u32 %s560_s30, 3 }
 0x306   : > { %s562_s18 = scalar_lea.vmem [#allocation6], %s2644_s29  ;;  %s3011_s29 = sshll.u32 %s3098_s24, 4  ;;  %s3012_s29 = int_to_ptr.vmem [resolvable:$false] %s3011_s29 }
 0x307   : > { %s2550_s25 = sshll.u32 %s562_s18, 4  ;;  %s3013_s19 = scalar_lea.vmem %s3012_s29, 256  ;;  %s3641_s25 = int_to_ptr.vmem [resolvable:$true] %s2550_s25 }
 0x308   : > { %s3007_s2 = scalar_lea.vmem %s3641_s25, 128  ;;  %p3014_p1 = scmp.lt.s32.totalorder %s3641_s25, %s3012_s29 }
 0x309   : > { %1564 = vperm.xlu1 %2977, %v3429_v25   ;;  %p3008_p12 = scmp.ne.s32.totalorder %s3641_s25, %s3007_s2  ;;  %p3015_p2 = scmp.lt.s32.totalorder %s3013_s19, %s3007_s2 }
 0x30b   : > { %p3009_p13 = pnand %p3008_p12, %p3224_p4  ;;  %p3016_p3 = por %p3015_p2, %p3014_p1 }
 0x30d   : > { %1569 = vperm.xlu1 %2977, %v3439_v29   ;;  %p3010_p0 = pneg %p3009_p13 }
 0x30f   : > { %p3017_p5 = pnand %p3016_p3, %p3010_p0 }
 0x374   : > { %v1555_v30 = vpop.permute.xlu1 %1554 }
 0x375   : > { %v1572_v45 = vsub.f32 %v1288_v62, %v1555_v30 }
 0x377   : > { %v1576_v31 = vmul.f32 1.442695, %v1572_v45 }
 0x378   : > { %v1064_v32 = vpop.permute.xlu1 %1063  ;;  %v1560_v33 = vpop.permute.xlu0 %1559 }
 0x379   : > { %2979 = vpow2.f32 %v1576_v31  ;;  %v1573_v35 = vsub.f32 %v1364_v4, %v1560_v33 }
 0x37b   : > { %v1578_v36 = vmul.f32 1.442695, %v1573_v35 }
 0x37c   : > { %v1066_v37 = vpop.permute.xlu1 %1065 }
 0x37d   : > { %2981 = vpow2.f32 %v1578_v36 }
 0x380   : > { %v1068_v38 = vpop.permute.xlu1 %1067 }
 0x381   : > { %v1075_v41 = vcombine.low %v1064_v32, %v1068_v38  ;;  %v1076_v50 = vcombine.high %v1064_v32, %v1068_v38 }
 0x383   : > { %v2980_v39 = vpop.eup %2979  ;;  %v1083_v47 = vrot.slane %v1075_v41, %v3309_v34  ;;  %v1090_v48 = vrot.slane %v1076_v50, %v3309_v34 }
 0x384   : > { %v1070_v42 = vpop.permute.xlu1 %1069  ;;  %v1592_v57 = vsel %vm813_vm2, %v2980_v39, 0.0 }
 0x385   : > { %v1091_v43 = vcombine.low %v1066_v37, %v1070_v42  ;;  %v1092_v44 = vcombine.high %v1066_v37, %v1070_v42  ;;  %1593 = vadd.xlane.f32.xlu1 %v1592_v57 }
 0x387   : > { %v2982_v46 = vpop.eup %2981  ;;  %v1099_v49 = vrot.slane %v1091_v43, %v3309_v34  ;;  %v1106_v51 = vrot.slane %v1092_v44, %v3309_v34 }
 0x388   : > { %v1565_v52 = vpop.permute.xlu1 %1564  ;;  %v1595_v53 = vsel %vm813_vm2, %v2982_v46, 0.0 }
 0x389   : > { %v1107_v54 = vcombine.low %v1083_v47, %v1099_v49  ;;  %v1108_v55 = vcombine.high %v1083_v47, %v1099_v49  ;;  %v1123_v56 = vcombine.low %v1090_v48, %v1106_v51  ;;  %v1124_v58 = vcombine.high %v1090_v48, %v1106_v51  ;;  %1596 = vadd.xlane.f32.xlu0 %v1595_v53  ;;  %v1586_v47 = vld [vmem:[#allocation4 + $0x10] sm:$0xff] }
 0x38a   : > { %v1574_v59 = vsub.f32 %v3399_v8, %v1565_v52  ;;  %v1587_v52 = vld [vmem:[#allocation4 + $0x18] sm:$0xff] }
 0x38b   : > { %v1115_v60 = vrot.slane %v1107_v54, %v3311_v40  ;;  %v1122_v61 = vrot.slane %v1108_v55, %v3311_v40  ;;  %v1131_v62 = vrot.slane %v1123_v56, %v3311_v40  ;;  %v1138_v0 = vrot.slane %v1124_v58, %v3311_v40  ;;  %v1984_v54 = vld [vmem:[%s3693_s6] sm:$0xff] }
 0x38c   : > { %v1580_v1 = vmul.f32 1.442695, %v1574_v59  ;;  %v1570_v2 = vpop.permute.xlu1 %1569 }
 0x38d   : > { %v1143_v4 = vcombine.low %v1115_v60, %v1122_v61  ;;  %v2655_v5 = vcombine.high %v1115_v60, %v1122_v61  ;;  %v1159_v7 = vcombine.low %v1131_v62, %v1138_v0  ;;  %v2656_v9 = vcombine.high %v1131_v62, %v1138_v0  ;;  %v1985_v60 = vld [vmem:[%s3693_s6 + $0x8] sm:$0xff] }
 0x38e   : > { %2983 = vpow2.f32 %v1580_v1  ;;  %v1575_v11 = vsub.f32 %v3395_v63, %v1570_v2 }
 0x38f   : > { %v1150_v12 = vrot.slane %v1143_v4, %v3309_v34  ;;  %v1158_v8 = vrot.slane %v2655_v5, %v3309_v34  ;;  %v1166_v13 = vrot.slane %v1159_v7, %v3309_v34  ;;  %v1174_v15 = vrot.slane %v2656_v9, %v3309_v34  ;;  %v1613_v5 = vld [vmem:[#allocation5] sm:$0xff]  ;;  %v1614_v7 = vld [vmem:[#allocation5 + $0x8] sm:$0xff] }
 0x390   : > { %v1582_v19 = vmul.f32 1.442695, %v1575_v11 }
 0x391   : > { %v1175_v24 = vcombine.low %v1150_v12, %v1158_v8  ;;  %v1191_v28 = vcombine.low %v1166_v13, %v1174_v15  ;;  %v1176_v30 = vcombine.high %v1150_v12, %v1158_v8  ;;  %v1192_v45 = vcombine.high %v1166_v13, %v1174_v15  ;;  %v1615_v13 = vld [vmem:[#allocation5 + $0x10] sm:$0xff] }
 0x392   : > { %2985 = vpow2.f32 %v1582_v19 }
 0x393   : > { %v1183_v31 = vrot.slane %v1175_v24, %v3311_v40  ;;  %v1199_v32 = vrot.slane %v1191_v28, %v3311_v40  ;;  %v1190_v63 = vrot.slane %v1176_v30, %v3311_v40  ;;  %v1206_v33 = vrot.slane %v1192_v45, %v3311_v40  ;;  %v1616_v24 = vld [vmem:[#allocation5 + $0x18] sm:$0xff] }
 0x395   : > { %v1207_v35 = vcombine.low %v1183_v31, %v1199_v32  ;;  %v1208_v36 = vcombine.high %v1183_v31, %v1199_v32  ;;  %v1209_v34 = vcombine.low %v1190_v63, %v1206_v33  ;;  %v1210_v41 = vcombine.high %v1190_v63, %v1206_v33 }
 0x397   : > { %2784 = vmatpush3.msra.mxu0 %v1207_v35  ;;  %2789 = vmatpush3.msra.mxu1 %v1208_v36 }
 0x398   : > { %v2984_v37 = vpop.eup %2983  ;;  %2786 = vmatmul.mubr.msk.f32.vlgmr.msra.gmra.mrb[10].mxu0 %vm813_vm2, %v2980_v39  ;;  %2791 = vmatmul.mubr.msk.f32.vlgmr.msra.gmra.mrb[2].mxu1 %vm813_vm2, %v2982_v46  ;;  %v1544_v39 = vmul.f32 1.442695, %v1540_v18  ;;  %v1546_v18 = vmul.f32 1.442695, %v1541_v23  ;;  %v1585_v46 = vld [vmem:[#allocation4 + $0x8] sm:$0xff] }
 0x399   : > { %2793 = vmatprep.subr.mxu0 %v3089_v6  ;;  %2798 = vmatprep.subr.mxu1 %v3089_v6  ;;  %v1598_v38 = vsel %vm813_vm2, %v2984_v37, 0.0 }
 0x39a   : > { %2794 = vmatpush3.msra.mxu0 %v1209_v34  ;;  %1599 = vadd.xlane.f32.xlu1 %v1598_v38  ;;  %2987 = vpow2.f32 %v1544_v39 }
 0x39b   : > { %2799 = vmatpush3.msra.mxu1 %v1210_v41  ;;  %2795 = vmatprep.mubr.msk.f32.mxu0 %vm3088_vm0, %v3089_v6  ;;  %2989 = vpow2.f32 %v1548_v14 }
 0x39c   : > { %v2986_v40 = vpop.eup %2985  ;;  %2800 = vmatprep.mubr.msk.f32.mxu1 %vm3088_vm0, %v3089_v6  ;;  %2796 = vmatmul.mubr.msk.f32.vlgmr.msra.gmra.mrb[12].mxu0 %vm813_vm2, %v2984_v37  ;;  %2991 = vpow2.f32 %v1550_v16 }
 0x39d   : > { %2801 = vmatmul.mubr.msk.f32.vlgmr.msra.gmra.mrb[4].mxu1 %vm813_vm2, %v2986_v40  ;;  %v1601_v50 = vsel %vm813_vm2, %v2986_v40, 0.0  ;;  %2803 = vmatprep.subr.mxu0 %v3089_v6  ;;  %2993 = vpow2.f32 %v1546_v18 }
 0x39e   : > { %1602 = vadd.xlane.f32.xlu0 %v1601_v50  ;;  %2805 = vmatprep.mubr.msk.f32.mxu0 %vm3088_vm0, %v3089_v6  ;;  %v1986_v50 = vld [vmem:[%s3693_s6 + $0x10] sm:$0xff] }
 0x39f   : > { %2808 = vmatprep.subr.mxu1 %v3089_v6  ;;  %2810 = vmatprep.mubr.msk.f32.mxu1 %vm3088_vm0, %v3089_v6 }
 0x3a0   : > { %2804 = vmatpush3.msra.mxu0 %v1984_v54  ;;  %2809 = vmatpush3.msra.mxu1 %v1985_v60 }
 0x3a1   : > { %2813 = vmatprep.subr.mxu0 %v3089_v6  ;;  %2818 = vmatprep.subr.mxu1 %v3089_v6 }
 0x3a4   : > { %v2988_v42 = vpop.eup %2987 }
 0x3a5   : > { %v2990_v57 = vpop.eup %2989  ;;  %v1588_v25 = vmul.f32 %v2988_v42, %v1584_v21 }
 0x3a6   : > { %v2992_v43 = vpop.eup %2991  ;;  %v1590_v48 = vmul.f32 %v2990_v57, %v1586_v47 }
 0x3a7   : > { %v2994_v44 = vpop.eup %2993  ;;  %v1591_v55 = vmul.f32 %v2992_v43, %v1587_v52 }
 0x3a8   : > { %v1589_v29 = vmul.f32 %v2994_v44, %v1585_v46 }
 0x3ab   : > { %1619 = vperm.xlu1 %2977, %v2988_v42   ;;  %v1987_v42 = vld [vmem:[%s3693_s6 + $0x18] sm:$0xff] }
 0x3af   : > { %1629 = vperm.xlu1 %2977, %v2990_v57  }
 0x3b3   : > { %1634 = vperm.xlu1 %2977, %v2992_v43  }
 0x3b4   : > { %1624 = vperm.xlu0 %2978, %v2994_v44  }
 0x412   : > { %v1594_v27 = vpop.xlane.xlu1 %1593 }
 0x413   : > { %v1604_v26 = vadd.f32 %v1594_v27, %v1588_v25 }
 0x415   : > { %1609 = vst.msk [vmem:[#allocation4] sm:$0xff] %vm818_vm3, %v1604_v26 }
 0x416   : > { %v1597_v17 = vpop.xlane.xlu0 %1596 }
 0x417   : > { %v1605_v20 = vadd.f32 %v1597_v17, %v1589_v29 }
 0x419   : > { %1610 = vst.msk [vmem:[#allocation4 + $0x8] sm:$0xff] %vm818_vm3, %v1605_v20 }
 0x41c   : > { %v1952_v23 = vld [vmem:[#allocation4] sm:$0xff] }
 0x41d   : > { %2995 = vrcp.f32 %v1952_v23 }
 0x420   : > { %v1953_v22 = vld [vmem:[#allocation4 + $0x8] sm:$0xff] }
 0x421   : > { %2997 = vrcp.f32 %v1953_v22 }
 0x427   : > { %v2996_v49 = vpop.eup %2995  ;;  %v1600_v51 = vpop.xlane.xlu1 %1599 }
 0x428   : > { %v1606_v53 = vadd.f32 %v1600_v51, %v1590_v48  ;;  %1962 = vperm.xlu0 %2978, %v2996_v49  }
 0x42a   : > { %1611 = vst.msk [vmem:[#allocation4 + $0x10] sm:$0xff] %vm818_vm3, %v1606_v53 }
 0x42b   : > { %v2998_v56 = vpop.eup %2997  ;;  %v1603_v58 = vpop.xlane.xlu0 %1602 }
 0x42c   : > { %v1607_v59 = vadd.f32 %v1603_v58, %v1591_v55  ;;  %1967 = vperm.xlu1 %2977, %v2998_v56   ;;  %v1620_v2 = vpop.permute.xlu1 %1619 }
 0x42d   : > { %v1637_v11 = vmul.f32 %v1620_v2, %v1613_v5  ;;  %v2326_v2 = vld [vmem:[%s3695_s8] sm:$0xff] }
 0x42e   : > { %1612 = vst.msk [vmem:[#allocation4 + $0x18] sm:$0xff] %vm818_vm3, %v1607_v59 }
 0x430   : > { %v1630_v4 = vpop.permute.xlu1 %1629 }
 0x431   : > { %v1954_v61 = vld [vmem:[#allocation4 + $0x10] sm:$0xff]  ;;  %v1639_v32 = vmul.f32 %v1630_v4, %v1615_v13  ;;  %v2327_v4 = vld [vmem:[%s3695_s8 + $0x8] sm:$0xff] }
 0x432   : > { %2999 = vrcp.f32 %v1954_v61  ;;  %v2882_v5 = vpack.c.bf16 %v2327_v4, %v2326_v2 }
 0x433   : > { %v1625_v9 = vpop.permute.xlu0 %1624 }
 0x434   : > { %v1635_v12 = vpop.permute.xlu1 %1634  ;;  %v1638_v8 = vmul.f32 %v1625_v9, %v1614_v7  ;;  %v2329_v7 = vld [vmem:[%s3695_s8 + $0x18] sm:$0xff] }
 0x435   : > { %v1955_v62 = vld [vmem:[#allocation4 + $0x18] sm:$0xff]  ;;  %v1640_v63 = vmul.f32 %v1635_v12, %v1616_v24  ;;  %v2412_v12 = vld [vmem:[%s3697_s10 + $0x8] sm:$0xff]  ;;  %v2415_v24 = vld [vmem:[%s3697_s10 + $0x20] sm:$0xff] }
 0x436   : > { %3001 = vrcp.f32 %v1955_v62 }
 0x43c   : > { %v3000_v0 = vpop.eup %2999 }
 0x43d   : > { %1972 = vperm.xlu0 %2978, %v3000_v0  }
 0x440   : > { %v3002_v1 = vpop.eup %3001 }
 0x441   : > { %1977 = vperm.xlu1 %2977, %v3002_v1  }
 0x46b   : > { %v1710_v15 = vpop.f32.mrb[10].mxu0  ;;  %v1783_v19 = vpop.f32.mrb[2].mxu1 }
 0x46c   : > { %v1933_v28 = vadd.f32 %v1710_v15, %v1637_v11  ;;  %v1934_v30 = vadd.f32 %v1783_v19, %v1638_v8  ;;  %v2787_v45 = vpop.f32.mrb[11].mxu0  ;;  %v2792_v31 = vpop.f32.mrb[3].mxu1  ;;  %v2411_v11 = vld [vmem:[%s3697_s10] sm:$0xff]  ;;  %v2413_v8 = vld [vmem:[%s3697_s10 + $0x10] sm:$0xff]  ;;  %v2414_v15 = vld [vmem:[%s3697_s10 + $0x18] sm:$0xff] }
 0x46d   : > { %v2888_v13 = vpack.c.bf16 %v2412_v12, %v2411_v11  ;;  %v2891_v19 = vpack.c.bf16 %v2414_v15, %v2413_v8  ;;  %v2417_v45 = vld [vmem:[%s3697_s10 + $0x30] sm:$0xff]  ;;  %v2418_v31 = vld [vmem:[%s3697_s10 + $0x38] sm:$0xff] }
 0x46e   : > { %1937 = vst.msk [vmem:[#allocation5] sm:$0xff] %vm813_vm2, %v1933_v28  ;;  %1938 = vst.msk [vmem:[#allocation5 + $0x8] sm:$0xff] %vm813_vm2, %v1934_v30  ;;  %v2416_v28 = vld [vmem:[%s3697_s10 + $0x28] sm:$0xff] }
 0x46f   : > { %v1856_v33 = vpop.f32.mrb[12].mxu0  ;;  %v2894_v30 = vpack.c.bf16 %v2416_v28, %v2415_v24 }
 0x470   : > { %v1935_v35 = vadd.f32 %v1856_v33, %v1639_v32  ;;  %v1929_v36 = vpop.f32.mrb[4].mxu1  ;;  %v2797_v37 = vpop.f32.mrb[13].mxu0  ;;  %v2897_v32 = vpack.c.bf16 %v2418_v31, %v2417_v45  ;;  %v2420_v33 = vld [vmem:[%s3697_s10 + $0x48] sm:$0xff] }
 0x471   : > { %v1936_v34 = vadd.f32 %v1929_v36, %v1640_v63  ;;  %v2802_v38 = vpop.f32.mrb[5].mxu1  ;;  %v2419_v63 = vld [vmem:[%s3697_s10 + $0x40] sm:$0xff]  ;;  %v2421_v36 = vld [vmem:[%s3697_s10 + $0x50] sm:$0xff]  ;;  %v2422_v37 = vld [vmem:[%s3697_s10 + $0x58] sm:$0xff] }
 0x472   : > { %1939 = vst.msk [vmem:[#allocation5 + $0x10] sm:$0xff] %vm813_vm2, %v1935_v35  ;;  %v2900_v35 = vpack.c.bf16 %v2420_v33, %v2419_v63  ;;  %v2423_v38 = vld [vmem:[%s3697_s10 + $0x60] sm:$0xff] }
 0x473   : > { %1940 = vst.msk [vmem:[#allocation5 + $0x18] sm:$0xff] %vm813_vm2, %v1936_v34  ;;  %v2903_v34 = vpack.c.bf16 %v2422_v37, %v2421_v36 }
 0x475   : > { %v1948_v40 = vld [vmem:[#allocation5] sm:$0xff]  ;;  %v1949_v16 = vld [vmem:[#allocation5 + $0x8] sm:$0xff] }
 0x479   : > { %v1950_v43 = vld [vmem:[#allocation5 + $0x10] sm:$0xff] }
 0x47a   : > { %v1951_v21 = vld [vmem:[#allocation5 + $0x18] sm:$0xff] }
 0x4a7   : > { %v1963_v41 = vpop.permute.xlu0 %1962 }
 0x4a8   : > { %v1980_v39 = vmul.f32 %v1963_v41, %v1948_v40  ;;  %v2424_v41 = vld [vmem:[%s3697_s10 + $0x68] sm:$0xff] }
 0x4a9   : > { %v2906_v40 = vpack.c.bf16 %v2424_v41, %v2423_v38 }
 0x4aa   : > { %2806 = vmatmul.mubr.msk.f32.vlgmr.msra.gmra.mrb[14].mxu0 %vm813_vm2, %v1980_v39 }
 0x4ab   : > { %v1968_v14 = vpop.permute.xlu1 %1967  ;;  %2814 = vmatpush3.msra.mxu0 %v1986_v50  ;;  %2815 = vmatprep.mubr.msk.f32.mxu0 %vm3088_vm0, %v3089_v6 }
 0x4ac   : > { %v1981_v18 = vmul.f32 %v1968_v14, %v1949_v16  ;;  %2881 = vmatprep.subr.bf16.mxu0 %v3087_v3 }
 0x4ae   : > { %2811 = vmatmul.mubr.msk.f32.vlgmr.msra.gmra.mrb[6].mxu1 %vm813_vm2, %v1981_v18  ;;  %v2674_v18 = vld [vmem:[%s3699_s12] ss:$0 sm:$0xff] }
 0x4af   : > { %2819 = vmatpush3.msra.mxu1 %v1987_v42  ;;  %2820 = vmatprep.mubr.msk.f32.mxu1 %vm3088_vm0, %v3089_v6 }
 0x4b0   : > { %2887 = vmatprep.subr.bf16.mxu1 %v3087_v3 }
 0x4bc   : > { %v1973_v57 = vpop.permute.xlu0 %1972 }
 0x4bd   : > { %v1982_v44 = vmul.f32 %v1973_v57, %v1950_v43  ;;  %v2675_v57 = vld [vmem:[%s3700_s13] ss:$0 sm:$0xff] }
 0x4bf   : > { %2816 = vmatmul.mubr.msk.f32.vlgmr.msra.gmra.mrb[16].mxu0 %vm813_vm2, %v1982_v44 }
 0x4c0   : > { %v1978_v25 = vpop.permute.xlu1 %1977  ;;  %2831 = vmatprep.mubr.msk.f32.mxu0 %vm3088_vm0, %v3089_v6  ;;  %2883 = vmatpush3.bf16.msra.mxu0 %v2882_v5 }
 0x4c1   : > { %v1983_v27 = vmul.f32 %v1978_v25, %v1951_v21  ;;  %2884 = vmatprep.subr.bf16.mxu0 %v3087_v3  ;;  %v2426_v21 = vld [vmem:[%s3697_s10 + $0x78] sm:$0xff] }
 0x4c3   : > { %2821 = vmatmul.mubr.msk.f32.vlgmr.msra.gmra.mrb[8].mxu1 %vm813_vm2, %v1983_v27  ;;  %v2676_v27 = vld [vmem:[%s3696_s9] ss:$0 sm:$0xff] }
 0x4c4   : > { %2866 = vmatprep.mubr.msk.f32.mxu1 %vm3088_vm0, %v3089_v6  ;;  %v2673_v6 = vld [vmem:[%s3694_s7] ss:$0 sm:$0xff]  ;;  %2889 = vmatpush3.bf16.msra.mxu1 %v2888_v13 }
 0x4c5   : > { %2890 = vmatprep.subr.bf16.mxu1 %v3087_v3 }
 0x4c8   : > { %2892 = vmatpush3.bf16.msra.mxu1 %v2891_v19 }
 0x4c9   : > { %2893 = vmatprep.subr.bf16.mxu1 %v3087_v3 }
 0x4cc   : > { %2895 = vmatpush3.bf16.msra.mxu1 %v2894_v30 }
 0x4cd   : > { %2896 = vmatprep.subr.bf16.mxu1 %v3087_v3 }
 0x4d0   : > { %2898 = vmatpush3.bf16.msra.mxu1 %v2897_v32 }
 0x4d1   : > { %2899 = vmatprep.subr.bf16.mxu1 %v3087_v3 }
 0x4d4   : > { %2901 = vmatpush3.bf16.msra.mxu1 %v2900_v35 }
 0x4d5   : > { %2902 = vmatprep.subr.bf16.mxu1 %v3087_v3 }
 0x4d8   : > { %2904 = vmatpush3.bf16.msra.mxu1 %v2903_v34 }
 0x4d9   : > { %2905 = vmatprep.subr.bf16.mxu1 %v3087_v3 }
 0x4dc   : > { %2907 = vmatpush3.bf16.msra.mxu1 %v2906_v40 }
 0x4dd   : > { %2908 = vmatprep.subr.bf16.mxu1 %v3087_v3  ;;  %v2425_v3 = vld [vmem:[%s3697_s10 + $0x70] sm:$0xff] }
 0x4de   : > { %v2909_v25 = vpack.c.bf16 %v2426_v21, %v2425_v3 }
 0x4e0   : > { %2910 = vmatpush3.bf16.msra.mxu1 %v2909_v25 }
 0x57d   : > { %v2057_v46 = vpop.f32.mrb[14].mxu0 }
 0x57e   : > { %v2807_v26 = vpop.f32.mrb[15].mxu0  ;;  %v2280_v17 = vsel %vm593_vm1, %v2057_v46, 0.0 }
 0x581   : > { %v2130_v29 = vpop.f32.mrb[6].mxu1 }
 0x582   : > { %v2281_v20 = vsel %vm593_vm1, %v2130_v29, 0.0  ;;  %v2812_v23 = vpop.f32.mrb[7].mxu1 }
 0x583   : > { %v2282_v22 = vadd.f32 %v2281_v20, %v2280_v17  ;;  %v2678_v20 = vld [vmem:[%s3698_s11] ss:$0 sm:$0xff] }
 0x592   : > { %v2203_v47 = vpop.f32.mrb[16].mxu0 }
 0x593   : > { %v2283_v48 = vsel %vm593_vm1, %v2203_v47, 0.0  ;;  %v2817_v49 = vpop.f32.mrb[17].mxu0 }
 0x594   : > { %v2284_v51 = vadd.f32 %v2283_v48, %v2282_v22 }
 0x596   : > { %v2276_v52 = vpop.f32.mrb[8].mxu1 }
 0x597   : > { %v2285_v53 = vsel %vm593_vm1, %v2276_v52, 0.0  ;;  %v2822_v54 = vpop.f32.mrb[9].mxu1 }
 0x598   : > { %v2286_v55 = vadd.f32 %v2285_v53, %v2284_v51 }
 0x59a   : > { %v2294_v56 = vadd.f32 %v2673_v6, %v2286_v55 }
 0x59c   : > { %v2295_v58 = vadd.f32 %v2294_v56, %v3269_v10  ;;  %v2328_v10 = vld [vmem:[%s3695_s8 + $0x10] sm:$0xff] }
 0x59d   : > { %v2885_v9 = vpack.c.bf16 %v2329_v7, %v2328_v10 }
 0x59e   : > { %v2298_v59 = vsel %vm593_vm1, %v2295_v58, 0.0 }
 0x59f   : > { %2299 = vadd.xlane.f32.xlu0 %v2298_v59  ;;  %2886 = vmatpush3.bf16.msra.mxu0 %v2885_v9 }
 0x62c   : > { %v2300_v60 = vpop.xlane.xlu0 %2299 }
 0x62d   : > { %v2302_v61 = vmul.f32 0.03125, %v2300_v60  ;;  %v2679_v60 = vld [vmem:[%s3701_s14] ss:$0 sm:$0xff] }
 0x62f   : > { %v2303_v62 = vsub.f32 %v2295_v58, %v2302_v61 }
 0x631   : > { %v2304_v0 = vmul.f32 %v2303_v62, %v2303_v62 }
 0x633   : > { %v2305_v1 = vsel %vm593_vm1, %v2304_v0, 0.0 }
 0x634   : > { %2306 = vadd.xlane.f32.xlu1 %v2305_v1 }
 0x6c1   : > { %v2307_v39 = vpop.xlane.xlu1 %2306 }
 0x6c2   : > { %v2308_v50 = vmul.f32 0.03125, %v2307_v39 }
 0x6c4   : > { %v2309_v14 = vadd.f32 1e-05, %v2308_v50 }
 0x6c6   : > { %3003 = vrsqrt.f32 %v2309_v14 }
 0x6d0   : > { %v3004_v16 = vpop.eup %3003 }
 0x6d1   : > { %v2311_v42 = vmul.f32 %v3004_v16, %v2303_v62  ;;  %v2680_v62 = vld [vmem:[%s3702_s15] ss:$0 sm:$0xff] }
 0x6d3   : > { %v2318_v43 = vmul.f32 %v2674_v18, %v2311_v42 }
 0x6d5   : > { %v2325_v44 = vadd.f32 %v2675_v57, %v2318_v43 }
 0x6d7   : > { %2832 = vmatmul.mubr.msk.f32.vlgmr.msra.gmra.mrb[18].mxu0 %vm593_vm1, %v2325_v44 }
 0x7aa   : > { %v2406_v46 = vpop.f32.mrb[18].mxu0 }
 0x7ab   : > { %v2407_v26 = vadd.f32 %v2676_v27, %v2406_v46  ;;  %v2833_v29 = vpop.f32.mrb[19].mxu0 }
 0x7ad   : > { %v2410_v17 = vmax.f32 %v2407_v26, 0.0 }
 0x7af   : > { %2867 = vmatmul.mubr.f32.vlgmr.msra.gmra.mrb[10].mxu1 %v2410_v17 }
 0x882   : > { %v2500_v23 = vpop.f32.mrb[10].mxu1 }
 0x883   : > { %v2501_v22 = vadd.f32 %v2678_v20, %v2500_v23  ;;  %v2868_v47 = vpop.f32.mrb[11].mxu1 }
 0x885   : > { %v2504_v48 = vadd.f32 %v2501_v22, %v2325_v44 }
 0x887   : > { %v2507_v49 = vsel %vm593_vm1, %v2504_v48, 0.0 }
 0x888   : > { %2508 = vadd.xlane.f32.xlu0 %v2507_v49 }
 0x915   : > { %v2509_v51 = vpop.xlane.xlu0 %2508 }
 0x916   : > { %v2510_v52 = vmul.f32 0.03125, %v2509_v51 }
 0x918   : > { %v2511_v53 = vsub.f32 %v2504_v48, %v2510_v52 }
 0x91a   : > { %v2512_v6 = vmul.f32 %v2511_v53, %v2511_v53 }
 0x91c   : > { %v2513_v54 = vsel %vm593_vm1, %v2512_v6, 0.0 }
 0x91d   : > { %2514 = vadd.xlane.f32.xlu0 %v2513_v54 }
 0x9aa   : > { %v2515_v55 = vpop.xlane.xlu0 %2514 }
 0x9ab   : > { %v2516_v56 = vmul.f32 0.03125, %v2515_v55 }
 0x9ad   : > { %v2517_v58 = vadd.f32 1e-05, %v2516_v56 }
 0x9af   : > { %3005 = vrsqrt.f32 %v2517_v58 }
 0x9b9   : > { %v3006_v59 = vpop.eup %3005 }
 0x9ba   : > { %v2519_v61 = vmul.f32 %v3006_v59, %v2511_v53 }
 0x9bc   : > { %v2526_v0 = vmul.f32 %v2679_v60, %v2519_v61 }
 0x9be   : > { %v2533_v1 = vadd.f32 %v2680_v62, %v2526_v0 }
 0x9c0   : > { %2534 = vst.msk [vmem:[%s562_s18] sm:$0xff] %vm593_vm1, %v2533_v1 }
 0x9c1   : > { %3020 = shalt.err (!%p3017_p5)
}
 0x9c2   : > { %s3021_s30 = scalar_lea.hbm %s3639_s17, 128  ;;  %s3025_s18 = scalar_lea.hbm %s3703_s16, 256 }
 0x9c3   : > { %p3022_p6 = scmp.ne.s32.totalorder %s3639_s17, %s3021_s30  ;;  %p3026_p10 = scmp.lt.u32.totalorder %s3639_s17, %s3703_s16 }
 0x9c4   : > { %p3027_p11 = scmp.lt.u32.totalorder %s3025_s18, %s3021_s30  ;;  %p3029_p13 = scmp.lt.u32.totalorder %s3021_s30, %s3639_s17 }
 0x9c5   : > { %p3023_p7 = pnand %p3022_p6, %p3224_p4 }
 0x9c6   : > { %p3028_p12 = por %p3027_p11, %p3026_p10 }
 0x9c7   : > { %p3024_p9 = pneg %p3023_p7 }
 0x9c8   : > { %p3030_p0 = por %p3029_p13, %p3028_p12 }
 0x9ca   : > { %p3031_p1 = pnand %p3030_p0, %p3024_p9 }
 0x9cc   : > { %3034 = shalt.err (!%p3031_p1)
}
 0x9cd   : > { %2911 = dma.vmem_to_hbm [thread:$0]  (%p3224_p4), %s3641_s25, 128, %s3639_s17, %s2536_s20  }
 0x9ce PF: > { %s3721_s2 = sld [smem:[#allocation9_spill]]  ;;  %p2917_p2 = scmp.ge.s32.totalorder %s3085_s26, 2 }
 0x9d0   : > { %p2914_p3 = pnand %p2917_p2, %p3231_p8 }
 0x9d4   : > { %s2562_s29 = sand.u32 1, %s3721_s2  }
 0x9d5   : > { %s2563_s19 = scalar_lea.sflag [#allocation7], %s2562_s29 }
 0x9d6   : > { %3060 = dma.done.wait (!%p2914_p3), %s2563_s19, 128  }
 0x9d7   : > { %3062 = vsyncadd (!%p2914_p3), %s2563_s19, 4294967168  ;;  %s29_s26 = sadd.s32 1, %s3085_s26   ;;  %s3723_s30 = sld [smem:[#allocation10_spill]] }
 0x9d8   : > { %p26_p5 = scmp.ge.s32.totalorder %s29_s26, 4   ;;  %s3724_s23 = sld [smem:[#allocation14_spill]] }
 0x9d9   : > { %s3725_s24 = sld [smem:[#allocation11_spill]]  ;;  %s3726_s25 = sld [smem:[#allocation12_spill]] }
 0x9da   : > { %s3727_s21 = smov %s3069_s22  ;;  %28 = sbr.rel (!%p26_p5) target bundleno = 7 (0x7), region = 130 }
 0x9dd   : > { %s3728_s22 = smov %s3723_s30 }
 0x9e1   :  { %2568 = vsyncpa [#allocation7], 1 }
 0x9e2   :  { %2570 = vsyncpa [#allocation7 + $0x1], 1 }

// kernel: _forward.3
= control target key start
LH: loop header
LB: loop body
LE: loop exit
PB: predicated region body
PF: predicated region fallthrough
CT: control target
= control target key end

     0   :  { %s3687_s0 = inlined_call_operand.vmem [shape: f32[2,8,32], index: 0, kind: input, shape index: {}, may-alias: {0,1}]   ;;  %s3688_s1 = inlined_call_operand.vmem [shape: f32[2,8,32], index: 1, kind: input, shape index: {}, may-alias: {0,1}]   ;;  %s3689_s2 = inlined_call_operand.vmem [shape: f32[32,32], index: 2, kind: input, shape index: {}]   ;;  %s3690_s3 = inlined_call_operand.vmem [shape: f32[32,64], index: 3, kind: input, shape index: {}]   ;;  %s3691_s4 = inlined_call_operand.vmem [shape: f32[1,32], index: 4, kind: input, shape index: {}]   ;;  %s3692_s5 = inlined_call_operand.vmem [shape: f32[1,64], index: 5, kind: input, shape index: {}]   ;;  %s3693_s6 = inlined_call_operand.vmem [shape: f32[4,8,32], index: 6, kind: input, shape index: {}]   ;;  %s3694_s7 = inlined_call_operand.vmem [shape: f32[1,32], index: 7, kind: input, shape index: {}]   ;;  %s3695_s8 = inlined_call_operand.vmem [shape: f32[32,128], index: 8, kind: input, shape index: {}]   ;;  %s3696_s9 = inlined_call_operand.vmem [shape: f32[1,128], index: 9, kind: input, shape index: {}]   ;;  %s3697_s10 = inlined_call_operand.vmem [shape: f32[128,32], index: 10, kind: input, shape index: {}]   ;;  %s3698_s11 = inlined_call_operand.vmem [shape: f32[1,32], index: 11, kind: input, shape index: {}]   ;;  %s3699_s12 = inlined_call_operand.vmem [shape: f32[1,32], index: 12, kind: input, shape index: {}]   ;;  %s3700_s13 = inlined_call_operand.vmem [shape: f32[1,32], index: 13, kind: input, shape index: {}]   ;;  %s3701_s14 = inlined_call_operand.vmem [shape: f32[1,32], index: 14, kind: input, shape index: {}]   ;;  %s3702_s15 = inlined_call_operand.vmem [shape: f32[1,32], index: 15, kind: input, shape index: {}]   ;;  %s3703_s16 = inlined_call_operand.hbm [shape: f32[2,8,32], index: 16, kind: output, shape index: {}]  }
   0x1   :  { %3709 = sst [smem:[#allocation15_spill]] %s3687_s0 }
   0x2   :  { %3710 = sst [smem:[#allocation16_spill]] %s3689_s2 }
   0x3   :  { %21 = vsyncpa [#allocation7], 0 }
   0x4   :  { %23 = vsyncpa [#allocation7 + $0x1], 0  ;;  %s3184_s21 = smov 0   ;;  %s3186_s22 = smov 0  }
   0x5   :  { %s3188_s23 = smov 0   ;;  %s3190_s24 = smov 0  }
   0x6   :  { %s3192_s25 = smov 0   ;;  %s3194_s26 = smov 0  }
   0x7 LB: > { %3711 = sst [smem:[#allocation9_spill]] %s3065_s21  ;;  %s2639_s27 = sadd.s32 4294967295, %s3085_s26   ;;  %s3085_s26 = sphi %s3194_s26, %s29_s26   ;;  %s3081_s25 = sphi %s3192_s25, %s3726_s25   ;;  %s3077_s24 = sphi %s3190_s24, %s3725_s24   ;;  %s3073_s23 = sphi %s3188_s23, %s3724_s23   ;;  %s3069_s22 = sphi %s3186_s22, %s3728_s22   ;;  %s3065_s21 = sphi %s3184_s21, %s3727_s21  }
   0x8   : > { %3712 = sst [smem:[#allocation10_spill]] %s3073_s23  ;;  %s2640_s28 = sadd.s32 4294967294, %s3085_s26  }
   0x9   : > { %3713 = sst [smem:[#allocation11_spill]] %s3081_s25  ;;  %s48_s29 = sadd.s32 1, %s3081_s25 }
   0xa   : > { %s407_s30 = sadd.s32 1, %s3073_s23  ;;  %p50_p0 = scmp.ge.s32.totalorder %s48_s29, 2 }
   0xb   : > { %p417_p1 = scmp.ne.s32.totalorder %s3073_s23, %s3069_s22  ;;  %p418_p2 = scmp.eq.s32.totalorder %s2639_s27, 1 }
   0xc   : > { %p423_p3 = scmp.ne.s32.totalorder %s3069_s22, %s3065_s21  ;;  %s3730_s29 = smov (%p50_p0, %s48_s29), 0 }
   0xd   : > { %3714 = sst [smem:[#allocation12_spill]] %s3730_s29  ;;  %p3224_p4 = por %p418_p2, %p417_p1 }
   0xe   : > { %p424_p5 = scmp.eq.s32.totalorder %s2640_s28, 1  ;;  %s402_s17 = ssub.s32 %s3081_s25, %s3730_s29 }
   0xf   : > { %p2643_p6 = scmp.ge.s32.totalorder %s3085_s26, 1  ;;  %p405_p7 = scmp.eq.s32.totalorder %s402_s17, 0 }
  0x10   : > { %p3231_p8 = por %p424_p5, %p423_p3  ;;  %p504_p9 = scmp.lt.s32.totalorder %s3085_s26, 3 }
  0x11   : > { %s3237_s19 = scalar_select %p405_p7, %s3073_s23, %s407_s30  }
  0x12   : > { %s3716_s18 = scalar_select %p3231_p8, 1, 0 }
  0x13   : > { %3718 = sst [smem:[#allocation14_spill]] %s3237_s19  ;;  %p505_p10 = pnand %p2643_p6, %p504_p9 }
  0x14   : > { %3717 = sst [smem:[#allocation13_spill]] %s3716_s18  ;;  %s3719_s2 = sld [smem:[#allocation16_spill]] (!%p505_p10)  ;;  %v3087_v3 = vmov (!%p505_p10), 0.0|0.0   ;;  %vm3088_vm0 = vmmov (!%p505_p10), 0   ;;  %v3089_v6 = vmov (!%p505_p10), 0.0   ;;  %v832_v8 = vld [vmem:[%s3690_s3] sm:$0xff] (!%p505_p10)  ;;  %v682_v26 = vlaneseq (!%p505_p10) }
  0x15   : > { %508 = sbr.rel (%p505_p10) target bundleno = 2510 (0x9ce), region = 84  ;;  %2869 = vmatprep.subr.bf16.mxu0 (!%p505_p10), %v3087_v3  ;;  %2749 = vmatprep.mubr.msk.f32.mxu0 (!%p505_p10), %vm3088_vm0, %v3089_v6  ;;  %p563_p11 = scmp.lt.s32.totalorder (!%p505_p10), %s3077_s24, 1  ;;  %v833_v9 = vld [vmem:[%s3690_s3 + $0x8] sm:$0xff] (!%p505_p10)  ;;  %vm593_vm1 = vcmask (!%p505_p10), 261120   ;;  %v834_v12 = vld [vmem:[%s3690_s3 + $0x10] sm:$0xff] (!%p505_p10)  ;;  %v835_v13 = vld [vmem:[%s3690_s3 + $0x18] sm:$0xff] (!%p505_p10) }
  0x16   : > { %2778 = vmatprep.subr.mxu1 (!%p505_p10), %v3089_v6  ;;  %2780 = vmatprep.mubr.msk.f32.mxu1 (!%p505_p10), %vm3088_vm0, %v3089_v6  ;;  %v2876_v11 = vpack.c.bf16 (!%p505_p10), %v833_v9, %v832_v8  ;;  %v2879_v14 = vpack.c.bf16 (!%p505_p10), %v835_v13, %v834_v12  ;;  %vm813_vm2 = vcmask (!%p505_p10), 64512   ;;  %v2647_v16 = vld [vmem:[%s3691_s4] ss:$0 sm:$0xff] (!%p505_p10)  ;;  %s3090_s25 = smov (!%p505_p10), 120   ;;  %s3091_s27 = smov (!%p505_p10), 104   ;;  %v683_v30 = vshrl.u32 (!%p505_p10), %v682_v26, 7 }
  0x17   : > { %827 = vst.msk [vmem:[#allocation5] sm:$0xff] (!%p505_p10), %vm813_vm2, %v3089_v6  ;;  %828 = vst.msk [vmem:[#allocation5 + $0x8] sm:$0xff] (!%p505_p10), %vm813_vm2, %v3089_v6  ;;  %v2651_v20 = vld [vmem:[%s3692_s5] ss:$0 sm:$0xff] (!%p505_p10)  ;;  %s3092_s30 = smov (!%p505_p10), 112   ;;  %vm818_vm3 = vcmask (!%p505_p10), 7168  }
  0x18   : > { %829 = vst.msk [vmem:[#allocation5 + $0x10] sm:$0xff] (!%p505_p10), %vm813_vm2, %v3089_v6  ;;  %830 = vst.msk [vmem:[#allocation5 + $0x18] sm:$0xff] (!%p505_p10), %vm813_vm2, %v3089_v6  ;;  %v3093_v24 = vmov (!%p505_p10), 1983009808   ;;  %v3094_v27 = vmov (!%p505_p10), 1934713408  }
  0x19   : > { %v680_v25 = vunpack.c.l.s4 (!%p505_p10), %v3093_v24  ;;  %v712_v28 = vunpack.c.l.s4 (!%p505_p10), %v3094_v27  ;;  %823 = vst.msk [vmem:[#allocation4] sm:$0xff] (!%p505_p10), %vm818_vm3, %v3089_v6  ;;  %824 = vst.msk [vmem:[#allocation4 + $0x8] sm:$0xff] (!%p505_p10), %vm818_vm3, %v3089_v6  ;;  %s3097_s29 = smov (!%p505_p10), 96   ;;  %s2682_s23 = sshll.u32 (!%p505_p10), %s3077_s24, 7 }
  0x1a   : > { %v582_v0 = vld [vmem:[%s3719_s2] sm:$0xff] (!%p505_p10)  ;;  %v583_v1 = vld [vmem:[%s3719_s2 + $0x8] sm:$0xff] (!%p505_p10)  ;;  %v584_v2 = vld [vmem:[%s3719_s2 + $0x10] sm:$0xff] (!%p505_p10)  ;;  %825 = vst.msk [vmem:[#allocation4 + $0x10] sm:$0xff] (!%p505_p10), %vm818_vm3, %v3089_v6  ;;  %s3639_s17 = scalar_lea.hbm (!%p505_p10), %s3703_s16, %s2682_s23 }
  0x1b   : > { %v2870_v4 = vpack.c.bf16 (!%p505_p10), %v583_v1, %v582_v0  ;;  %v585_v5 = vld [vmem:[%s3719_s2 + $0x18] sm:$0xff] (!%p505_p10)  ;;  %s3720_s2 = sld [smem:[#allocation15_spill]] (!%p505_p10)  ;;  %v681_v29 = vunpack.c.0.s8 (!%p505_p10), %v680_v25  ;;  %v713_v33 = vunpack.c.0.s8 (!%p505_p10), %v712_v28  ;;  %826 = vst.msk [vmem:[#allocation4 + $0x18] sm:$0xff] (!%p505_p10), %vm818_vm3, %v3089_v6 }
  0x1c   : > { %v2873_v7 = vpack.c.bf16 %v585_v5, %v584_v2  ;;  %s564_s21 = scalar_select %p563_p11, %s3077_s24, 1 }
  0x1d   : > { %2871 = vmatpush3.bf16.msra.mxu0 %v2870_v4  ;;  %v3309_v34 = vsub.s32 %v681_v29, %v683_v30  ;;  %v3311_v40 = vsub.s32 %v713_v33, %v683_v30  ;;  %s3098_s24 = smov [#allocation6]  }
  0x1e   : > { %2872 = vmatprep.subr.bf16.mxu0 %v3087_v3  ;;  %s2645_s28 = sshll.u32 %s564_s21, 3 }
  0x1f   : > { %s576_s21 = scalar_lea.vmem %s3688_s1, %s2645_s28 }
  0x20   : > { %v831_v15 = vld [vmem:[%s576_s21] sm:$0xff] }
  0x21   : > { %s569_s19 = scalar_lea.vmem %s3720_s2, %s2645_s28  ;;  %2874 = vmatpush3.bf16.msra.mxu0 %v2873_v7 }
  0x22   : > { %v3269_v10 = vld [vmem:[%s569_s19] sm:$0xff]  ;;  %2875 = vmatprep.subr.bf16.mxu0 %v3087_v3 }
  0x24   : > { %2750 = vmatmul.mubr.msk.f32.vlgmr.msra.gmra.mrb[0].mxu0 %vm593_vm1, %v3269_v10 }
  0x25   : > { %2877 = vmatpush3.bf16.msra.mxu0 %v2876_v11  ;;  %2760 = vmatprep.mubr.msk.f32.mxu0 %vm3088_vm0, %v3089_v6 }
  0x26   : > { %2878 = vmatprep.subr.bf16.mxu0 %v3087_v3 }
  0x29   : > { %2880 = vmatpush3.bf16.msra.mxu0 %v2879_v14 }
  0x2a   : > { %2763 = vmatprep.subr.mxu0 %v3089_v6 }
  0x2c   : > { %2761 = vmatmul.mubr.msk.f32.vlgmr.msra.gmra.mrb[2].mxu0 %vm593_vm1, %v831_v15 }
  0x2d   : > { %2765 = vmatprep.mubr.msk.f32.mxu0 %vm3088_vm0, %v3089_v6 }
  0xf7   : > { %v663_v17 = vpop.f32.mrb[0].mxu0 }
  0xf8   : > { %v664_v18 = vadd.f32 %v2647_v16, %v663_v17  ;;  %v2751_v19 = vpop.f32.mrb[1].mxu0 }
  0xfa   : > { %668 = vrot.lane.b32.xlu0 %v664_v18, %s3090_s25  ;;  %674 = vrot.lane.b32.xlu1 %v664_v18, %s3091_s27 }
  0xfe   : > { %671 = vrot.lane.b32.xlu0 %v664_v18, %s3092_s30 }
  0xff   : > { %v913_v21 = vpop.f32.mrb[2].mxu0 }
 0x100   : > { %v3304_v22 = vadd.f32 %v2651_v20, %v913_v21  ;;  %v2762_v23 = vpop.f32.mrb[3].mxu0 }
 0x102   : > { %921 = vrot.lane.b32.xlu0 %v3304_v22, %s3092_s30  ;;  %918 = vrot.lane.b32.xlu1 %v3304_v22, %s3090_s25  ;;  %s560_s30 = sand.u32 1, %s3069_s22  }
 0x103   : > { %s2536_s20 = scalar_lea.sflag [#allocation7], %s560_s30 }
 0x106   : > { %924 = vrot.lane.b32.xlu1 %v3304_v22, %s3091_s27 }
 0x16c   : > { %v669_v31 = vpop.permute.xlu0 %668  ;;  %v675_v32 = vpop.permute.xlu1 %674 }
 0x16d   : > { %v693_v35 = vcombine.low %v669_v31, %v675_v32  ;;  %v694_v36 = vcombine.high %v669_v31, %v675_v32 }
 0x16f   : > { %v701_v41 = vrot.slane %v693_v35, %v3309_v34  ;;  %v708_v42 = vrot.slane %v694_v36, %v3309_v34 }
 0x170   : > { %v672_v37 = vpop.permute.xlu0 %671 }
 0x171   : > { %v677_v38 = vcombine.low %v664_v18, %v672_v37  ;;  %v678_v39 = vcombine.high %v664_v18, %v672_v37 }
 0x173   : > { %v685_v43 = vrot.slane %v677_v38, %v3309_v34  ;;  %v692_v44 = vrot.slane %v678_v39, %v3309_v34 }
 0x174   : > { %v3317_v45 = vpop.permute.xlu1 %918  ;;  %v3319_v50 = vpop.permute.xlu0 %921 }
 0x175   : > { %v709_v46 = vcombine.low %v685_v43, %v701_v41  ;;  %v710_v47 = vcombine.high %v685_v43, %v701_v41  ;;  %v725_v48 = vcombine.low %v692_v44, %v708_v42  ;;  %v726_v49 = vcombine.high %v692_v44, %v708_v42 }
 0x176   : > { %v927_v55 = vcombine.low %v3304_v22, %v3319_v50  ;;  %v928_v56 = vcombine.high %v3304_v22, %v3319_v50 }
 0x177   : > { %v717_v51 = vrot.slane %v709_v46, %v3311_v40  ;;  %v724_v52 = vrot.slane %v710_v47, %v3311_v40  ;;  %v733_v53 = vrot.slane %v725_v48, %v3311_v40  ;;  %v740_v54 = vrot.slane %v726_v49, %v3311_v40 }
 0x178   : > { %v3329_v57 = vpop.permute.xlu1 %924  ;;  %v935_v5 = vrot.slane %v927_v55, %v3309_v34  ;;  %v942_v7 = vrot.slane %v928_v56, %v3309_v34 }
 0x179   : > { %v745_v58 = vcombine.low %v717_v51, %v724_v52  ;;  %v2649_v59 = vcombine.high %v717_v51, %v724_v52  ;;  %v761_v60 = vcombine.low %v733_v53, %v740_v54  ;;  %v2650_v61 = vcombine.high %v733_v53, %v740_v54 }
 0x17a   : > { %v943_v62 = vcombine.low %v3317_v45, %v3329_v57  ;;  %v944_v63 = vcombine.high %v3317_v45, %v3329_v57 }
 0x17b   : > { %v752_v0 = vrot.slane %v745_v58, %v3309_v34  ;;  %v760_v1 = vrot.slane %v2649_v59, %v3309_v34  ;;  %v768_v2 = vrot.slane %v761_v60, %v3309_v34  ;;  %v776_v4 = vrot.slane %v2650_v61, %v3309_v34 }
 0x17c   : > { %v951_v8 = vrot.slane %v943_v62, %v3309_v34  ;;  %v958_v9 = vrot.slane %v944_v63, %v3309_v34  ;;  %v3095_v61 = vmov -inf  }
 0x17d   : > { %v777_v11 = vcombine.low %v752_v0, %v760_v1  ;;  %v778_v12 = vcombine.high %v752_v0, %v760_v1  ;;  %v793_v13 = vcombine.low %v768_v2, %v776_v4  ;;  %v794_v14 = vcombine.high %v768_v2, %v776_v4  ;;  %819 = vst.msk [vmem:[#allocation3] sm:$0xff] %vm818_vm3, %v3095_v61 }
 0x17e   : > { %v959_v15 = vcombine.low %v935_v5, %v951_v8  ;;  %v960_v16 = vcombine.high %v935_v5, %v951_v8  ;;  %v975_v17 = vcombine.low %v942_v7, %v958_v9  ;;  %v976_v18 = vcombine.high %v942_v7, %v958_v9  ;;  %820 = vst.msk [vmem:[#allocation3 + $0x8] sm:$0xff] %vm818_vm3, %v3095_v61 }
 0x17f   : > { %v785_v19 = vrot.slane %v777_v11, %v3311_v40  ;;  %v792_v20 = vrot.slane %v778_v12, %v3311_v40  ;;  %v801_v21 = vrot.slane %v793_v13, %v3311_v40  ;;  %v808_v23 = vrot.slane %v794_v14, %v3311_v40  ;;  %821 = vst.msk [vmem:[#allocation3 + $0x10] sm:$0xff] %vm818_vm3, %v3095_v61 }
 0x180   : > { %v967_v24 = vrot.slane %v959_v15, %v3311_v40  ;;  %v974_v25 = vrot.slane %v960_v16, %v3311_v40  ;;  %v983_v26 = vrot.slane %v975_v17, %v3311_v40  ;;  %v990_v27 = vrot.slane %v976_v18, %v3311_v40  ;;  %822 = vst.msk [vmem:[#allocation3 + $0x18] sm:$0xff] %vm818_vm3, %v3095_v61 }
 0x181   : > { %v809_v28 = vcombine.low %v785_v19, %v801_v21  ;;  %v810_v29 = vcombine.high %v785_v19, %v801_v21  ;;  %v811_v30 = vcombine.low %v792_v20, %v808_v23  ;;  %v812_v31 = vcombine.high %v792_v20, %v808_v23 }
 0x182   : > { %v995_v32 = vcombine.low %v967_v24, %v974_v25  ;;  %v2653_v33 = vcombine.high %v967_v24, %v974_v25  ;;  %v1011_v35 = vcombine.low %v983_v26, %v990_v27  ;;  %v2654_v36 = vcombine.high %v983_v26, %v990_v27 }
 0x183   : > { %814 = vst.msk [vmem:[#allocation2] sm:$0xff] %vm813_vm2, %v809_v28  ;;  %815 = vst.msk [vmem:[#allocation2 + $0x8] sm:$0xff] %vm813_vm2, %v810_v29  ;;  %v3096_v13 = vmov 0  }
 0x184   : > { %816 = vst.msk [vmem:[#allocation2 + $0x10] sm:$0xff] %vm813_vm2, %v811_v30  ;;  %817 = vst.msk [vmem:[#allocation2 + $0x18] sm:$0xff] %vm813_vm2, %v812_v31  ;;  %v1002_v37 = vrot.slane %v995_v32, %v3309_v34  ;;  %v1010_v38 = vrot.slane %v2653_v33, %v3309_v34  ;;  %v1018_v39 = vrot.slane %v1011_v35, %v3309_v34  ;;  %2977 = vset.pattern.permute.xlu1 %v3096_v13  ;;  %v3405_v14 = vld [vmem:[#allocation3] sm:$0xff] }
 0x185   : > { %v1026_v41 = vrot.slane %v2654_v36, %v3309_v34  ;;  %2978 = vset.pattern.permute.xlu0 %v3096_v13  ;;  %v3410_v17 = vld [vmem:[#allocation3 + $0x8] sm:$0xff] }
 0x186   : > { %v1027_v42 = vcombine.low %v1002_v37, %v1010_v38  ;;  %v1028_v44 = vcombine.high %v1002_v37, %v1010_v38  ;;  %v3420_v21 = vld [vmem:[#allocation3 + $0x10] sm:$0xff] }
 0x187   : > { %v1043_v43 = vcombine.low %v1018_v39, %v1026_v41  ;;  %v1044_v46 = vcombine.high %v1018_v39, %v1026_v41  ;;  %v3431_v26 = vld [vmem:[#allocation3 + $0x18] sm:$0xff] }
 0x188   : > { %v1035_v47 = vrot.slane %v1027_v42, %v3311_v40  ;;  %v1042_v49 = vrot.slane %v1028_v44, %v3311_v40 }
 0x189   : > { %v1051_v48 = vrot.slane %v1043_v43, %v3311_v40  ;;  %v1058_v51 = vrot.slane %v1044_v46, %v3311_v40 }
 0x18a   : > { %v1211_v54 = vld [vmem:[#allocation2] sm:$0xff]  ;;  %v1212_v59 = vld [vmem:[#allocation2 + $0x8] sm:$0xff] }
 0x18b   : > { %v1059_v52 = vcombine.low %v1035_v47, %v1051_v48  ;;  %v1062_v53 = vcombine.high %v1042_v49, %v1058_v51  ;;  %v1214_v55 = vld [vmem:[#allocation2 + $0x18] sm:$0xff]  ;;  %v1060_v56 = vcombine.high %v1035_v47, %v1051_v48  ;;  %v1061_v58 = vcombine.low %v1042_v49, %v1058_v51  ;;  %v1213_v60 = vld [vmem:[#allocation2 + $0x10] sm:$0xff] }
 0x18d   : > { %2764 = vmatpush3.xpose.msk.msra.mxu0 %vm813_vm2, %v1059_v52  ;;  %2779 = vmatpush3.xpose.msk.msra.mxu1 %vm813_vm2, %v1062_v53 }
 0x18e   : > { %2768 = vmatprep.subr.mxu0 %v3089_v6  ;;  %2788 = vmatprep.subr.mxu1 %v3089_v6 }
 0x190   : > { %2766 = vmatmul.mubr.msk.f32.vlgmr.msra.gmra.mrb[4].mxu0 %vm813_vm2, %v1211_v54  ;;  %2781 = vmatmul.mubr.msk.f32.vlgmr.msra.gmra.mrb[0].mxu1 %vm813_vm2, %v1214_v55 }
 0x191   : > { %2769 = vmatpush3.xpose.msk.msra.mxu0 %vm813_vm2, %v1060_v56  ;;  %2770 = vmatprep.mubr.msk.f32.mxu0 %vm3088_vm0, %v3089_v6 }
 0x192   : > { %2773 = vmatprep.subr.mxu0 %v3089_v6  ;;  %2790 = vmatprep.mubr.msk.f32.mxu1 %vm3088_vm0, %v3089_v6 }
 0x194   : > { %2771 = vmatmul.mubr.msk.f32.vlgmr.msra.gmra.mrb[6].mxu0 %vm813_vm2, %v1212_v59 }
 0x195   : > { %2774 = vmatpush3.xpose.msk.msra.mxu0 %vm813_vm2, %v1061_v58  ;;  %2775 = vmatprep.mubr.msk.f32.mxu0 %vm3088_vm0, %v3089_v6 }
 0x196   : > { %2783 = vmatprep.subr.mxu0 %v3089_v6 }
 0x198   : > { %2776 = vmatmul.mubr.msk.f32.vlgmr.msra.gmra.mrb[8].mxu0 %vm813_vm2, %v1213_v60 }
 0x199   : > { %2785 = vmatprep.mubr.msk.f32.mxu0 %vm3088_vm0, %v3089_v6 }
 0x263   : > { %v1288_v62 = vpop.f32.mrb[4].mxu0  ;;  %v3395_v63 = vpop.f32.mrb[0].mxu1 }
 0x264   : > { %v2767_v0 = vpop.f32.mrb[5].mxu0  ;;  %v2782_v1 = vpop.f32.mrb[1].mxu1  ;;  %v1524_v2 = vsel %vm813_vm2, %v1288_v62, -inf  ;;  %v1533_v12 = vsel %vm813_vm2, %v3395_v63, -inf }
 0x265   : > { %1525 = vmax.xlane.f32.xlu0 %v1524_v2 }
 0x267   : > { %v1364_v4 = vpop.f32.mrb[6].mxu0 }
 0x268   : > { %v2772_v5 = vpop.f32.mrb[7].mxu0  ;;  %v1527_v7 = vsel %vm813_vm2, %v1364_v4, -inf }
 0x269   : > { %1528 = vmax.xlane.f32.xlu1 %v1527_v7 }
 0x26b   : > { %v3399_v8 = vpop.f32.mrb[8].mxu0 }
 0x26c   : > { %v2777_v9 = vpop.f32.mrb[9].mxu0  ;;  %v1530_v11 = vsel %vm813_vm2, %v3399_v8, -inf }
 0x26d   : > { %1531 = vmax.xlane.f32.xlu0 %v1530_v11 }
 0x271   : > { %1534 = vmax.xlane.f32.xlu0 %v1533_v12 }
 0x2f2   : > { %v1526_v15 = vpop.xlane.xlu0 %1525 }
 0x2f3   : > { %v3408_v16 = vmax.f32 %v3405_v14, %v1526_v15 }
 0x2f5   : > { %v1540_v18 = vsub.f32 %v3405_v14, %v3408_v16  ;;  %1941 = vst.msk [vmem:[#allocation3] sm:$0xff] %vm818_vm3, %v3408_v16  ;;  %1554 = vperm.xlu1 %2977, %v3408_v16  }
 0x2f6   : > { %v1529_v19 = vpop.xlane.xlu1 %1528 }
 0x2f7   : > { %v3418_v20 = vmax.f32 %v3410_v17, %v1529_v19 }
 0x2f9   : > { %v1541_v23 = vsub.f32 %v3410_v17, %v3418_v20  ;;  %1942 = vst.msk [vmem:[#allocation3 + $0x8] sm:$0xff] %vm818_vm3, %v3418_v20  ;;  %1063 = vrot.lane.b32.xlu1 %v3304_v22, %s3097_s29  ;;  %1559 = vperm.xlu0 %2978, %v3418_v20  }
 0x2fa   : > { %v1532_v24 = vpop.xlane.xlu0 %1531 }
 0x2fb   : > { %v3429_v25 = vmax.f32 %v3420_v21, %v1532_v24 }
 0x2fd   : > { %v1542_v27 = vsub.f32 %v3420_v21, %v3429_v25  ;;  %1943 = vst.msk [vmem:[#allocation3 + $0x10] sm:$0xff] %vm818_vm3, %v3429_v25  ;;  %1065 = vrot.lane.b32.xlu1 %v3317_v45, %s3097_s29  ;;  %v1584_v21 = vld [vmem:[#allocation4] sm:$0xff] }
 0x2fe   : > { %v1535_v28 = vpop.xlane.xlu0 %1534 }
 0x2ff   : > { %v3439_v29 = vmax.f32 %v3431_v26, %v1535_v28  ;;  %v1548_v14 = vmul.f32 1.442695, %v1542_v27 }
 0x301   : > { %v1543_v22 = vsub.f32 %v3431_v26, %v3439_v29  ;;  %1944 = vst.msk [vmem:[#allocation3 + $0x18] sm:$0xff] %vm818_vm3, %v3439_v29  ;;  %1067 = vrot.lane.b32.xlu1 %v3319_v50, %s3097_s29 }
 0x303   : > { %v1550_v16 = vmul.f32 1.442695, %v1543_v22 }
 0x305   : > { %1069 = vrot.lane.b32.xlu1 %v3329_v57, %s3097_s29  ;;  %s2644_s29 = sshll.u32 %s560_s30, 3 }
 0x306   : > { %s562_s18 = scalar_lea.vmem [#allocation6], %s2644_s29  ;;  %s3011_s29 = sshll.u32 %s3098_s24, 4  ;;  %s3012_s29 = int_to_ptr.vmem [resolvable:$false] %s3011_s29 }
 0x307   : > { %s2550_s25 = sshll.u32 %s562_s18, 4  ;;  %s3013_s19 = scalar_lea.vmem %s3012_s29, 256  ;;  %s3641_s25 = int_to_ptr.vmem [resolvable:$true] %s2550_s25 }
 0x308   : > { %s3007_s2 = scalar_lea.vmem %s3641_s25, 128  ;;  %p3014_p1 = scmp.lt.s32.totalorder %s3641_s25, %s3012_s29 }
 0x309   : > { %1564 = vperm.xlu1 %2977, %v3429_v25   ;;  %p3008_p12 = scmp.ne.s32.totalorder %s3641_s25, %s3007_s2  ;;  %p3015_p2 = scmp.lt.s32.totalorder %s3013_s19, %s3007_s2 }
 0x30b   : > { %p3009_p13 = pnand %p3008_p12, %p3224_p4  ;;  %p3016_p3 = por %p3015_p2, %p3014_p1 }
 0x30d   : > { %1569 = vperm.xlu1 %2977, %v3439_v29   ;;  %p3010_p0 = pneg %p3009_p13 }
 0x30f   : > { %p3017_p5 = pnand %p3016_p3, %p3010_p0 }
 0x374   : > { %v1555_v30 = vpop.permute.xlu1 %1554 }
 0x375   : > { %v1572_v45 = vsub.f32 %v1288_v62, %v1555_v30 }
 0x377   : > { %v1576_v31 = vmul.f32 1.442695, %v1572_v45 }
 0x378   : > { %v1064_v32 = vpop.permute.xlu1 %1063  ;;  %v1560_v33 = vpop.permute.xlu0 %1559 }
 0x379   : > { %2979 = vpow2.f32 %v1576_v31  ;;  %v1573_v35 = vsub.f32 %v1364_v4, %v1560_v33 }
 0x37b   : > { %v1578_v36 = vmul.f32 1.442695, %v1573_v35 }
 0x37c   : > { %v1066_v37 = vpop.permute.xlu1 %1065 }
 0x37d   : > { %2981 = vpow2.f32 %v1578_v36 }
 0x380   : > { %v1068_v38 = vpop.permute.xlu1 %1067 }
 0x381   : > { %v1075_v41 = vcombine.low %v1064_v32, %v1068_v38  ;;  %v1076_v50 = vcombine.high %v1064_v32, %v1068_v38 }
 0x383   : > { %v2980_v39 = vpop.eup %2979  ;;  %v1083_v47 = vrot.slane %v1075_v41, %v3309_v34  ;;  %v1090_v48 = vrot.slane %v1076_v50, %v3309_v34 }
 0x384   : > { %v1070_v42 = vpop.permute.xlu1 %1069  ;;  %v1592_v57 = vsel %vm813_vm2, %v2980_v39, 0.0 }
 0x385   : > { %v1091_v43 = vcombine.low %v1066_v37, %v1070_v42  ;;  %v1092_v44 = vcombine.high %v1066_v37, %v1070_v42  ;;  %1593 = vadd.xlane.f32.xlu1 %v1592_v57 }
 0x387   : > { %v2982_v46 = vpop.eup %2981  ;;  %v1099_v49 = vrot.slane %v1091_v43, %v3309_v34  ;;  %v1106_v51 = vrot.slane %v1092_v44, %v3309_v34 }
 0x388   : > { %v1565_v52 = vpop.permute.xlu1 %1564  ;;  %v1595_v53 = vsel %vm813_vm2, %v2982_v46, 0.0 }
 0x389   : > { %v1107_v54 = vcombine.low %v1083_v47, %v1099_v49  ;;  %v1108_v55 = vcombine.high %v1083_v47, %v1099_v49  ;;  %v1123_v56 = vcombine.low %v1090_v48, %v1106_v51  ;;  %v1124_v58 = vcombine.high %v1090_v48, %v1106_v51  ;;  %1596 = vadd.xlane.f32.xlu0 %v1595_v53  ;;  %v1586_v47 = vld [vmem:[#allocation4 + $0x10] sm:$0xff] }
 0x38a   : > { %v1574_v59 = vsub.f32 %v3399_v8, %v1565_v52  ;;  %v1587_v52 = vld [vmem:[#allocation4 + $0x18] sm:$0xff] }
 0x38b   : > { %v1115_v60 = vrot.slane %v1107_v54, %v3311_v40  ;;  %v1122_v61 = vrot.slane %v1108_v55, %v3311_v40  ;;  %v1131_v62 = vrot.slane %v1123_v56, %v3311_v40  ;;  %v1138_v0 = vrot.slane %v1124_v58, %v3311_v40  ;;  %v1984_v54 = vld [vmem:[%s3693_s6] sm:$0xff] }
 0x38c   : > { %v1580_v1 = vmul.f32 1.442695, %v1574_v59  ;;  %v1570_v2 = vpop.permute.xlu1 %1569 }
 0x38d   : > { %v1143_v4 = vcombine.low %v1115_v60, %v1122_v61  ;;  %v2655_v5 = vcombine.high %v1115_v60, %v1122_v61  ;;  %v1159_v7 = vcombine.low %v1131_v62, %v1138_v0  ;;  %v2656_v9 = vcombine.high %v1131_v62, %v1138_v0  ;;  %v1985_v60 = vld [vmem:[%s3693_s6 + $0x8] sm:$0xff] }
 0x38e   : > { %2983 = vpow2.f32 %v1580_v1  ;;  %v1575_v11 = vsub.f32 %v3395_v63, %v1570_v2 }
 0x38f   : > { %v1150_v12 = vrot.slane %v1143_v4, %v3309_v34  ;;  %v1158_v8 = vrot.slane %v2655_v5, %v3309_v34  ;;  %v1166_v13 = vrot.slane %v1159_v7, %v3309_v34  ;;  %v1174_v15 = vrot.slane %v2656_v9, %v3309_v34  ;;  %v1613_v5 = vld [vmem:[#allocation5] sm:$0xff]  ;;  %v1614_v7 = vld [vmem:[#allocation5 + $0x8] sm:$0xff] }
 0x390   : > { %v1582_v19 = vmul.f32 1.442695, %v1575_v11 }
 0x391   : > { %v1175_v24 = vcombine.low %v1150_v12, %v1158_v8  ;;  %v1191_v28 = vcombine.low %v1166_v13, %v1174_v15  ;;  %v1176_v30 = vcombine.high %v1150_v12, %v1158_v8  ;;  %v1192_v45 = vcombine.high %v1166_v13, %v1174_v15  ;;  %v1615_v13 = vld [vmem:[#allocation5 + $0x10] sm:$0xff] }
 0x392   : > { %2985 = vpow2.f32 %v1582_v19 }
 0x393   : > { %v1183_v31 = vrot.slane %v1175_v24, %v3311_v40  ;;  %v1199_v32 = vrot.slane %v1191_v28, %v3311_v40  ;;  %v1190_v63 = vrot.slane %v1176_v30, %v3311_v40  ;;  %v1206_v33 = vrot.slane %v1192_v45, %v3311_v40  ;;  %v1616_v24 = vld [vmem:[#allocation5 + $0x18] sm:$0xff] }
 0x395   : > { %v1207_v35 = vcombine.low %v1183_v31, %v1199_v32  ;;  %v1208_v36 = vcombine.high %v1183_v31, %v1199_v32  ;;  %v1209_v34 = vcombine.low %v1190_v63, %v1206_v33  ;;  %v1210_v41 = vcombine.high %v1190_v63, %v1206_v33 }
 0x397   : > { %2784 = vmatpush3.msra.mxu0 %v1207_v35  ;;  %2789 = vmatpush3.msra.mxu1 %v1208_v36 }
 0x398   : > { %v2984_v37 = vpop.eup %2983  ;;  %2786 = vmatmul.mubr.msk.f32.vlgmr.msra.gmra.mrb[10].mxu0 %vm813_vm2, %v2980_v39  ;;  %2791 = vmatmul.mubr.msk.f32.vlgmr.msra.gmra.mrb[2].mxu1 %vm813_vm2, %v2982_v46  ;;  %v1544_v39 = vmul.f32 1.442695, %v1540_v18  ;;  %v1546_v18 = vmul.f32 1.442695, %v1541_v23  ;;  %v1585_v46 = vld [vmem:[#allocation4 + $0x8] sm:$0xff] }
 0x399   : > { %2793 = vmatprep.subr.mxu0 %v3089_v6  ;;  %2798 = vmatprep.subr.mxu1 %v3089_v6  ;;  %v1598_v38 = vsel %vm813_vm2, %v2984_v37, 0.0 }
 0x39a   : > { %2794 = vmatpush3.msra.mxu0 %v1209_v34  ;;  %1599 = vadd.xlane.f32.xlu1 %v1598_v38  ;;  %2987 = vpow2.f32 %v1544_v39 }
 0x39b   : > { %2799 = vmatpush3.msra.mxu1 %v1210_v41  ;;  %2795 = vmatprep.mubr.msk.f32.mxu0 %vm3088_vm0, %v3089_v6  ;;  %2989 = vpow2.f32 %v1548_v14 }
 0x39c   : > { %v2986_v40 = vpop.eup %2985  ;;  %2800 = vmatprep.mubr.msk.f32.mxu1 %vm3088_vm0, %v3089_v6  ;;  %2796 = vmatmul.mubr.msk.f32.vlgmr.msra.gmra.mrb[12].mxu0 %vm813_vm2, %v2984_v37  ;;  %2991 = vpow2.f32 %v1550_v16 }
 0x39d   : > { %2801 = vmatmul.mubr.msk.f32.vlgmr.msra.gmra.mrb[4].mxu1 %vm813_vm2, %v2986_v40  ;;  %v1601_v50 = vsel %vm813_vm2, %v2986_v40, 0.0  ;;  %2803 = vmatprep.subr.mxu0 %v3089_v6  ;;  %2993 = vpow2.f32 %v1546_v18 }
 0x39e   : > { %1602 = vadd.xlane.f32.xlu0 %v1601_v50  ;;  %2805 = vmatprep.mubr.msk.f32.mxu0 %vm3088_vm0, %v3089_v6  ;;  %v1986_v50 = vld [vmem:[%s3693_s6 + $0x10] sm:$0xff] }
 0x39f   : > { %2808 = vmatprep.subr.mxu1 %v3089_v6  ;;  %2810 = vmatprep.mubr.msk.f32.mxu1 %vm3088_vm0, %v3089_v6 }
 0x3a0   : > { %2804 = vmatpush3.msra.mxu0 %v1984_v54  ;;  %2809 = vmatpush3.msra.mxu1 %v1985_v60 }
 0x3a1   : > { %2813 = vmatprep.subr.mxu0 %v3089_v6  ;;  %2818 = vmatprep.subr.mxu1 %v3089_v6 }
 0x3a4   : > { %v2988_v42 = vpop.eup %2987 }
 0x3a5   : > { %v2990_v57 = vpop.eup %2989  ;;  %v1588_v25 = vmul.f32 %v2988_v42, %v1584_v21 }
 0x3a6   : > { %v2992_v43 = vpop.eup %2991  ;;  %v1590_v48 = vmul.f32 %v2990_v57, %v1586_v47 }
 0x3a7   : > { %v2994_v44 = vpop.eup %2993  ;;  %v1591_v55 = vmul.f32 %v2992_v43, %v1587_v52 }
 0x3a8   : > { %v1589_v29 = vmul.f32 %v2994_v44, %v1585_v46 }
 0x3ab   : > { %1619 = vperm.xlu1 %2977, %v2988_v42   ;;  %v1987_v42 = vld [vmem:[%s3693_s6 + $0x18] sm:$0xff] }
 0x3af   : > { %1629 = vperm.xlu1 %2977, %v2990_v57  }
 0x3b3   : > { %1634 = vperm.xlu1 %2977, %v2992_v43  }
 0x3b4   : > { %1624 = vperm.xlu0 %2978, %v2994_v44  }
 0x412   : > { %v1594_v27 = vpop.xlane.xlu1 %1593 }
 0x413   : > { %v1604_v26 = vadd.f32 %v1594_v27, %v1588_v25 }
 0x415   : > { %1609 = vst.msk [vmem:[#allocation4] sm:$0xff] %vm818_vm3, %v1604_v26 }
 0x416   : > { %v1597_v17 = vpop.xlane.xlu0 %1596 }
 0x417   : > { %v1605_v20 = vadd.f32 %v1597_v17, %v1589_v29 }
 0x419   : > { %1610 = vst.msk [vmem:[#allocation4 + $0x8] sm:$0xff] %vm818_vm3, %v1605_v20 }
 0x41c   : > { %v1952_v23 = vld [vmem:[#allocation4] sm:$0xff] }
 0x41d   : > { %2995 = vrcp.f32 %v1952_v23 }
 0x420   : > { %v1953_v22 = vld [vmem:[#allocation4 + $0x8] sm:$0xff] }
 0x421   : > { %2997 = vrcp.f32 %v1953_v22 }
 0x427   : > { %v2996_v49 = vpop.eup %2995  ;;  %v1600_v51 = vpop.xlane.xlu1 %1599 }
 0x428   : > { %v1606_v53 = vadd.f32 %v1600_v51, %v1590_v48  ;;  %1962 = vperm.xlu0 %2978, %v2996_v49  }
 0x42a   : > { %1611 = vst.msk [vmem:[#allocation4 + $0x10] sm:$0xff] %vm818_vm3, %v1606_v53 }
 0x42b   : > { %v2998_v56 = vpop.eup %2997  ;;  %v1603_v58 = vpop.xlane.xlu0 %1602 }
 0x42c   : > { %v1607_v59 = vadd.f32 %v1603_v58, %v1591_v55  ;;  %1967 = vperm.xlu1 %2977, %v2998_v56   ;;  %v1620_v2 = vpop.permute.xlu1 %1619 }
 0x42d   : > { %v1637_v11 = vmul.f32 %v1620_v2, %v1613_v5  ;;  %v2326_v2 = vld [vmem:[%s3695_s8] sm:$0xff] }
 0x42e   : > { %1612 = vst.msk [vmem:[#allocation4 + $0x18] sm:$0xff] %vm818_vm3, %v1607_v59 }
 0x430   : > { %v1630_v4 = vpop.permute.xlu1 %1629 }
 0x431   : > { %v1954_v61 = vld [vmem:[#allocation4 + $0x10] sm:$0xff]  ;;  %v1639_v32 = vmul.f32 %v1630_v4, %v1615_v13  ;;  %v2327_v4 = vld [vmem:[%s3695_s8 + $0x8] sm:$0xff] }
 0x432   : > { %2999 = vrcp.f32 %v1954_v61  ;;  %v2882_v5 = vpack.c.bf16 %v2327_v4, %v2326_v2 }
 0x433   : > { %v1625_v9 = vpop.permute.xlu0 %1624 }
 0x434   : > { %v1635_v12 = vpop.permute.xlu1 %1634  ;;  %v1638_v8 = vmul.f32 %v1625_v9, %v1614_v7  ;;  %v2329_v7 = vld [vmem:[%s3695_s8 + $0x18] sm:$0xff] }
 0x435   : > { %v1955_v62 = vld [vmem:[#allocation4 + $0x18] sm:$0xff]  ;;  %v1640_v63 = vmul.f32 %v1635_v12, %v1616_v24  ;;  %v2412_v12 = vld [vmem:[%s3697_s10 + $0x8] sm:$0xff]  ;;  %v2415_v24 = vld [vmem:[%s3697_s10 + $0x20] sm:$0xff] }
 0x436   : > { %3001 = vrcp.f32 %v1955_v62 }
 0x43c   : > { %v3000_v0 = vpop.eup %2999 }
 0x43d   : > { %1972 = vperm.xlu0 %2978, %v3000_v0  }
 0x440   : > { %v3002_v1 = vpop.eup %3001 }
 0x441   : > { %1977 = vperm.xlu1 %2977, %v3002_v1  }
 0x46b   : > { %v1710_v15 = vpop.f32.mrb[10].mxu0  ;;  %v1783_v19 = vpop.f32.mrb[2].mxu1 }
 0x46c   : > { %v1933_v28 = vadd.f32 %v1710_v15, %v1637_v11  ;;  %v1934_v30 = vadd.f32 %v1783_v19, %v1638_v8  ;;  %v2787_v45 = vpop.f32.mrb[11].mxu0  ;;  %v2792_v31 = vpop.f32.mrb[3].mxu1  ;;  %v2411_v11 = vld [vmem:[%s3697_s10] sm:$0xff]  ;;  %v2413_v8 = vld [vmem:[%s3697_s10 + $0x10] sm:$0xff]  ;;  %v2414_v15 = vld [vmem:[%s3697_s10 + $0x18] sm:$0xff] }
 0x46d   : > { %v2888_v13 = vpack.c.bf16 %v2412_v12, %v2411_v11  ;;  %v2891_v19 = vpack.c.bf16 %v2414_v15, %v2413_v8  ;;  %v2417_v45 = vld [vmem:[%s3697_s10 + $0x30] sm:$0xff]  ;;  %v2418_v31 = vld [vmem:[%s3697_s10 + $0x38] sm:$0xff] }
 0x46e   : > { %1937 = vst.msk [vmem:[#allocation5] sm:$0xff] %vm813_vm2, %v1933_v28  ;;  %1938 = vst.msk [vmem:[#allocation5 + $0x8] sm:$0xff] %vm813_vm2, %v1934_v30  ;;  %v2416_v28 = vld [vmem:[%s3697_s10 + $0x28] sm:$0xff] }
 0x46f   : > { %v1856_v33 = vpop.f32.mrb[12].mxu0  ;;  %v2894_v30 = vpack.c.bf16 %v2416_v28, %v2415_v24 }
 0x470   : > { %v1935_v35 = vadd.f32 %v1856_v33, %v1639_v32  ;;  %v1929_v36 = vpop.f32.mrb[4].mxu1  ;;  %v2797_v37 = vpop.f32.mrb[13].mxu0  ;;  %v2897_v32 = vpack.c.bf16 %v2418_v31, %v2417_v45  ;;  %v2420_v33 = vld [vmem:[%s3697_s10 + $0x48] sm:$0xff] }
 0x471   : > { %v1936_v34 = vadd.f32 %v1929_v36, %v1640_v63  ;;  %v2802_v38 = vpop.f32.mrb[5].mxu1  ;;  %v2419_v63 = vld [vmem:[%s3697_s10 + $0x40] sm:$0xff]  ;;  %v2421_v36 = vld [vmem:[%s3697_s10 + $0x50] sm:$0xff]  ;;  %v2422_v37 = vld [vmem:[%s3697_s10 + $0x58] sm:$0xff] }
 0x472   : > { %1939 = vst.msk [vmem:[#allocation5 + $0x10] sm:$0xff] %vm813_vm2, %v1935_v35  ;;  %v2900_v35 = vpack.c.bf16 %v2420_v33, %v2419_v63  ;;  %v2423_v38 = vld [vmem:[%s3697_s10 + $0x60] sm:$0xff] }
 0x473   : > { %1940 = vst.msk [vmem:[#allocation5 + $0x18] sm:$0xff] %vm813_vm2, %v1936_v34  ;;  %v2903_v34 = vpack.c.bf16 %v2422_v37, %v2421_v36 }
 0x475   : > { %v1948_v40 = vld [vmem:[#allocation5] sm:$0xff]  ;;  %v1949_v16 = vld [vmem:[#allocation5 + $0x8] sm:$0xff] }
 0x479   : > { %v1950_v43 = vld [vmem:[#allocation5 + $0x10] sm:$0xff] }
 0x47a   : > { %v1951_v21 = vld [vmem:[#allocation5 + $0x18] sm:$0xff] }
 0x4a7   : > { %v1963_v41 = vpop.permute.xlu0 %1962 }
 0x4a8   : > { %v1980_v39 = vmul.f32 %v1963_v41, %v1948_v40  ;;  %v2424_v41 = vld [vmem:[%s3697_s10 + $0x68] sm:$0xff] }
 0x4a9   : > { %v2906_v40 = vpack.c.bf16 %v2424_v41, %v2423_v38 }
 0x4aa   : > { %2806 = vmatmul.mubr.msk.f32.vlgmr.msra.gmra.mrb[14].mxu0 %vm813_vm2, %v1980_v39 }
 0x4ab   : > { %v1968_v14 = vpop.permute.xlu1 %1967  ;;  %2814 = vmatpush3.msra.mxu0 %v1986_v50  ;;  %2815 = vmatprep.mubr.msk.f32.mxu0 %vm3088_vm0, %v3089_v6 }
 0x4ac   : > { %v1981_v18 = vmul.f32 %v1968_v14, %v1949_v16  ;;  %2881 = vmatprep.subr.bf16.mxu0 %v3087_v3 }
 0x4ae   : > { %2811 = vmatmul.mubr.msk.f32.vlgmr.msra.gmra.mrb[6].mxu1 %vm813_vm2, %v1981_v18  ;;  %v2674_v18 = vld [vmem:[%s3699_s12] ss:$0 sm:$0xff] }
 0x4af   : > { %2819 = vmatpush3.msra.mxu1 %v1987_v42  ;;  %2820 = vmatprep.mubr.msk.f32.mxu1 %vm3088_vm0, %v3089_v6 }
 0x4b0   : > { %2887 = vmatprep.subr.bf16.mxu1 %v3087_v3 }
 0x4bc   : > { %v1973_v57 = vpop.permute.xlu0 %1972 }
 0x4bd   : > { %v1982_v44 = vmul.f32 %v1973_v57, %v1950_v43  ;;  %v2675_v57 = vld [vmem:[%s3700_s13] ss:$0 sm:$0xff] }
 0x4bf   : > { %2816 = vmatmul.mubr.msk.f32.vlgmr.msra.gmra.mrb[16].mxu0 %vm813_vm2, %v1982_v44 }
 0x4c0   : > { %v1978_v25 = vpop.permute.xlu1 %1977  ;;  %2831 = vmatprep.mubr.msk.f32.mxu0 %vm3088_vm0, %v3089_v6  ;;  %2883 = vmatpush3.bf16.msra.mxu0 %v2882_v5 }
 0x4c1   : > { %v1983_v27 = vmul.f32 %v1978_v25, %v1951_v21  ;;  %2884 = vmatprep.subr.bf16.mxu0 %v3087_v3  ;;  %v2426_v21 = vld [vmem:[%s3697_s10 + $0x78] sm:$0xff] }
 0x4c3   : > { %2821 = vmatmul.mubr.msk.f32.vlgmr.msra.gmra.mrb[8].mxu1 %vm813_vm2, %v1983_v27  ;;  %v2676_v27 = vld [vmem:[%s3696_s9] ss:$0 sm:$0xff] }
 0x4c4   : > { %2866 = vmatprep.mubr.msk.f32.mxu1 %vm3088_vm0, %v3089_v6  ;;  %v2673_v6 = vld [vmem:[%s3694_s7] ss:$0 sm:$0xff]  ;;  %2889 = vmatpush3.bf16.msra.mxu1 %v2888_v13 }
 0x4c5   : > { %2890 = vmatprep.subr.bf16.mxu1 %v3087_v3 }
 0x4c8   : > { %2892 = vmatpush3.bf16.msra.mxu1 %v2891_v19 }
 0x4c9   : > { %2893 = vmatprep.subr.bf16.mxu1 %v3087_v3 }
 0x4cc   : > { %2895 = vmatpush3.bf16.msra.mxu1 %v2894_v30 }
 0x4cd   : > { %2896 = vmatprep.subr.bf16.mxu1 %v3087_v3 }
 0x4d0   : > { %2898 = vmatpush3.bf16.msra.mxu1 %v2897_v32 }
 0x4d1   : > { %2899 = vmatprep.subr.bf16.mxu1 %v3087_v3 }
 0x4d4   : > { %2901 = vmatpush3.bf16.msra.mxu1 %v2900_v35 }
 0x4d5   : > { %2902 = vmatprep.subr.bf16.mxu1 %v3087_v3 }
 0x4d8   : > { %2904 = vmatpush3.bf16.msra.mxu1 %v2903_v34 }
 0x4d9   : > { %2905 = vmatprep.subr.bf16.mxu1 %v3087_v3 }
 0x4dc   : > { %2907 = vmatpush3.bf16.msra.mxu1 %v2906_v40 }
 0x4dd   : > { %2908 = vmatprep.subr.bf16.mxu1 %v3087_v3  ;;  %v2425_v3 = vld [vmem:[%s3697_s10 + $0x70] sm:$0xff] }
 0x4de   : > { %v2909_v25 = vpack.c.bf16 %v2426_v21, %v2425_v3 }
 0x4e0   : > { %2910 = vmatpush3.bf16.msra.mxu1 %v2909_v25 }
 0x57d   : > { %v2057_v46 = vpop.f32.mrb[14].mxu0 }
 0x57e   : > { %v2807_v26 = vpop.f32.mrb[15].mxu0  ;;  %v2280_v17 = vsel %vm593_vm1, %v2057_v46, 0.0 }
 0x581   : > { %v2130_v29 = vpop.f32.mrb[6].mxu1 }
 0x582   : > { %v2281_v20 = vsel %vm593_vm1, %v2130_v29, 0.0  ;;  %v2812_v23 = vpop.f32.mrb[7].mxu1 }
 0x583   : > { %v2282_v22 = vadd.f32 %v2281_v20, %v2280_v17  ;;  %v2678_v20 = vld [vmem:[%s3698_s11] ss:$0 sm:$0xff] }
 0x592   : > { %v2203_v47 = vpop.f32.mrb[16].mxu0 }
 0x593   : > { %v2283_v48 = vsel %vm593_vm1, %v2203_v47, 0.0  ;;  %v2817_v49 = vpop.f32.mrb[17].mxu0 }
 0x594   : > { %v2284_v51 = vadd.f32 %v2283_v48, %v2282_v22 }
 0x596   : > { %v2276_v52 = vpop.f32.mrb[8].mxu1 }
 0x597   : > { %v2285_v53 = vsel %vm593_vm1, %v2276_v52, 0.0  ;;  %v2822_v54 = vpop.f32.mrb[9].mxu1 }
 0x598   : > { %v2286_v55 = vadd.f32 %v2285_v53, %v2284_v51 }
 0x59a   : > { %v2294_v56 = vadd.f32 %v2673_v6, %v2286_v55 }
 0x59c   : > { %v2295_v58 = vadd.f32 %v2294_v56, %v3269_v10  ;;  %v2328_v10 = vld [vmem:[%s3695_s8 + $0x10] sm:$0xff] }
 0x59d   : > { %v2885_v9 = vpack.c.bf16 %v2329_v7, %v2328_v10 }
 0x59e   : > { %v2298_v59 = vsel %vm593_vm1, %v2295_v58, 0.0 }
 0x59f   : > { %2299 = vadd.xlane.f32.xlu0 %v2298_v59  ;;  %2886 = vmatpush3.bf16.msra.mxu0 %v2885_v9 }
 0x62c   : > { %v2300_v60 = vpop.xlane.xlu0 %2299 }
 0x62d   : > { %v2302_v61 = vmul.f32 0.03125, %v2300_v60  ;;  %v2679_v60 = vld [vmem:[%s3701_s14] ss:$0 sm:$0xff] }
 0x62f   : > { %v2303_v62 = vsub.f32 %v2295_v58, %v2302_v61 }
 0x631   : > { %v2304_v0 = vmul.f32 %v2303_v62, %v2303_v62 }
 0x633   : > { %v2305_v1 = vsel %vm593_vm1, %v2304_v0, 0.0 }
 0x634   : > { %2306 = vadd.xlane.f32.xlu1 %v2305_v1 }
 0x6c1   : > { %v2307_v39 = vpop.xlane.xlu1 %2306 }
 0x6c2   : > { %v2308_v50 = vmul.f32 0.03125, %v2307_v39 }
 0x6c4   : > { %v2309_v14 = vadd.f32 1e-05, %v2308_v50 }
 0x6c6   : > { %3003 = vrsqrt.f32 %v2309_v14 }
 0x6d0   : > { %v3004_v16 = vpop.eup %3003 }
 0x6d1   : > { %v2311_v42 = vmul.f32 %v3004_v16, %v2303_v62  ;;  %v2680_v62 = vld [vmem:[%s3702_s15] ss:$0 sm:$0xff] }
 0x6d3   : > { %v2318_v43 = vmul.f32 %v2674_v18, %v2311_v42 }
 0x6d5   : > { %v2325_v44 = vadd.f32 %v2675_v57, %v2318_v43 }
 0x6d7   : > { %2832 = vmatmul.mubr.msk.f32.vlgmr.msra.gmra.mrb[18].mxu0 %vm593_vm1, %v2325_v44 }
 0x7aa   : > { %v2406_v46 = vpop.f32.mrb[18].mxu0 }
 0x7ab   : > { %v2407_v26 = vadd.f32 %v2676_v27, %v2406_v46  ;;  %v2833_v29 = vpop.f32.mrb[19].mxu0 }
 0x7ad   : > { %v2410_v17 = vmax.f32 %v2407_v26, 0.0 }
 0x7af   : > { %2867 = vmatmul.mubr.f32.vlgmr.msra.gmra.mrb[10].mxu1 %v2410_v17 }
 0x882   : > { %v2500_v23 = vpop.f32.mrb[10].mxu1 }
 0x883   : > { %v2501_v22 = vadd.f32 %v2678_v20, %v2500_v23  ;;  %v2868_v47 = vpop.f32.mrb[11].mxu1 }
 0x885   : > { %v2504_v48 = vadd.f32 %v2501_v22, %v2325_v44 }
 0x887   : > { %v2507_v49 = vsel %vm593_vm1, %v2504_v48, 0.0 }
 0x888   : > { %2508 = vadd.xlane.f32.xlu0 %v2507_v49 }
 0x915   : > { %v2509_v51 = vpop.xlane.xlu0 %2508 }
 0x916   : > { %v2510_v52 = vmul.f32 0.03125, %v2509_v51 }
 0x918   : > { %v2511_v53 = vsub.f32 %v2504_v48, %v2510_v52 }
 0x91a   : > { %v2512_v6 = vmul.f32 %v2511_v53, %v2511_v53 }
 0x91c   : > { %v2513_v54 = vsel %vm593_vm1, %v2512_v6, 0.0 }
 0x91d   : > { %2514 = vadd.xlane.f32.xlu0 %v2513_v54 }
 0x9aa   : > { %v2515_v55 = vpop.xlane.xlu0 %2514 }
 0x9ab   : > { %v2516_v56 = vmul.f32 0.03125, %v2515_v55 }
 0x9ad   : > { %v2517_v58 = vadd.f32 1e-05, %v2516_v56 }
 0x9af   : > { %3005 = vrsqrt.f32 %v2517_v58 }
 0x9b9   : > { %v3006_v59 = vpop.eup %3005 }
 0x9ba   : > { %v2519_v61 = vmul.f32 %v3006_v59, %v2511_v53 }
 0x9bc   : > { %v2526_v0 = vmul.f32 %v2679_v60, %v2519_v61 }
 0x9be   : > { %v2533_v1 = vadd.f32 %v2680_v62, %v2526_v0 }
 0x9c0   : > { %2534 = vst.msk [vmem:[%s562_s18] sm:$0xff] %vm593_vm1, %v2533_v1 }
 0x9c1   : > { %3020 = shalt.err (!%p3017_p5)
}
 0x9c2   : > { %s3021_s30 = scalar_lea.hbm %s3639_s17, 128  ;;  %s3025_s18 = scalar_lea.hbm %s3703_s16, 256 }
 0x9c3   : > { %p3022_p6 = scmp.ne.s32.totalorder %s3639_s17, %s3021_s30  ;;  %p3026_p10 = scmp.lt.u32.totalorder %s3639_s17, %s3703_s16 }
 0x9c4   : > { %p3027_p11 = scmp.lt.u32.totalorder %s3025_s18, %s3021_s30  ;;  %p3029_p13 = scmp.lt.u32.totalorder %s3021_s30, %s3639_s17 }
 0x9c5   : > { %p3023_p7 = pnand %p3022_p6, %p3224_p4 }
 0x9c6   : > { %p3028_p12 = por %p3027_p11, %p3026_p10 }
 0x9c7   : > { %p3024_p9 = pneg %p3023_p7 }
 0x9c8   : > { %p3030_p0 = por %p3029_p13, %p3028_p12 }
 0x9ca   : > { %p3031_p1 = pnand %p3030_p0, %p3024_p9 }
 0x9cc   : > { %3034 = shalt.err (!%p3031_p1)
}
 0x9cd   : > { %2911 = dma.vmem_to_hbm [thread:$0]  (%p3224_p4), %s3641_s25, 128, %s3639_s17, %s2536_s20  }
 0x9ce PF: > { %s3721_s2 = sld [smem:[#allocation9_spill]]  ;;  %p2917_p2 = scmp.ge.s32.totalorder %s3085_s26, 2 }
 0x9d0   : > { %p2914_p3 = pnand %p2917_p2, %p3231_p8 }
 0x9d4   : > { %s2562_s29 = sand.u32 1, %s3721_s2  }
 0x9d5   : > { %s2563_s19 = scalar_lea.sflag [#allocation7], %s2562_s29 }
 0x9d6   : > { %3060 = dma.done.wait (!%p2914_p3), %s2563_s19, 128  }
 0x9d7   : > { %3062 = vsyncadd (!%p2914_p3), %s2563_s19, 4294967168  ;;  %s29_s26 = sadd.s32 1, %s3085_s26   ;;  %s3723_s30 = sld [smem:[#allocation10_spill]] }
 0x9d8   : > { %p26_p5 = scmp.ge.s32.totalorder %s29_s26, 4   ;;  %s3724_s23 = sld [smem:[#allocation14_spill]] }
 0x9d9   : > { %s3725_s24 = sld [smem:[#allocation11_spill]]  ;;  %s3726_s25 = sld [smem:[#allocation12_spill]] }
 0x9da   : > { %s3727_s21 = smov %s3069_s22  ;;  %28 = sbr.rel (!%p26_p5) target bundleno = 7 (0x7), region = 130 }
 0x9dd   : > { %s3728_s22 = smov %s3723_s30 }
 0x9e1   :  { %2568 = vsyncpa [#allocation7], 1 }
 0x9e2   :  { %2570 = vsyncpa [#allocation7 + $0x1], 1 }

// kernel: _forward.2
= control target key start
LH: loop header
LB: loop body
LE: loop exit
PB: predicated region body
PF: predicated region fallthrough
CT: control target
= control target key end

     0   :  { %s3088_s21 = smov 0   ;;  %s3090_s22 = smov 0   ;;  %s3517_s0 = inlined_call_operand.vmem [shape: f32[2,8,32], index: 0, kind: input, shape index: {}, may-alias: {0,1}]   ;;  %s3518_s1 = inlined_call_operand.vmem [shape: f32[2,8,32], index: 1, kind: input, shape index: {}, may-alias: {0,1}]   ;;  %s3519_s2 = inlined_call_operand.vmem [shape: f32[32,32], index: 2, kind: input, shape index: {}]   ;;  %s3520_s3 = inlined_call_operand.vmem [shape: f32[32,64], index: 3, kind: input, shape index: {}]   ;;  %s3521_s4 = inlined_call_operand.vmem [shape: f32[1,32], index: 4, kind: input, shape index: {}]   ;;  %s3522_s5 = inlined_call_operand.vmem [shape: f32[1,64], index: 5, kind: input, shape index: {}]   ;;  %s3523_s6 = inlined_call_operand.vmem [shape: f32[4,8,32], index: 6, kind: input, shape index: {}]   ;;  %s3524_s7 = inlined_call_operand.vmem [shape: f32[1,32], index: 7, kind: input, shape index: {}]   ;;  %s3525_s8 = inlined_call_operand.vmem [shape: f32[32,128], index: 8, kind: input, shape index: {}]   ;;  %s3526_s9 = inlined_call_operand.vmem [shape: f32[1,128], index: 9, kind: input, shape index: {}]   ;;  %s3527_s10 = inlined_call_operand.vmem [shape: f32[128,32], index: 10, kind: input, shape index: {}]   ;;  %s3528_s11 = inlined_call_operand.vmem [shape: f32[1,32], index: 11, kind: input, shape index: {}]   ;;  %s3529_s12 = inlined_call_operand.vmem [shape: f32[1,32], index: 12, kind: input, shape index: {}]   ;;  %s3530_s13 = inlined_call_operand.vmem [shape: f32[1,32], index: 13, kind: input, shape index: {}]   ;;  %s3531_s14 = inlined_call_operand.vmem [shape: f32[1,32], index: 14, kind: input, shape index: {}]   ;;  %s3532_s15 = inlined_call_operand.vmem [shape: f32[1,32], index: 15, kind: input, shape index: {}]   ;;  %s3533_s16 = inlined_call_operand.vmem [shape: f32[2,8,32], index: 16, kind: output, shape index: {}]  }
   0x1   :  { %3534 = sst [smem:[#allocation6_spill]] %s3517_s0  ;;  %s3092_s23 = smov 0  }
   0x2 LB: > { %s45_s24 = sadd.s32 1, %s2986_s22  ;;  %p2637_p0 = scmp.ge.s32.totalorder %s2990_s23, 1  ;;  %s2990_s23 = sphi %s3092_s23, %s26_s23   ;;  %s2986_s22 = sphi %s3090_s22, %s3537_s22   ;;  %s2982_s21 = sphi %s3088_s21, %s3536_s21  }
   0x3   : > { %p47_p1 = scmp.ge.s32.totalorder %s45_s24, 2  ;;  %p501_p2 = scmp.lt.s32.totalorder %s2990_s23, 3 }
   0x5   : > { %s3539_s24 = smov (%p47_p1, %s45_s24), 0  ;;  %p502_p3 = pnand %p2637_p0, %p501_p2 }
   0x6   : > { %v588_v0 = vld [vmem:[%s3519_s2] sm:$0xff] (!%p502_p3)  ;;  %v589_v1 = vld [vmem:[%s3519_s2 + $0x8] sm:$0xff] (!%p502_p3)  ;;  %v590_v2 = vld [vmem:[%s3519_s2 + $0x10] sm:$0xff] (!%p502_p3)  ;;  %v2992_v3 = vmov (!%p502_p3), 0.0|0.0   ;;  %vm2993_vm0 = vmmov (!%p502_p3), 0   ;;  %v2994_v6 = vmov (!%p502_p3), 0.0   ;;  %v688_v26 = vlaneseq (!%p502_p3) }
   0x7   : > { %505 = sbr.rel (%p502_p3) target bundleno = 2479 (0x9af), region = 84  ;;  %2861 = vmatprep.subr.bf16.mxu0 (!%p502_p3), %v2992_v3  ;;  %v2862_v4 = vpack.c.bf16 (!%p502_p3), %v589_v1, %v588_v0  ;;  %v591_v5 = vld [vmem:[%s3519_s2 + $0x18] sm:$0xff] (!%p502_p3)  ;;  %2741 = vmatprep.mubr.msk.f32.mxu0 (!%p502_p3), %vm2993_vm0, %v2994_v6  ;;  %p562_p4 = scmp.lt.s32.totalorder (!%p502_p3), %s2982_s21, 1  ;;  %v838_v8 = vld [vmem:[%s3520_s3] sm:$0xff] (!%p502_p3)  ;;  %v839_v9 = vld [vmem:[%s3520_s3 + $0x8] sm:$0xff] (!%p502_p3)  ;;  %vm599_vm1 = vcmask (!%p502_p3), 261120  }
   0x8   : > { %2770 = vmatprep.subr.mxu1 (!%p502_p3), %v2994_v6  ;;  %2772 = vmatprep.mubr.msk.f32.mxu1 (!%p502_p3), %vm2993_vm0, %v2994_v6  ;;  %v2865_v7 = vpack.c.bf16 (!%p502_p3), %v591_v5, %v590_v2  ;;  %s3535_s29 = sld [smem:[#allocation6_spill]] (!%p502_p3)  ;;  %v2868_v11 = vpack.c.bf16 (!%p502_p3), %v839_v9, %v838_v8  ;;  %v840_v12 = vld [vmem:[%s3520_s3 + $0x10] sm:$0xff] (!%p502_p3)  ;;  %v841_v13 = vld [vmem:[%s3520_s3 + $0x18] sm:$0xff] (!%p502_p3)  ;;  %vm819_vm2 = vcmask (!%p502_p3), 64512   ;;  %v2641_v16 = vld [vmem:[%s3521_s4] ss:$0 sm:$0xff] (!%p502_p3) }
   0x9   : > { %2863 = vmatpush3.bf16.msra.mxu0 (!%p502_p3), %v2862_v4  ;;  %v2871_v14 = vpack.c.bf16 (!%p502_p3), %v841_v13, %v840_v12  ;;  %833 = vst.msk [vmem:[#allocation5] sm:$0xff] (!%p502_p3), %vm819_vm2, %v2994_v6  ;;  %834 = vst.msk [vmem:[#allocation5 + $0x8] sm:$0xff] (!%p502_p3), %vm819_vm2, %v2994_v6  ;;  %v2645_v20 = vld [vmem:[%s3522_s5] ss:$0 sm:$0xff] (!%p502_p3)  ;;  %s2997_s18 = smov (!%p502_p3), 112   ;;  %v689_v30 = vshrl.u32 (!%p502_p3), %v688_v26, 7 }
   0xa   : > { %2864 = vmatprep.subr.bf16.mxu0 (!%p502_p3), %v2992_v3  ;;  %835 = vst.msk [vmem:[#allocation5 + $0x10] sm:$0xff] (!%p502_p3), %vm819_vm2, %v2994_v6  ;;  %836 = vst.msk [vmem:[#allocation5 + $0x18] sm:$0xff] (!%p502_p3), %vm819_vm2, %v2994_v6  ;;  %v2998_v24 = vmov (!%p502_p3), 1983009808   ;;  %v2999_v27 = vmov (!%p502_p3), 1934713408  }
   0xb   : > { %v686_v25 = vunpack.c.l.s4 (!%p502_p3), %v2998_v24  ;;  %v718_v28 = vunpack.c.l.s4 (!%p502_p3), %v2999_v27  ;;  %vm824_vm3 = vcmask (!%p502_p3), 7168  }
   0xc   : > { %829 = vst.msk [vmem:[#allocation4] sm:$0xff] (!%p502_p3), %vm824_vm3, %v2994_v6  ;;  %830 = vst.msk [vmem:[#allocation4 + $0x8] sm:$0xff] (!%p502_p3), %vm824_vm3, %v2994_v6 }
   0xd   : > { %2866 = vmatpush3.bf16.msra.mxu0 (!%p502_p3), %v2865_v7  ;;  %v687_v29 = vunpack.c.0.s8 (!%p502_p3), %v686_v25  ;;  %v719_v33 = vunpack.c.0.s8 (!%p502_p3), %v718_v28  ;;  %831 = vst.msk [vmem:[#allocation4 + $0x10] sm:$0xff] (!%p502_p3), %vm824_vm3, %v2994_v6  ;;  %832 = vst.msk [vmem:[#allocation4 + $0x18] sm:$0xff] (!%p502_p3), %vm824_vm3, %v2994_v6 }
   0xe   : > { %s3541_s21 = smov (!%p562_p4, %s2982_s21), 1  ;;  %2867 = vmatprep.subr.bf16.mxu0 %v2992_v3 }
   0xf   : > { %s3131_s26 = sshll.u32 %s3541_s21, 3  ;;  %v3178_v34 = vsub.s32 %v687_v29, %v689_v30  ;;  %v3180_v40 = vsub.s32 %v719_v33, %v689_v30  ;;  %s3002_s21 = smov 96  }
  0x10   : > { %s568_s30 = scalar_lea.vmem %s3535_s29, %s3131_s26  ;;  %s575_s25 = scalar_lea.vmem %s3518_s1, %s3131_s26 }
  0x11   : > { %v3137_v10 = vld [vmem:[%s568_s30] sm:$0xff]  ;;  %s2995_s29 = smov 120   ;;  %s2996_s30 = smov 104  }
  0x12   : > { %2742 = vmatmul.mubr.msk.f32.vlgmr.msra.gmra.mrb[0].mxu0 %vm599_vm1, %v3137_v10  ;;  %v837_v15 = vld [vmem:[%s575_s25] sm:$0xff] }
  0x13   : > { %2869 = vmatpush3.bf16.msra.mxu0 %v2868_v11  ;;  %2752 = vmatprep.mubr.msk.f32.mxu0 %vm2993_vm0, %v2994_v6 }
  0x14   : > { %2870 = vmatprep.subr.bf16.mxu0 %v2992_v3 }
  0x17   : > { %2872 = vmatpush3.bf16.msra.mxu0 %v2871_v14 }
  0x18   : > { %2755 = vmatprep.subr.mxu0 %v2994_v6 }
  0x1a   : > { %2753 = vmatmul.mubr.msk.f32.vlgmr.msra.gmra.mrb[2].mxu0 %vm599_vm1, %v837_v15 }
  0x1b   : > { %2757 = vmatprep.mubr.msk.f32.mxu0 %vm2993_vm0, %v2994_v6 }
  0xe5   : > { %v669_v17 = vpop.f32.mrb[0].mxu0 }
  0xe6   : > { %v670_v18 = vadd.f32 %v2641_v16, %v669_v17  ;;  %v2743_v19 = vpop.f32.mrb[1].mxu0 }
  0xe8   : > { %674 = vrot.lane.b32.xlu0 %v670_v18, %s2995_s29  ;;  %680 = vrot.lane.b32.xlu1 %v670_v18, %s2996_s30 }
  0xec   : > { %677 = vrot.lane.b32.xlu0 %v670_v18, %s2997_s18 }
  0xed   : > { %v919_v21 = vpop.f32.mrb[2].mxu0 }
  0xee   : > { %v3173_v22 = vadd.f32 %v2645_v20, %v919_v21  ;;  %v2754_v23 = vpop.f32.mrb[3].mxu0 }
  0xf0   : > { %927 = vrot.lane.b32.xlu0 %v3173_v22, %s2997_s18  ;;  %924 = vrot.lane.b32.xlu1 %v3173_v22, %s2995_s29  ;;  %s582_s18 = scalar_lea.vmem %s3533_s16, %s3131_s26 }
  0xf4   : > { %930 = vrot.lane.b32.xlu1 %v3173_v22, %s2996_s30 }
 0x15a   : > { %v675_v31 = vpop.permute.xlu0 %674  ;;  %v681_v32 = vpop.permute.xlu1 %680 }
 0x15b   : > { %v699_v35 = vcombine.low %v675_v31, %v681_v32  ;;  %v700_v36 = vcombine.high %v675_v31, %v681_v32 }
 0x15d   : > { %v707_v41 = vrot.slane %v699_v35, %v3178_v34  ;;  %v714_v42 = vrot.slane %v700_v36, %v3178_v34 }
 0x15e   : > { %v678_v37 = vpop.permute.xlu0 %677 }
 0x15f   : > { %v683_v38 = vcombine.low %v670_v18, %v678_v37  ;;  %v684_v39 = vcombine.high %v670_v18, %v678_v37 }
 0x161   : > { %v691_v43 = vrot.slane %v683_v38, %v3178_v34  ;;  %v698_v44 = vrot.slane %v684_v39, %v3178_v34 }
 0x162   : > { %v3186_v45 = vpop.permute.xlu1 %924  ;;  %v3188_v50 = vpop.permute.xlu0 %927 }
 0x163   : > { %v715_v46 = vcombine.low %v691_v43, %v707_v41  ;;  %v716_v47 = vcombine.high %v691_v43, %v707_v41  ;;  %v731_v48 = vcombine.low %v698_v44, %v714_v42  ;;  %v732_v49 = vcombine.high %v698_v44, %v714_v42 }
 0x164   : > { %v933_v55 = vcombine.low %v3173_v22, %v3188_v50  ;;  %v934_v56 = vcombine.high %v3173_v22, %v3188_v50 }
 0x165   : > { %v723_v51 = vrot.slane %v715_v46, %v3180_v40  ;;  %v730_v52 = vrot.slane %v716_v47, %v3180_v40  ;;  %v739_v53 = vrot.slane %v731_v48, %v3180_v40  ;;  %v746_v54 = vrot.slane %v732_v49, %v3180_v40 }
 0x166   : > { %v3198_v57 = vpop.permute.xlu1 %930  ;;  %v941_v5 = vrot.slane %v933_v55, %v3178_v34  ;;  %v948_v7 = vrot.slane %v934_v56, %v3178_v34 }
 0x167   : > { %v751_v58 = vcombine.low %v723_v51, %v730_v52  ;;  %v2643_v59 = vcombine.high %v723_v51, %v730_v52  ;;  %v767_v60 = vcombine.low %v739_v53, %v746_v54  ;;  %v2644_v61 = vcombine.high %v739_v53, %v746_v54 }
 0x168   : > { %v949_v62 = vcombine.low %v3186_v45, %v3198_v57  ;;  %v950_v63 = vcombine.high %v3186_v45, %v3198_v57 }
 0x169   : > { %v758_v0 = vrot.slane %v751_v58, %v3178_v34  ;;  %v766_v1 = vrot.slane %v2643_v59, %v3178_v34  ;;  %v774_v2 = vrot.slane %v767_v60, %v3178_v34  ;;  %v782_v4 = vrot.slane %v2644_v61, %v3178_v34 }
 0x16a   : > { %v957_v8 = vrot.slane %v949_v62, %v3178_v34  ;;  %v964_v9 = vrot.slane %v950_v63, %v3178_v34  ;;  %v3000_v61 = vmov -inf  }
 0x16b   : > { %v783_v11 = vcombine.low %v758_v0, %v766_v1  ;;  %v784_v12 = vcombine.high %v758_v0, %v766_v1  ;;  %v799_v13 = vcombine.low %v774_v2, %v782_v4  ;;  %v800_v14 = vcombine.high %v774_v2, %v782_v4  ;;  %825 = vst.msk [vmem:[#allocation3] sm:$0xff] %vm824_vm3, %v3000_v61 }
 0x16c   : > { %v965_v15 = vcombine.low %v941_v5, %v957_v8  ;;  %v966_v16 = vcombine.high %v941_v5, %v957_v8  ;;  %v981_v17 = vcombine.low %v948_v7, %v964_v9  ;;  %v982_v18 = vcombine.high %v948_v7, %v964_v9  ;;  %826 = vst.msk [vmem:[#allocation3 + $0x8] sm:$0xff] %vm824_vm3, %v3000_v61 }
 0x16d   : > { %v791_v19 = vrot.slane %v783_v11, %v3180_v40  ;;  %v798_v20 = vrot.slane %v784_v12, %v3180_v40  ;;  %v807_v21 = vrot.slane %v799_v13, %v3180_v40  ;;  %v814_v23 = vrot.slane %v800_v14, %v3180_v40  ;;  %827 = vst.msk [vmem:[#allocation3 + $0x10] sm:$0xff] %vm824_vm3, %v3000_v61 }
 0x16e   : > { %v973_v24 = vrot.slane %v965_v15, %v3180_v40  ;;  %v980_v25 = vrot.slane %v966_v16, %v3180_v40  ;;  %v989_v26 = vrot.slane %v981_v17, %v3180_v40  ;;  %v996_v27 = vrot.slane %v982_v18, %v3180_v40  ;;  %828 = vst.msk [vmem:[#allocation3 + $0x18] sm:$0xff] %vm824_vm3, %v3000_v61 }
 0x16f   : > { %v815_v28 = vcombine.low %v791_v19, %v807_v21  ;;  %v816_v29 = vcombine.high %v791_v19, %v807_v21  ;;  %v817_v30 = vcombine.low %v798_v20, %v814_v23  ;;  %v818_v31 = vcombine.high %v798_v20, %v814_v23 }
 0x170   : > { %v1001_v32 = vcombine.low %v973_v24, %v980_v25  ;;  %v2647_v33 = vcombine.high %v973_v24, %v980_v25  ;;  %v1017_v35 = vcombine.low %v989_v26, %v996_v27  ;;  %v2648_v36 = vcombine.high %v989_v26, %v996_v27 }
 0x171   : > { %820 = vst.msk [vmem:[#allocation2] sm:$0xff] %vm819_vm2, %v815_v28  ;;  %821 = vst.msk [vmem:[#allocation2 + $0x8] sm:$0xff] %vm819_vm2, %v816_v29  ;;  %v3001_v13 = vmov 0  }
 0x172   : > { %822 = vst.msk [vmem:[#allocation2 + $0x10] sm:$0xff] %vm819_vm2, %v817_v30  ;;  %823 = vst.msk [vmem:[#allocation2 + $0x18] sm:$0xff] %vm819_vm2, %v818_v31  ;;  %v1008_v37 = vrot.slane %v1001_v32, %v3178_v34  ;;  %v1016_v38 = vrot.slane %v2647_v33, %v3178_v34  ;;  %v1024_v39 = vrot.slane %v1017_v35, %v3178_v34  ;;  %2938 = vset.pattern.permute.xlu1 %v3001_v13  ;;  %v3274_v14 = vld [vmem:[#allocation3] sm:$0xff] }
 0x173   : > { %v1032_v41 = vrot.slane %v2648_v36, %v3178_v34  ;;  %2939 = vset.pattern.permute.xlu0 %v3001_v13  ;;  %v3279_v17 = vld [vmem:[#allocation3 + $0x8] sm:$0xff] }
 0x174   : > { %v1033_v42 = vcombine.low %v1008_v37, %v1016_v38  ;;  %v1034_v44 = vcombine.high %v1008_v37, %v1016_v38  ;;  %v3289_v21 = vld [vmem:[#allocation3 + $0x10] sm:$0xff] }
 0x175   : > { %v1049_v43 = vcombine.low %v1024_v39, %v1032_v41  ;;  %v1050_v46 = vcombine.high %v1024_v39, %v1032_v41  ;;  %v3300_v26 = vld [vmem:[#allocation3 + $0x18] sm:$0xff] }
 0x176   : > { %v1041_v47 = vrot.slane %v1033_v42, %v3180_v40  ;;  %v1048_v49 = vrot.slane %v1034_v44, %v3180_v40 }
 0x177   : > { %v1057_v48 = vrot.slane %v1049_v43, %v3180_v40  ;;  %v1064_v51 = vrot.slane %v1050_v46, %v3180_v40 }
 0x178   : > { %v1217_v54 = vld [vmem:[#allocation2] sm:$0xff]  ;;  %v1218_v59 = vld [vmem:[#allocation2 + $0x8] sm:$0xff] }
 0x179   : > { %v1065_v52 = vcombine.low %v1041_v47, %v1057_v48  ;;  %v1068_v53 = vcombine.high %v1048_v49, %v1064_v51  ;;  %v1220_v55 = vld [vmem:[#allocation2 + $0x18] sm:$0xff]  ;;  %v1066_v56 = vcombine.high %v1041_v47, %v1057_v48  ;;  %v1067_v58 = vcombine.low %v1048_v49, %v1064_v51  ;;  %v1219_v60 = vld [vmem:[#allocation2 + $0x10] sm:$0xff] }
 0x17b   : > { %2756 = vmatpush3.xpose.msk.msra.mxu0 %vm819_vm2, %v1065_v52  ;;  %2771 = vmatpush3.xpose.msk.msra.mxu1 %vm819_vm2, %v1068_v53 }
 0x17c   : > { %2760 = vmatprep.subr.mxu0 %v2994_v6  ;;  %2780 = vmatprep.subr.mxu1 %v2994_v6 }
 0x17e   : > { %2758 = vmatmul.mubr.msk.f32.vlgmr.msra.gmra.mrb[4].mxu0 %vm819_vm2, %v1217_v54  ;;  %2773 = vmatmul.mubr.msk.f32.vlgmr.msra.gmra.mrb[0].mxu1 %vm819_vm2, %v1220_v55 }
 0x17f   : > { %2761 = vmatpush3.xpose.msk.msra.mxu0 %vm819_vm2, %v1066_v56  ;;  %2762 = vmatprep.mubr.msk.f32.mxu0 %vm2993_vm0, %v2994_v6 }
 0x180   : > { %2765 = vmatprep.subr.mxu0 %v2994_v6  ;;  %2782 = vmatprep.mubr.msk.f32.mxu1 %vm2993_vm0, %v2994_v6 }
 0x182   : > { %2763 = vmatmul.mubr.msk.f32.vlgmr.msra.gmra.mrb[6].mxu0 %vm819_vm2, %v1218_v59 }
 0x183   : > { %2766 = vmatpush3.xpose.msk.msra.mxu0 %vm819_vm2, %v1067_v58  ;;  %2767 = vmatprep.mubr.msk.f32.mxu0 %vm2993_vm0, %v2994_v6 }
 0x184   : > { %2775 = vmatprep.subr.mxu0 %v2994_v6 }
 0x186   : > { %2768 = vmatmul.mubr.msk.f32.vlgmr.msra.gmra.mrb[8].mxu0 %vm819_vm2, %v1219_v60 }
 0x187   : > { %2777 = vmatprep.mubr.msk.f32.mxu0 %vm2993_vm0, %v2994_v6 }
 0x251   : > { %v1294_v62 = vpop.f32.mrb[4].mxu0  ;;  %v3264_v63 = vpop.f32.mrb[0].mxu1 }
 0x252   : > { %v2759_v0 = vpop.f32.mrb[5].mxu0  ;;  %v2774_v1 = vpop.f32.mrb[1].mxu1  ;;  %v1530_v2 = vsel %vm819_vm2, %v1294_v62, -inf  ;;  %v1539_v12 = vsel %vm819_vm2, %v3264_v63, -inf }
 0x253   : > { %1531 = vmax.xlane.f32.xlu0 %v1530_v2 }
 0x255   : > { %v1370_v4 = vpop.f32.mrb[6].mxu0 }
 0x256   : > { %v2764_v5 = vpop.f32.mrb[7].mxu0  ;;  %v1533_v7 = vsel %vm819_vm2, %v1370_v4, -inf }
 0x257   : > { %1534 = vmax.xlane.f32.xlu1 %v1533_v7 }
 0x259   : > { %v3268_v8 = vpop.f32.mrb[8].mxu0 }
 0x25a   : > { %v2769_v9 = vpop.f32.mrb[9].mxu0  ;;  %v1536_v11 = vsel %vm819_vm2, %v3268_v8, -inf }
 0x25b   : > { %1537 = vmax.xlane.f32.xlu0 %v1536_v11 }
 0x25f   : > { %1540 = vmax.xlane.f32.xlu0 %v1539_v12 }
 0x2e0   : > { %v1532_v15 = vpop.xlane.xlu0 %1531 }
 0x2e1   : > { %v3277_v16 = vmax.f32 %v3274_v14, %v1532_v15 }
 0x2e3   : > { %v1546_v18 = vsub.f32 %v3274_v14, %v3277_v16  ;;  %1947 = vst.msk [vmem:[#allocation3] sm:$0xff] %vm824_vm3, %v3277_v16  ;;  %1560 = vperm.xlu1 %2938, %v3277_v16  }
 0x2e4   : > { %v1535_v19 = vpop.xlane.xlu1 %1534 }
 0x2e5   : > { %v3287_v20 = vmax.f32 %v3279_v17, %v1535_v19 }
 0x2e7   : > { %v1547_v23 = vsub.f32 %v3279_v17, %v3287_v20  ;;  %1948 = vst.msk [vmem:[#allocation3 + $0x8] sm:$0xff] %vm824_vm3, %v3287_v20  ;;  %1069 = vrot.lane.b32.xlu1 %v3173_v22, %s3002_s21  ;;  %1565 = vperm.xlu0 %2939, %v3287_v20  }
 0x2e8   : > { %v1538_v24 = vpop.xlane.xlu0 %1537 }
 0x2e9   : > { %v3298_v25 = vmax.f32 %v3289_v21, %v1538_v24 }
 0x2eb   : > { %v1548_v27 = vsub.f32 %v3289_v21, %v3298_v25  ;;  %1949 = vst.msk [vmem:[#allocation3 + $0x10] sm:$0xff] %vm824_vm3, %v3298_v25  ;;  %1071 = vrot.lane.b32.xlu1 %v3186_v45, %s3002_s21  ;;  %v1590_v21 = vld [vmem:[#allocation4] sm:$0xff] }
 0x2ec   : > { %v1541_v28 = vpop.xlane.xlu0 %1540 }
 0x2ed   : > { %v3308_v29 = vmax.f32 %v3300_v26, %v1541_v28  ;;  %v1554_v14 = vmul.f32 1.442695, %v1548_v27 }
 0x2ef   : > { %v1549_v22 = vsub.f32 %v3300_v26, %v3308_v29  ;;  %1950 = vst.msk [vmem:[#allocation3 + $0x18] sm:$0xff] %vm824_vm3, %v3308_v29  ;;  %1073 = vrot.lane.b32.xlu1 %v3188_v50, %s3002_s21 }
 0x2f1   : > { %v1556_v16 = vmul.f32 1.442695, %v1549_v22 }
 0x2f3   : > { %1075 = vrot.lane.b32.xlu1 %v3198_v57, %s3002_s21 }
 0x2f7   : > { %1570 = vperm.xlu1 %2938, %v3298_v25  }
 0x2fb   : > { %1575 = vperm.xlu1 %2938, %v3308_v29  }
 0x362   : > { %v1561_v30 = vpop.permute.xlu1 %1560 }
 0x363   : > { %v1578_v45 = vsub.f32 %v1294_v62, %v1561_v30 }
 0x365   : > { %v1582_v31 = vmul.f32 1.442695, %v1578_v45 }
 0x366   : > { %v1070_v32 = vpop.permute.xlu1 %1069  ;;  %v1566_v33 = vpop.permute.xlu0 %1565 }
 0x367   : > { %2940 = vpow2.f32 %v1582_v31  ;;  %v1579_v35 = vsub.f32 %v1370_v4, %v1566_v33 }
 0x369   : > { %v1584_v36 = vmul.f32 1.442695, %v1579_v35 }
 0x36a   : > { %v1072_v37 = vpop.permute.xlu1 %1071 }
 0x36b   : > { %2942 = vpow2.f32 %v1584_v36 }
 0x36e   : > { %v1074_v38 = vpop.permute.xlu1 %1073 }
 0x36f   : > { %v1081_v41 = vcombine.low %v1070_v32, %v1074_v38  ;;  %v1082_v50 = vcombine.high %v1070_v32, %v1074_v38 }
 0x371   : > { %v2941_v39 = vpop.eup %2940  ;;  %v1089_v47 = vrot.slane %v1081_v41, %v3178_v34  ;;  %v1096_v48 = vrot.slane %v1082_v50, %v3178_v34 }
 0x372   : > { %v1076_v42 = vpop.permute.xlu1 %1075  ;;  %v1598_v57 = vsel %vm819_vm2, %v2941_v39, 0.0 }
 0x373   : > { %v1097_v43 = vcombine.low %v1072_v37, %v1076_v42  ;;  %v1098_v44 = vcombine.high %v1072_v37, %v1076_v42  ;;  %1599 = vadd.xlane.f32.xlu1 %v1598_v57 }
 0x375   : > { %v2943_v46 = vpop.eup %2942  ;;  %v1105_v49 = vrot.slane %v1097_v43, %v3178_v34  ;;  %v1112_v51 = vrot.slane %v1098_v44, %v3178_v34 }
 0x376   : > { %v1571_v52 = vpop.permute.xlu1 %1570  ;;  %v1601_v53 = vsel %vm819_vm2, %v2943_v46, 0.0 }
 0x377   : > { %v1113_v54 = vcombine.low %v1089_v47, %v1105_v49  ;;  %v1114_v55 = vcombine.high %v1089_v47, %v1105_v49  ;;  %v1129_v56 = vcombine.low %v1096_v48, %v1112_v51  ;;  %v1130_v58 = vcombine.high %v1096_v48, %v1112_v51  ;;  %1602 = vadd.xlane.f32.xlu0 %v1601_v53  ;;  %v1592_v47 = vld [vmem:[#allocation4 + $0x10] sm:$0xff] }
 0x378   : > { %v1580_v59 = vsub.f32 %v3268_v8, %v1571_v52  ;;  %v1593_v52 = vld [vmem:[#allocation4 + $0x18] sm:$0xff] }
 0x379   : > { %v1121_v60 = vrot.slane %v1113_v54, %v3180_v40  ;;  %v1128_v61 = vrot.slane %v1114_v55, %v3180_v40  ;;  %v1137_v62 = vrot.slane %v1129_v56, %v3180_v40  ;;  %v1144_v0 = vrot.slane %v1130_v58, %v3180_v40  ;;  %v1990_v54 = vld [vmem:[%s3523_s6] sm:$0xff] }
 0x37a   : > { %v1586_v1 = vmul.f32 1.442695, %v1580_v59  ;;  %v1576_v2 = vpop.permute.xlu1 %1575 }
 0x37b   : > { %v1149_v4 = vcombine.low %v1121_v60, %v1128_v61  ;;  %v2649_v5 = vcombine.high %v1121_v60, %v1128_v61  ;;  %v1165_v7 = vcombine.low %v1137_v62, %v1144_v0  ;;  %v2650_v9 = vcombine.high %v1137_v62, %v1144_v0  ;;  %v1991_v60 = vld [vmem:[%s3523_s6 + $0x8] sm:$0xff] }
 0x37c   : > { %2944 = vpow2.f32 %v1586_v1  ;;  %v1581_v11 = vsub.f32 %v3264_v63, %v1576_v2 }
 0x37d   : > { %v1156_v12 = vrot.slane %v1149_v4, %v3178_v34  ;;  %v1164_v8 = vrot.slane %v2649_v5, %v3178_v34  ;;  %v1172_v13 = vrot.slane %v1165_v7, %v3178_v34  ;;  %v1180_v15 = vrot.slane %v2650_v9, %v3178_v34  ;;  %v1619_v5 = vld [vmem:[#allocation5] sm:$0xff]  ;;  %v1620_v7 = vld [vmem:[#allocation5 + $0x8] sm:$0xff] }
 0x37e   : > { %v1588_v19 = vmul.f32 1.442695, %v1581_v11 }
 0x37f   : > { %v1181_v24 = vcombine.low %v1156_v12, %v1164_v8  ;;  %v1197_v28 = vcombine.low %v1172_v13, %v1180_v15  ;;  %v1182_v30 = vcombine.high %v1156_v12, %v1164_v8  ;;  %v1198_v45 = vcombine.high %v1172_v13, %v1180_v15  ;;  %v1621_v13 = vld [vmem:[#allocation5 + $0x10] sm:$0xff] }
 0x380   : > { %2946 = vpow2.f32 %v1588_v19 }
 0x381   : > { %v1189_v31 = vrot.slane %v1181_v24, %v3180_v40  ;;  %v1205_v32 = vrot.slane %v1197_v28, %v3180_v40  ;;  %v1196_v63 = vrot.slane %v1182_v30, %v3180_v40  ;;  %v1212_v33 = vrot.slane %v1198_v45, %v3180_v40  ;;  %v1622_v24 = vld [vmem:[#allocation5 + $0x18] sm:$0xff] }
 0x383   : > { %v1213_v35 = vcombine.low %v1189_v31, %v1205_v32  ;;  %v1214_v36 = vcombine.high %v1189_v31, %v1205_v32  ;;  %v1215_v34 = vcombine.low %v1196_v63, %v1212_v33  ;;  %v1216_v41 = vcombine.high %v1196_v63, %v1212_v33 }
 0x385   : > { %2776 = vmatpush3.msra.mxu0 %v1213_v35  ;;  %2781 = vmatpush3.msra.mxu1 %v1214_v36 }
 0x386   : > { %v2945_v37 = vpop.eup %2944  ;;  %2778 = vmatmul.mubr.msk.f32.vlgmr.msra.gmra.mrb[10].mxu0 %vm819_vm2, %v2941_v39  ;;  %2783 = vmatmul.mubr.msk.f32.vlgmr.msra.gmra.mrb[2].mxu1 %vm819_vm2, %v2943_v46  ;;  %v1550_v39 = vmul.f32 1.442695, %v1546_v18  ;;  %v1552_v18 = vmul.f32 1.442695, %v1547_v23  ;;  %v1591_v46 = vld [vmem:[#allocation4 + $0x8] sm:$0xff] }
 0x387   : > { %2785 = vmatprep.subr.mxu0 %v2994_v6  ;;  %2790 = vmatprep.subr.mxu1 %v2994_v6  ;;  %v1604_v38 = vsel %vm819_vm2, %v2945_v37, 0.0 }
 0x388   : > { %2786 = vmatpush3.msra.mxu0 %v1215_v34  ;;  %1605 = vadd.xlane.f32.xlu1 %v1604_v38  ;;  %2948 = vpow2.f32 %v1550_v39 }
 0x389   : > { %2791 = vmatpush3.msra.mxu1 %v1216_v41  ;;  %2787 = vmatprep.mubr.msk.f32.mxu0 %vm2993_vm0, %v2994_v6  ;;  %2950 = vpow2.f32 %v1554_v14 }
 0x38a   : > { %v2947_v40 = vpop.eup %2946  ;;  %2792 = vmatprep.mubr.msk.f32.mxu1 %vm2993_vm0, %v2994_v6  ;;  %2788 = vmatmul.mubr.msk.f32.vlgmr.msra.gmra.mrb[12].mxu0 %vm819_vm2, %v2945_v37  ;;  %2952 = vpow2.f32 %v1556_v16 }
 0x38b   : > { %2793 = vmatmul.mubr.msk.f32.vlgmr.msra.gmra.mrb[4].mxu1 %vm819_vm2, %v2947_v40  ;;  %v1607_v50 = vsel %vm819_vm2, %v2947_v40, 0.0  ;;  %2795 = vmatprep.subr.mxu0 %v2994_v6  ;;  %2954 = vpow2.f32 %v1552_v18 }
 0x38c   : > { %1608 = vadd.xlane.f32.xlu0 %v1607_v50  ;;  %2797 = vmatprep.mubr.msk.f32.mxu0 %vm2993_vm0, %v2994_v6  ;;  %v1992_v50 = vld [vmem:[%s3523_s6 + $0x10] sm:$0xff] }
 0x38d   : > { %2800 = vmatprep.subr.mxu1 %v2994_v6  ;;  %2802 = vmatprep.mubr.msk.f32.mxu1 %vm2993_vm0, %v2994_v6 }
 0x38e   : > { %2796 = vmatpush3.msra.mxu0 %v1990_v54  ;;  %2801 = vmatpush3.msra.mxu1 %v1991_v60 }
 0x38f   : > { %2805 = vmatprep.subr.mxu0 %v2994_v6  ;;  %2810 = vmatprep.subr.mxu1 %v2994_v6 }
 0x392   : > { %v2949_v42 = vpop.eup %2948 }
 0x393   : > { %v2951_v57 = vpop.eup %2950  ;;  %v1594_v25 = vmul.f32 %v2949_v42, %v1590_v21 }
 0x394   : > { %v2953_v43 = vpop.eup %2952  ;;  %v1596_v48 = vmul.f32 %v2951_v57, %v1592_v47 }
 0x395   : > { %v2955_v44 = vpop.eup %2954  ;;  %v1597_v55 = vmul.f32 %v2953_v43, %v1593_v52 }
 0x396   : > { %v1595_v29 = vmul.f32 %v2955_v44, %v1591_v46 }
 0x399   : > { %1625 = vperm.xlu1 %2938, %v2949_v42   ;;  %v1993_v42 = vld [vmem:[%s3523_s6 + $0x18] sm:$0xff] }
 0x39d   : > { %1635 = vperm.xlu1 %2938, %v2951_v57  }
 0x3a1   : > { %1640 = vperm.xlu1 %2938, %v2953_v43  }
 0x3a2   : > { %1630 = vperm.xlu0 %2939, %v2955_v44  }
 0x400   : > { %v1600_v27 = vpop.xlane.xlu1 %1599 }
 0x401   : > { %v1610_v26 = vadd.f32 %v1600_v27, %v1594_v25 }
 0x403   : > { %1615 = vst.msk [vmem:[#allocation4] sm:$0xff] %vm824_vm3, %v1610_v26 }
 0x404   : > { %v1603_v17 = vpop.xlane.xlu0 %1602 }
 0x405   : > { %v1611_v20 = vadd.f32 %v1603_v17, %v1595_v29 }
 0x407   : > { %1616 = vst.msk [vmem:[#allocation4 + $0x8] sm:$0xff] %vm824_vm3, %v1611_v20 }
 0x40a   : > { %v1958_v23 = vld [vmem:[#allocation4] sm:$0xff] }
 0x40b   : > { %2956 = vrcp.f32 %v1958_v23 }
 0x40e   : > { %v1959_v22 = vld [vmem:[#allocation4 + $0x8] sm:$0xff] }
 0x40f   : > { %2958 = vrcp.f32 %v1959_v22 }
 0x415   : > { %v2957_v49 = vpop.eup %2956  ;;  %v1606_v51 = vpop.xlane.xlu1 %1605 }
 0x416   : > { %v1612_v53 = vadd.f32 %v1606_v51, %v1596_v48  ;;  %1968 = vperm.xlu0 %2939, %v2957_v49  }
 0x418   : > { %1617 = vst.msk [vmem:[#allocation4 + $0x10] sm:$0xff] %vm824_vm3, %v1612_v53 }
 0x419   : > { %v2959_v56 = vpop.eup %2958  ;;  %v1609_v58 = vpop.xlane.xlu0 %1608 }
 0x41a   : > { %v1613_v59 = vadd.f32 %v1609_v58, %v1597_v55  ;;  %1973 = vperm.xlu1 %2938, %v2959_v56   ;;  %v1626_v2 = vpop.permute.xlu1 %1625 }
 0x41b   : > { %v1643_v11 = vmul.f32 %v1626_v2, %v1619_v5  ;;  %v2332_v2 = vld [vmem:[%s3525_s8] sm:$0xff] }
 0x41c   : > { %1618 = vst.msk [vmem:[#allocation4 + $0x18] sm:$0xff] %vm824_vm3, %v1613_v59 }
 0x41e   : > { %v1636_v4 = vpop.permute.xlu1 %1635 }
 0x41f   : > { %v1960_v61 = vld [vmem:[#allocation4 + $0x10] sm:$0xff]  ;;  %v1645_v32 = vmul.f32 %v1636_v4, %v1621_v13  ;;  %v2333_v4 = vld [vmem:[%s3525_s8 + $0x8] sm:$0xff] }
 0x420   : > { %2960 = vrcp.f32 %v1960_v61  ;;  %v2874_v5 = vpack.c.bf16 %v2333_v4, %v2332_v2 }
 0x421   : > { %v1631_v9 = vpop.permute.xlu0 %1630 }
 0x422   : > { %v1641_v12 = vpop.permute.xlu1 %1640  ;;  %v1644_v8 = vmul.f32 %v1631_v9, %v1620_v7  ;;  %v2335_v7 = vld [vmem:[%s3525_s8 + $0x18] sm:$0xff] }
 0x423   : > { %v1961_v62 = vld [vmem:[#allocation4 + $0x18] sm:$0xff]  ;;  %v1646_v63 = vmul.f32 %v1641_v12, %v1622_v24  ;;  %v2418_v12 = vld [vmem:[%s3527_s10 + $0x8] sm:$0xff]  ;;  %v2421_v24 = vld [vmem:[%s3527_s10 + $0x20] sm:$0xff] }
 0x424   : > { %2962 = vrcp.f32 %v1961_v62 }
 0x42a   : > { %v2961_v0 = vpop.eup %2960 }
 0x42b   : > { %1978 = vperm.xlu0 %2939, %v2961_v0  }
 0x42e   : > { %v2963_v1 = vpop.eup %2962 }
 0x42f   : > { %1983 = vperm.xlu1 %2938, %v2963_v1  }
 0x459   : > { %v1716_v15 = vpop.f32.mrb[10].mxu0  ;;  %v1789_v19 = vpop.f32.mrb[2].mxu1 }
 0x45a   : > { %v1939_v28 = vadd.f32 %v1716_v15, %v1643_v11  ;;  %v1940_v30 = vadd.f32 %v1789_v19, %v1644_v8  ;;  %v2779_v45 = vpop.f32.mrb[11].mxu0  ;;  %v2784_v31 = vpop.f32.mrb[3].mxu1  ;;  %v2417_v11 = vld [vmem:[%s3527_s10] sm:$0xff]  ;;  %v2419_v8 = vld [vmem:[%s3527_s10 + $0x10] sm:$0xff]  ;;  %v2420_v15 = vld [vmem:[%s3527_s10 + $0x18] sm:$0xff] }
 0x45b   : > { %v2880_v13 = vpack.c.bf16 %v2418_v12, %v2417_v11  ;;  %v2883_v19 = vpack.c.bf16 %v2420_v15, %v2419_v8  ;;  %v2423_v45 = vld [vmem:[%s3527_s10 + $0x30] sm:$0xff]  ;;  %v2424_v31 = vld [vmem:[%s3527_s10 + $0x38] sm:$0xff] }
 0x45c   : > { %1943 = vst.msk [vmem:[#allocation5] sm:$0xff] %vm819_vm2, %v1939_v28  ;;  %1944 = vst.msk [vmem:[#allocation5 + $0x8] sm:$0xff] %vm819_vm2, %v1940_v30  ;;  %v2422_v28 = vld [vmem:[%s3527_s10 + $0x28] sm:$0xff] }
 0x45d   : > { %v1862_v33 = vpop.f32.mrb[12].mxu0  ;;  %v2886_v30 = vpack.c.bf16 %v2422_v28, %v2421_v24 }
 0x45e   : > { %v1941_v35 = vadd.f32 %v1862_v33, %v1645_v32  ;;  %v1935_v36 = vpop.f32.mrb[4].mxu1  ;;  %v2789_v37 = vpop.f32.mrb[13].mxu0  ;;  %v2889_v32 = vpack.c.bf16 %v2424_v31, %v2423_v45  ;;  %v2426_v33 = vld [vmem:[%s3527_s10 + $0x48] sm:$0xff] }
 0x45f   : > { %v1942_v34 = vadd.f32 %v1935_v36, %v1646_v63  ;;  %v2794_v38 = vpop.f32.mrb[5].mxu1  ;;  %v2425_v63 = vld [vmem:[%s3527_s10 + $0x40] sm:$0xff]  ;;  %v2427_v36 = vld [vmem:[%s3527_s10 + $0x50] sm:$0xff]  ;;  %v2428_v37 = vld [vmem:[%s3527_s10 + $0x58] sm:$0xff] }
 0x460   : > { %1945 = vst.msk [vmem:[#allocation5 + $0x10] sm:$0xff] %vm819_vm2, %v1941_v35  ;;  %v2892_v35 = vpack.c.bf16 %v2426_v33, %v2425_v63  ;;  %v2429_v38 = vld [vmem:[%s3527_s10 + $0x60] sm:$0xff] }
 0x461   : > { %1946 = vst.msk [vmem:[#allocation5 + $0x18] sm:$0xff] %vm819_vm2, %v1942_v34  ;;  %v2895_v34 = vpack.c.bf16 %v2428_v37, %v2427_v36 }
 0x463   : > { %v1954_v40 = vld [vmem:[#allocation5] sm:$0xff]  ;;  %v1955_v16 = vld [vmem:[#allocation5 + $0x8] sm:$0xff] }
 0x467   : > { %v1956_v43 = vld [vmem:[#allocation5 + $0x10] sm:$0xff] }
 0x468   : > { %v1957_v21 = vld [vmem:[#allocation5 + $0x18] sm:$0xff] }
 0x495   : > { %v1969_v41 = vpop.permute.xlu0 %1968 }
 0x496   : > { %v1986_v39 = vmul.f32 %v1969_v41, %v1954_v40  ;;  %v2430_v41 = vld [vmem:[%s3527_s10 + $0x68] sm:$0xff] }
 0x497   : > { %v2898_v40 = vpack.c.bf16 %v2430_v41, %v2429_v38 }
 0x498   : > { %2798 = vmatmul.mubr.msk.f32.vlgmr.msra.gmra.mrb[14].mxu0 %vm819_vm2, %v1986_v39 }
 0x499   : > { %v1974_v14 = vpop.permute.xlu1 %1973  ;;  %2806 = vmatpush3.msra.mxu0 %v1992_v50  ;;  %2807 = vmatprep.mubr.msk.f32.mxu0 %vm2993_vm0, %v2994_v6 }
 0x49a   : > { %v1987_v18 = vmul.f32 %v1974_v14, %v1955_v16  ;;  %2873 = vmatprep.subr.bf16.mxu0 %v2992_v3 }
 0x49c   : > { %2803 = vmatmul.mubr.msk.f32.vlgmr.msra.gmra.mrb[6].mxu1 %vm819_vm2, %v1987_v18  ;;  %v2668_v18 = vld [vmem:[%s3529_s12] ss:$0 sm:$0xff] }
 0x49d   : > { %2811 = vmatpush3.msra.mxu1 %v1993_v42  ;;  %2812 = vmatprep.mubr.msk.f32.mxu1 %vm2993_vm0, %v2994_v6 }
 0x49e   : > { %2879 = vmatprep.subr.bf16.mxu1 %v2992_v3 }
 0x4aa   : > { %v1979_v57 = vpop.permute.xlu0 %1978 }
 0x4ab   : > { %v1988_v44 = vmul.f32 %v1979_v57, %v1956_v43  ;;  %v2669_v57 = vld [vmem:[%s3530_s13] ss:$0 sm:$0xff] }
 0x4ad   : > { %2808 = vmatmul.mubr.msk.f32.vlgmr.msra.gmra.mrb[16].mxu0 %vm819_vm2, %v1988_v44 }
 0x4ae   : > { %v1984_v25 = vpop.permute.xlu1 %1983  ;;  %2823 = vmatprep.mubr.msk.f32.mxu0 %vm2993_vm0, %v2994_v6  ;;  %2875 = vmatpush3.bf16.msra.mxu0 %v2874_v5 }
 0x4af   : > { %v1989_v27 = vmul.f32 %v1984_v25, %v1957_v21  ;;  %2876 = vmatprep.subr.bf16.mxu0 %v2992_v3  ;;  %v2432_v21 = vld [vmem:[%s3527_s10 + $0x78] sm:$0xff] }
 0x4b1   : > { %2813 = vmatmul.mubr.msk.f32.vlgmr.msra.gmra.mrb[8].mxu1 %vm819_vm2, %v1989_v27  ;;  %v2670_v27 = vld [vmem:[%s3526_s9] ss:$0 sm:$0xff] }
 0x4b2   : > { %2858 = vmatprep.mubr.msk.f32.mxu1 %vm2993_vm0, %v2994_v6  ;;  %v2667_v6 = vld [vmem:[%s3524_s7] ss:$0 sm:$0xff]  ;;  %2881 = vmatpush3.bf16.msra.mxu1 %v2880_v13 }
 0x4b3   : > { %2882 = vmatprep.subr.bf16.mxu1 %v2992_v3 }
 0x4b6   : > { %2884 = vmatpush3.bf16.msra.mxu1 %v2883_v19 }
 0x4b7   : > { %2885 = vmatprep.subr.bf16.mxu1 %v2992_v3 }
 0x4ba   : > { %2887 = vmatpush3.bf16.msra.mxu1 %v2886_v30 }
 0x4bb   : > { %2888 = vmatprep.subr.bf16.mxu1 %v2992_v3 }
 0x4be   : > { %2890 = vmatpush3.bf16.msra.mxu1 %v2889_v32 }
 0x4bf   : > { %2891 = vmatprep.subr.bf16.mxu1 %v2992_v3 }
 0x4c2   : > { %2893 = vmatpush3.bf16.msra.mxu1 %v2892_v35 }
 0x4c3   : > { %2894 = vmatprep.subr.bf16.mxu1 %v2992_v3 }
 0x4c6   : > { %2896 = vmatpush3.bf16.msra.mxu1 %v2895_v34 }
 0x4c7   : > { %2897 = vmatprep.subr.bf16.mxu1 %v2992_v3 }
 0x4ca   : > { %2899 = vmatpush3.bf16.msra.mxu1 %v2898_v40 }
 0x4cb   : > { %2900 = vmatprep.subr.bf16.mxu1 %v2992_v3  ;;  %v2431_v3 = vld [vmem:[%s3527_s10 + $0x70] sm:$0xff] }
 0x4cc   : > { %v2901_v25 = vpack.c.bf16 %v2432_v21, %v2431_v3 }
 0x4ce   : > { %2902 = vmatpush3.bf16.msra.mxu1 %v2901_v25 }
 0x56b   : > { %v2063_v46 = vpop.f32.mrb[14].mxu0 }
 0x56c   : > { %v2799_v26 = vpop.f32.mrb[15].mxu0  ;;  %v2286_v17 = vsel %vm599_vm1, %v2063_v46, 0.0 }
 0x56f   : > { %v2136_v29 = vpop.f32.mrb[6].mxu1 }
 0x570   : > { %v2287_v20 = vsel %vm599_vm1, %v2136_v29, 0.0  ;;  %v2804_v23 = vpop.f32.mrb[7].mxu1 }
 0x571   : > { %v2288_v22 = vadd.f32 %v2287_v20, %v2286_v17  ;;  %v2672_v20 = vld [vmem:[%s3528_s11] ss:$0 sm:$0xff] }
 0x580   : > { %v2209_v47 = vpop.f32.mrb[16].mxu0 }
 0x581   : > { %v2289_v48 = vsel %vm599_vm1, %v2209_v47, 0.0  ;;  %v2809_v49 = vpop.f32.mrb[17].mxu0 }
 0x582   : > { %v2290_v51 = vadd.f32 %v2289_v48, %v2288_v22 }
 0x584   : > { %v2282_v52 = vpop.f32.mrb[8].mxu1 }
 0x585   : > { %v2291_v53 = vsel %vm599_vm1, %v2282_v52, 0.0  ;;  %v2814_v54 = vpop.f32.mrb[9].mxu1 }
 0x586   : > { %v2292_v55 = vadd.f32 %v2291_v53, %v2290_v51 }
 0x588   : > { %v2300_v56 = vadd.f32 %v2667_v6, %v2292_v55 }
 0x58a   : > { %v2301_v58 = vadd.f32 %v2300_v56, %v3137_v10  ;;  %v2334_v10 = vld [vmem:[%s3525_s8 + $0x10] sm:$0xff] }
 0x58b   : > { %v2877_v9 = vpack.c.bf16 %v2335_v7, %v2334_v10 }
 0x58c   : > { %v2304_v59 = vsel %vm599_vm1, %v2301_v58, 0.0 }
 0x58d   : > { %2305 = vadd.xlane.f32.xlu0 %v2304_v59  ;;  %2878 = vmatpush3.bf16.msra.mxu0 %v2877_v9 }
 0x61a   : > { %v2306_v60 = vpop.xlane.xlu0 %2305 }
 0x61b   : > { %v2308_v61 = vmul.f32 0.03125, %v2306_v60  ;;  %v2673_v60 = vld [vmem:[%s3531_s14] ss:$0 sm:$0xff] }
 0x61d   : > { %v2309_v62 = vsub.f32 %v2301_v58, %v2308_v61 }
 0x61f   : > { %v2310_v0 = vmul.f32 %v2309_v62, %v2309_v62 }
 0x621   : > { %v2311_v1 = vsel %vm599_vm1, %v2310_v0, 0.0 }
 0x622   : > { %2312 = vadd.xlane.f32.xlu1 %v2311_v1 }
 0x6af   : > { %v2313_v39 = vpop.xlane.xlu1 %2312 }
 0x6b0   : > { %v2314_v50 = vmul.f32 0.03125, %v2313_v39 }
 0x6b2   : > { %v2315_v14 = vadd.f32 1e-05, %v2314_v50 }
 0x6b4   : > { %2964 = vrsqrt.f32 %v2315_v14 }
 0x6be   : > { %v2965_v16 = vpop.eup %2964 }
 0x6bf   : > { %v2317_v42 = vmul.f32 %v2965_v16, %v2309_v62  ;;  %v2674_v62 = vld [vmem:[%s3532_s15] ss:$0 sm:$0xff] }
 0x6c1   : > { %v2324_v43 = vmul.f32 %v2668_v18, %v2317_v42 }
 0x6c3   : > { %v2331_v44 = vadd.f32 %v2669_v57, %v2324_v43 }
 0x6c5   : > { %2824 = vmatmul.mubr.msk.f32.vlgmr.msra.gmra.mrb[18].mxu0 %vm599_vm1, %v2331_v44 }
 0x798   : > { %v2412_v46 = vpop.f32.mrb[18].mxu0 }
 0x799   : > { %v2413_v26 = vadd.f32 %v2670_v27, %v2412_v46  ;;  %v2825_v29 = vpop.f32.mrb[19].mxu0 }
 0x79b   : > { %v2416_v17 = vmax.f32 %v2413_v26, 0.0 }
 0x79d   : > { %2859 = vmatmul.mubr.f32.vlgmr.msra.gmra.mrb[10].mxu1 %v2416_v17 }
 0x870   : > { %v2506_v23 = vpop.f32.mrb[10].mxu1 }
 0x871   : > { %v2507_v22 = vadd.f32 %v2672_v20, %v2506_v23  ;;  %v2860_v47 = vpop.f32.mrb[11].mxu1 }
 0x873   : > { %v2510_v48 = vadd.f32 %v2507_v22, %v2331_v44 }
 0x875   : > { %v2513_v49 = vsel %vm599_vm1, %v2510_v48, 0.0 }
 0x876   : > { %2514 = vadd.xlane.f32.xlu0 %v2513_v49 }
 0x903   : > { %v2515_v51 = vpop.xlane.xlu0 %2514 }
 0x904   : > { %v2516_v52 = vmul.f32 0.03125, %v2515_v51 }
 0x906   : > { %v2517_v53 = vsub.f32 %v2510_v48, %v2516_v52 }
 0x908   : > { %v2518_v6 = vmul.f32 %v2517_v53, %v2517_v53 }
 0x90a   : > { %v2519_v54 = vsel %vm599_vm1, %v2518_v6, 0.0 }
 0x90b   : > { %2520 = vadd.xlane.f32.xlu0 %v2519_v54 }
 0x998   : > { %v2521_v55 = vpop.xlane.xlu0 %2520 }
 0x999   : > { %v2522_v56 = vmul.f32 0.03125, %v2521_v55 }
 0x99b   : > { %v2523_v58 = vadd.f32 1e-05, %v2522_v56 }
 0x99d   : > { %2966 = vrsqrt.f32 %v2523_v58 }
 0x9a7   : > { %v2967_v59 = vpop.eup %2966 }
 0x9a8   : > { %v2525_v61 = vmul.f32 %v2967_v59, %v2517_v53 }
 0x9aa   : > { %v2532_v0 = vmul.f32 %v2673_v60, %v2525_v61 }
 0x9ac   : > { %v2539_v1 = vadd.f32 %v2674_v62, %v2532_v0 }
 0x9ae   : > { %2540 = vst.msk [vmem:[%s582_s18] sm:$0xff] %vm599_vm1, %v2539_v1 }
 0x9af PF: > { %s26_s23 = sadd.s32 1, %s2990_s23   ;;  %s3536_s21 = smov %s2986_s22 }
 0x9b0   : > { %p23_p5 = scmp.ge.s32.totalorder %s26_s23, 4   ;;  %s3537_s22 = smov %s3539_s24 }
 0x9b2   :  { %25 = sbr.rel (!%p23_p5) target bundleno = 2 (0x2), region = 125 }

</bundles_post_ra>
